<compile_context>
chip_gen: v6e
topology: v6e:2x2x1
jax: 0.10.0
libtpu: 0.0.40
codegen_flags: <defaults>
</compile_context>

<pallas_src>
import functools
import numpy as np
import jax
import jax.numpy as jnp
from jax.experimental import pallas as pl
from jax.experimental.pallas import tpu as pltpu

# ---------------- configuration (small, consistent with the module) ----------
B = 2          # batch
L = 512        # tokens per example
DIM = 32       # in_features == out_features
HIDDEN = 128   # hidden_features (mlp_ratio = 4)

_SQRT_2_OVER_PI = 0.7978845608028654


def _num_tensorcores():
    """v7x has 2 TensorCores per chip; v5e/v6e have 1.  Fall back to 1."""
    try:
        kind = jax.devices()[0].device_kind.lower()
        if "v7" in kind:
            return 2
    except Exception:
        pass
    return 1


def _gelu_tanh(x):
    # tanh-approximate GELU; tanh lowers to the EUP (separate bundle slot).
    return 0.5 * x * (1.0 + jnp.tanh(_SQRT_2_OVER_PI * (x + 0.044715 * x * x * x)))


# ---------------- Pallas kernel: fused fc1 + GELU + fc2 ----------------------
def mlp_kernel(x_ref, w1_ref, b1_ref, w2_ref, b2_ref, o_ref):
    # fc1: bf16 (TILE_M, DIM) @ bf16 (DIM, HIDDEN) -> f32 accumulate
    h = jnp.dot(x_ref[...], w1_ref[...], preferred_element_type=jnp.float32)
    h = h + b1_ref[...]
    h = _gelu_tanh(h)                          # (TILE_M, HIDDEN), f32
    # dropout(p=0.0) is identity
    h = h.astype(jnp.bfloat16)                 # bf16 operand for the 2nd MXU pass
    o = jnp.dot(h, w2_ref[...], preferred_element_type=jnp.float32)
    o = o + b2_ref[...]
    o_ref[...] = o.astype(o_ref.dtype)         # (TILE_M, DIM)


# ---------------- one-time parameter prep (hoisted out of the hot path) ------
def prep_params(w1, b1, w2, b2):
    """PyTorch (out, in) weights -> (in, out) bf16; biases -> (1, N) f32."""
    return (w1.T.astype(jnp.bfloat16),
            b1.reshape(1, -1).astype(jnp.float32),
            w2.T.astype(jnp.bfloat16),
            b2.reshape(1, -1).astype(jnp.float32))


# ---------------- jitted pallas wrapper ---------------------------------------
@functools.partial(jax.jit, static_argnames=("tile_m",))
def _mlp_pallas_flat(xf, w1t, b1r, w2t, b2r, *, tile_m):
    M, d_in = xf.shape
    d_hidden = w1t.shape[1]
    d_out = w2t.shape[1]
    xb = xf.astype(jnp.bfloat16)

    full = lambda shape: pl.BlockSpec(shape, lambda i: (0,) * len(shape))
    return pl.pallas_call(
        mlp_kernel,
        out_shape=jax.ShapeDtypeStruct((M, d_out), xf.dtype),
        grid=(M // tile_m,),
        in_specs=[
            pl.BlockSpec((tile_m, d_in), lambda i: (i, 0)),
            full((d_in, d_hidden)),
            full((1, d_hidden)),
            full((d_hidden, d_out)),
            full((1, d_out)),
        ],
        out_specs=pl.BlockSpec((tile_m, d_out), lambda i: (i, 0)),
        compiler_params=pltpu.CompilerParams(dimension_semantics=("parallel",)),
    )(xb, w1t, b1r, w2t, b2r)


def mlp_pallas(x, prepped_params, *, tile_m=None):
    """x: (..., in_features); prepped_params from prep_params()."""
    w1t, b1r, w2t, b2r = prepped_params
    d_in = w1t.shape[0]
    d_out = w2t.shape[1]

    xf = x.reshape(-1, d_in)
    M = xf.shape[0]
    if tile_m is None:
        ntc = _num_tensorcores()
        # one grid step per TensorCore (1 on v5e/v6e, 2 on v7x)
        tile_m = M if (ntc <= 1 or M % ntc != 0) else M // ntc
    assert M % tile_m == 0 and tile_m % 8 == 0, "row count must tile cleanly"

    out = _mlp_pallas_flat(xf, w1t, b1r, w2t, b2r, tile_m=tile_m)
    return out.reshape(*x.shape[:-1], d_out)


# ---------------- pure-JAX reference (mirrors the PyTorch forward) ------------
def mlp_ref(x, w1, b1, w2, b2):
    h = x @ w1.T + b1
    h = jax.nn.gelu(h, approximate=False)      # nn.GELU() default (erf-based)
    # dropout(p=0.0) is identity
    return h @ w2.T + b2


# ---------------- main ---------------------------------------------------------
if __name__ == "__main__":
    key = jax.random.PRNGKey(0)
    ks = jax.random.split(key, 5)
    init = lambda k, s, sc=0.05: sc * jax.random.normal(k, s, jnp.float32)

    w1 = init(ks[0], (HIDDEN, DIM))            # PyTorch nn.Linear layout (out, in)
    b1 = init(ks[1], (HIDDEN,), 0.02)
    w2 = init(ks[2], (DIM, HIDDEN))
    b2 = init(ks[3], (DIM,), 0.02)
    x = jax.random.normal(ks[4], (B, L, DIM), jnp.float32)

    # One-time parameter prep (transpose + bf16 cast), kept out of the hot path.
    prepped = jax.tree_util.tree_map(jax.block_until_ready,
                                     prep_params(w1, b1, w2, b2))

    out = jax.block_until_ready(mlp_pallas(x, prepped))
    ref = jax.block_until_ready(mlp_ref(x, w1, b1, w2, b2))

    assert out.shape == (B, L, DIM)
    np.testing.assert_allclose(np.asarray(out), np.asarray(ref), rtol=2e-2, atol=2e-2)
    print("KERNEL_OK")
</pallas_src>

<mosaic_0001>
module attributes {stable_mosaic.version = 11 : i64} {
  func.func @mlp_kernel(%arg0: i32, %arg1: memref<1024x32xbf16, #tpu.memory_space<vmem>>, %arg2: memref<32x128xbf16, #tpu.memory_space<vmem>>, %arg3: memref<1x128xf32, #tpu.memory_space<vmem>>, %arg4: memref<128x32xbf16, #tpu.memory_space<vmem>>, %arg5: memref<1x32xf32, #tpu.memory_space<vmem>>, %arg6: memref<1024x32xf32, #tpu.memory_space<vmem>>) attributes {dimension_semantics = [#tpu.dimension_semantics<parallel>], iteration_bounds = array<i64: 1>, scalar_prefetch = 0 : i64, scratch_operands = 0 : i64, tpu.core_type = #tpu.core_type<tc>, window_params = [{transform_indices = @transform_0, window_bounds = array<i64: 1024, 32>}, {pipeline_mode = #tpu.pipeline_mode<synchronous>, transform_indices = @transform_1, window_bounds = array<i64: 32, 128>}, {pipeline_mode = #tpu.pipeline_mode<synchronous>, transform_indices = @transform_2, window_bounds = array<i64: 1, 128>}, {pipeline_mode = #tpu.pipeline_mode<synchronous>, transform_indices = @transform_3, window_bounds = array<i64: 128, 32>}, {pipeline_mode = #tpu.pipeline_mode<synchronous>, transform_indices = @transform_4, window_bounds = array<i64: 1, 32>}, {transform_indices = @transform_5, window_bounds = array<i64: 1024, 32>}]} {
    %c0 = arith.constant 0 : index
    %c0_0 = arith.constant 0 : index
    %0 = vector.load %arg1[%c0, %c0_0] : memref<1024x32xbf16, #tpu.memory_space<vmem>>, vector<1024x32xbf16>
    %c0_1 = arith.constant 0 : index
    %c0_2 = arith.constant 0 : index
    %1 = vector.load %arg2[%c0_1, %c0_2] : memref<32x128xbf16, #tpu.memory_space<vmem>>, vector<32x128xbf16>
    %cst = arith.constant dense<0.000000e+00> : vector<1024x128xf32>
    %2 = tpu.matmul %0, %1, %cst {dimension_numbers = #tpu.dot_dimension_numbers<[1], [0], [0], [1], [0, 0, 1, 1], [], []>} : vector<1024x32xbf16>, vector<32x128xbf16>, vector<1024x128xf32> -> vector<1024x128xf32>
    %c0_3 = arith.constant 0 : index
    %c0_4 = arith.constant 0 : index
    %3 = vector.load %arg3[%c0_3, %c0_4] : memref<1x128xf32, #tpu.memory_space<vmem>>, vector<1x128xf32>
    %4 = vector.broadcast %3 : vector<1x128xf32> to vector<1024x128xf32>
    %5 = arith.addf %2, %4 : vector<1024x128xf32>
    %cst_5 = arith.constant 5.000000e-01 : f32
    %6 = vector.broadcast %cst_5 : f32 to vector<1024x128xf32>
    %7 = arith.mulf %6, %5 : vector<1024x128xf32>
    %cst_6 = arith.constant 4.471500e-02 : f32
    %8 = vector.broadcast %cst_6 : f32 to vector<1024x128xf32>
    %9 = arith.mulf %8, %5 : vector<1024x128xf32>
    %10 = arith.mulf %9, %5 : vector<1024x128xf32>
    %11 = arith.mulf %10, %5 : vector<1024x128xf32>
    %12 = arith.addf %5, %11 : vector<1024x128xf32>
    %cst_7 = arith.constant 0.797884583 : f32
    %13 = vector.broadcast %cst_7 : f32 to vector<1024x128xf32>
    %14 = arith.mulf %13, %12 : vector<1024x128xf32>
    %15 = math.tanh %14 : vector<1024x128xf32>
    %cst_8 = arith.constant 1.000000e+00 : f32
    %16 = vector.broadcast %cst_8 : f32 to vector<1024x128xf32>
    %17 = arith.addf %16, %15 : vector<1024x128xf32>
    %18 = arith.mulf %7, %17 : vector<1024x128xf32>
    %19 = arith.truncf %18 : vector<1024x128xf32> to vector<1024x128xbf16>
    %c0_9 = arith.constant 0 : index
    %c0_10 = arith.constant 0 : index
    %20 = vector.load %arg4[%c0_9, %c0_10] : memref<128x32xbf16, #tpu.memory_space<vmem>>, vector<128x32xbf16>
    %cst_11 = arith.constant dense<0.000000e+00> : vector<1024x32xf32>
    %21 = tpu.matmul %19, %20, %cst_11 {dimension_numbers = #tpu.dot_dimension_numbers<[1], [0], [0], [1], [0, 0, 1, 1], [], []>} : vector<1024x128xbf16>, vector<128x32xbf16>, vector<1024x32xf32> -> vector<1024x32xf32>
    %c0_12 = arith.constant 0 : index
    %c0_13 = arith.constant 0 : index
    %22 = vector.load %arg5[%c0_12, %c0_13] : memref<1x32xf32, #tpu.memory_space<vmem>>, vector<1x32xf32>
    %23 = vector.broadcast %22 : vector<1x32xf32> to vector<1024x32xf32>
    %24 = arith.addf %21, %23 : vector<1024x32xf32>
    %c0_14 = arith.constant 0 : index
    %c0_15 = arith.constant 0 : index
    %25 = vector.load %arg6[%c0_14, %c0_15] : memref<1024x32xf32, #tpu.memory_space<vmem>>, vector<1024x32xf32>
    tpu.vector_store %arg6[%c0_14, %c0_15], %24 {strides = array<i32>} : memref<1024x32xf32, #tpu.memory_space<vmem>>, vector<1024x32xf32>,
    return
  }
  func.func @transform_0(%arg0: i32) -> (i32, i32) {
    %c0_i32 = arith.constant 0 : i32
    %c0_i32_0 = arith.constant 0 : i32
    return %arg0, %c0_i32 : i32, i32
  }
  func.func @transform_1(%arg0: i32) -> (i32, i32) {
    %c0_i32 = arith.constant 0 : i32
    %c0_i32_0 = arith.constant 0 : i32
    %c0_i32_1 = arith.constant 0 : i32
    return %c0_i32, %c0_i32_0 : i32, i32
  }
  func.func @transform_2(%arg0: i32) -> (i32, i32) {
    %c0_i32 = arith.constant 0 : i32
    %c0_i32_0 = arith.constant 0 : i32
    %c0_i32_1 = arith.constant 0 : i32
    return %c0_i32, %c0_i32_0 : i32, i32
  }
  func.func @transform_3(%arg0: i32) -> (i32, i32) {
    %c0_i32 = arith.constant 0 : i32
    %c0_i32_0 = arith.constant 0 : i32
    %c0_i32_1 = arith.constant 0 : i32
    return %c0_i32, %c0_i32_0 : i32, i32
  }
  func.func @transform_4(%arg0: i32) -> (i32, i32) {
    %c0_i32 = arith.constant 0 : i32
    %c0_i32_0 = arith.constant 0 : i32
    %c0_i32_1 = arith.constant 0 : i32
    return %c0_i32, %c0_i32_0 : i32, i32
  }
  func.func @transform_5(%arg0: i32) -> (i32, i32) {
    %c0_i32 = arith.constant 0 : i32
    %c0_i32_0 = arith.constant 0 : i32
    return %arg0, %c0_i32 : i32, i32
  }
}

</mosaic_0001>

<bundles_post_ra>
// kernel: _mlp_pallas_flat.1
= control target key start
LH: loop header
LB: loop body
LE: loop exit
PB: predicated region body
PF: predicated region fallthrough
CT: control target
= control target key end

     0   :  { %vm492_vm0 = vcmask 261120   ;;  %s6784_s1 = inlined_call_operand.vmem [shape: bf16[32,128], index: 1, kind: input, shape index: {}]   ;;  %s6785_s0 = inlined_call_operand.vmem [shape: bf16[1024,32], index: 0, kind: input, shape index: {}]   ;;  %s6786_s3 = inlined_call_operand.vmem [shape: bf16[128,32], index: 3, kind: input, shape index: {}]   ;;  %s6787_s2 = inlined_call_operand.vmem [shape: f32[1,128], index: 2, kind: input, shape index: {}]   ;;  %s6788_s4 = inlined_call_operand.vmem [shape: f32[1,32], index: 4, kind: input, shape index: {}]   ;;  %s6789_s5 = inlined_call_operand.vmem [shape: f32[1024,32], index: 5, kind: output, shape index: {}]  }
   0x1   :  { %v3764_v0 = vld [vmem:[%s6784_s1 + $0x8] sm:$0xff]   ;;  %v3765_v1 = vld [vmem:[%s6784_s1] sm:$0xff]   ;;  %v3768_v4 = vld [vmem:[%s6785_s0 + $0x10] sm:$0xff]  }
   0x2   :  { %3472 = vmatprep.subr.bf16.mxu0 %v3764_v0  ;;  %v3766_v2 = vld [vmem:[%s6785_s0] sm:$0xff]   ;;  %v3767_v3 = vld [vmem:[%s6785_s0 + $0x8] sm:$0xff]   ;;  %v3769_v5 = vld [vmem:[%s6785_s0 + $0x18] sm:$0xff]  }
   0x3   :  { %3473 = vmatpush3.bf16.msra.mxu0 %v3764_v0  ;;  %3476 = vmatprep.mubr.msk.bf16.mxu0 %vm492_vm0, %v3766_v2  ;;  %v3770_v6 = vld [vmem:[%s6785_s0 + $0x20] sm:$0xff]   ;;  %v3771_v7 = vld [vmem:[%s6785_s0 + $0x28] sm:$0xff]   ;;  %v3772_v8 = vld [vmem:[%s6785_s0 + $0x30] sm:$0xff]  }
   0x4   :  { %3474 = vmatprep.subr.bf16.mxu0 %v3765_v1  ;;  %v3773_v9 = vld [vmem:[%s6785_s0 + $0x38] sm:$0xff]   ;;  %v3774_v10 = vld [vmem:[%s6785_s0 + $0x40] sm:$0xff]   ;;  %v3775_v11 = vld [vmem:[%s6785_s0 + $0x48] sm:$0xff]  }
   0x5   :  { %v3776_v12 = vld [vmem:[%s6785_s0 + $0x50] sm:$0xff]   ;;  %v3777_v13 = vld [vmem:[%s6785_s0 + $0x58] sm:$0xff]   ;;  %v3778_v14 = vld [vmem:[%s6785_s0 + $0x60] sm:$0xff]  }
   0x6   :  { %v3779_v15 = vld [vmem:[%s6785_s0 + $0x68] sm:$0xff]   ;;  %v3780_v16 = vld [vmem:[%s6785_s0 + $0x70] sm:$0xff]   ;;  %v3781_v17 = vld [vmem:[%s6785_s0 + $0x78] sm:$0xff]  }
   0x7   :  { %3475 = vmatpush3.bf16.msra.mxu0 %v3765_v1  ;;  %v3782_v18 = vld [vmem:[%s6785_s0 + $0x80] sm:$0xff]   ;;  %v3783_v19 = vld [vmem:[%s6785_s0 + $0x88] sm:$0xff]   ;;  %v3784_v20 = vld [vmem:[%s6785_s0 + $0x90] sm:$0xff]  }
   0x8   :  { %v3785_v21 = vld [vmem:[%s6785_s0 + $0x98] sm:$0xff]   ;;  %v3786_v22 = vld [vmem:[%s6785_s0 + $0xa0] sm:$0xff]   ;;  %v3787_v23 = vld [vmem:[%s6785_s0 + $0xa8] sm:$0xff]  }
   0x9   :  { %v3788_v24 = vld [vmem:[%s6785_s0 + $0xb0] sm:$0xff]   ;;  %v3820_v25 = vld [vmem:[%s6786_s3 + $0x38] sm:$0xff]   ;;  %v3790_v28 = vld [vmem:[%s6785_s0 + $0xc0] sm:$0xff]  }
   0xa   :  { %3477 = vmatmul.mubr.msk.bf16.vlgmr.msra.gmra.mxu0 %vm492_vm0, %v3767_v3  ;;  %v3789_v26 = vld [vmem:[%s6785_s0 + $0xb8] sm:$0xff]   ;;  %3748 = vmatprep.subr.bf16.mxu1 %v3820_v25  ;;  %v3821_v27 = vld [vmem:[%s6786_s3 + $0x30] sm:$0xff]   ;;  %v3824_v29 = vld [vmem:[%s6786_s3 + $0x28] sm:$0xff]  }
   0xb   :  { %3480 = vmatprep.mubr.msk.bf16.mxu0 %vm492_vm0, %v3768_v4  ;;  %3604 = vmatprep.subr.bf16.mxu0 %v3820_v25  ;;  %v3825_v30 = vld [vmem:[%s6786_s3 + $0x20] sm:$0xff]   ;;  %v3791_v31 = vld [vmem:[%s6785_s0 + $0xc8] sm:$0xff]   ;;  %v3792_v32 = vld [vmem:[%s6785_s0 + $0xd0] sm:$0xff]  }
   0xc   :  { %3756 = vmatpush3.bf16.msra.mxu1 %v3820_v25  ;;  %3605 = vmatpush3.bf16.msra.mxu0 %v3820_v25  ;;  %v3828_v33 = vld [vmem:[%s6786_s3 + $0x18] sm:$0xff]   ;;  %v3829_v34 = vld [vmem:[%s6786_s3 + $0x10] sm:$0xff]   ;;  %v3794_v36 = vld [vmem:[%s6785_s0 + $0xe0] sm:$0xff]  }
   0xd   :  { %3749 = vmatprep.subr.bf16.mxu1 %v3821_v27  ;;  %3606 = vmatprep.subr.bf16.mxu0 %v3821_v27  ;;  %v3793_v35 = vld [vmem:[%s6785_s0 + $0xd8] sm:$0xff]   ;;  %v3832_v37 = vld [vmem:[%s6786_s3 + $0x8] sm:$0xff]   ;;  %v3833_v38 = vld [vmem:[%s6786_s3] sm:$0xff]  }
   0xe   :  { %v3795_v39 = vld [vmem:[%s6785_s0 + $0xe8] sm:$0xff]   ;;  %v3796_v40 = vld [vmem:[%s6785_s0 + $0xf0] sm:$0xff]   ;;  %v3797_v41 = vld [vmem:[%s6785_s0 + $0xf8] sm:$0xff]  }
   0xf   :  { %v3798_v42 = vld [vmem:[%s6785_s0 + $0x100] sm:$0xff]   ;;  %v3799_v43 = vld [vmem:[%s6785_s0 + $0x108] sm:$0xff]   ;;  %v3800_v44 = vld [vmem:[%s6785_s0 + $0x110] sm:$0xff]  }
  0x10   :  { %3757 = vmatpush3.bf16.msra.mxu1 %v3821_v27  ;;  %3607 = vmatpush3.bf16.msra.mxu0 %v3821_v27  ;;  %v3801_v45 = vld [vmem:[%s6785_s0 + $0x118] sm:$0xff]   ;;  %v3802_v46 = vld [vmem:[%s6785_s0 + $0x120] sm:$0xff]   ;;  %v3803_v47 = vld [vmem:[%s6785_s0 + $0x128] sm:$0xff]  }
  0x11   :  { %3750 = vmatprep.subr.bf16.mxu1 %v3824_v29  ;;  %3608 = vmatprep.subr.bf16.mxu0 %v3824_v29  ;;  %v3804_v48 = vld [vmem:[%s6785_s0 + $0x130] sm:$0xff]   ;;  %v3805_v49 = vld [vmem:[%s6785_s0 + $0x138] sm:$0xff]   ;;  %v3806_v50 = vld [vmem:[%s6785_s0 + $0x140] sm:$0xff]  }
  0x12   :  { %3481 = vmatmul.mubr.msk.bf16.gmra.mxu0 %vm492_vm0, %v3769_v5  ;;  %v3807_v51 = vld [vmem:[%s6785_s0 + $0x148] sm:$0xff]   ;;  %v3808_v52 = vld [vmem:[%s6785_s0 + $0x150] sm:$0xff]   ;;  %v3809_v53 = vld [vmem:[%s6785_s0 + $0x158] sm:$0xff]  }
  0x13   :  { %3484 = vmatprep.mubr.msk.bf16.mxu0 %vm492_vm0, %v3770_v6  ;;  %v3810_v54 = vld [vmem:[%s6785_s0 + $0x160] sm:$0xff]   ;;  %v3811_v55 = vld [vmem:[%s6785_s0 + $0x168] sm:$0xff]   ;;  %v3812_v56 = vld [vmem:[%s6785_s0 + $0x170] sm:$0xff]  }
  0x14   :  { %3758 = vmatpush3.bf16.msra.mxu1 %v3824_v29  ;;  %3609 = vmatpush3.bf16.msra.mxu0 %v3824_v29  ;;  %v3813_v57 = vld [vmem:[%s6785_s0 + $0x178] sm:$0xff]   ;;  %v3814_v58 = vld [vmem:[%s6785_s0 + $0x180] sm:$0xff]   ;;  %v3815_v59 = vld [vmem:[%s6785_s0 + $0x188] sm:$0xff]  }
  0x15   :  { %3751 = vmatprep.subr.bf16.mxu1 %v3825_v30  ;;  %3610 = vmatprep.subr.bf16.mxu0 %v3825_v30  ;;  %v3816_v60 = vld [vmem:[%s6785_s0 + $0x190] sm:$0xff]   ;;  %v4363_v61 = vld [vmem:[%s6787_s2] ss:$0 sm:$0xff]  ;;  %v3817_v4 = vld [vmem:[%s6785_s0 + $0x198] sm:$0xff]  }
  0x18   :  { %3759 = vmatpush3.bf16.msra.mxu1 %v3825_v30  ;;  %3611 = vmatpush3.bf16.msra.mxu0 %v3825_v30  ;;  %v3822_v30 = vld [vmem:[%s6785_s0 + $0x1b0] sm:$0xff]  }
  0x19   :  { %3752 = vmatprep.subr.bf16.mxu1 %v3828_v33  ;;  %3612 = vmatprep.subr.bf16.mxu0 %v3828_v33 }
  0x1a   :  { %3485 = vmatmul.mubr.msk.bf16.gmra.mxu0 %vm492_vm0, %v3771_v7 }
  0x1b   :  { %3488 = vmatprep.mubr.msk.bf16.mxu0 %vm492_vm0, %v3772_v8  ;;  %v3818_v8 = vld [vmem:[%s6785_s0 + $0x1a0] sm:$0xff]  }
  0x1c   :  { %3760 = vmatpush3.bf16.msra.mxu1 %v3828_v33  ;;  %3613 = vmatpush3.bf16.msra.mxu0 %v3828_v33 }
  0x1d   :  { %3753 = vmatprep.subr.bf16.mxu1 %v3829_v34  ;;  %3614 = vmatprep.subr.bf16.mxu0 %v3829_v34 }
  0x20   :  { %3761 = vmatpush3.bf16.msra.mxu1 %v3829_v34  ;;  %3615 = vmatpush3.bf16.msra.mxu0 %v3829_v34 }
  0x21   :  { %3754 = vmatprep.subr.bf16.mxu1 %v3832_v37  ;;  %3616 = vmatprep.subr.bf16.mxu0 %v3832_v37 }
  0x22   :  { %3489 = vmatmul.mubr.msk.bf16.gmra.mxu0 %vm492_vm0, %v3773_v9 }
  0x23   :  { %3492 = vmatprep.mubr.msk.bf16.mxu0 %vm492_vm0, %v3774_v10 }
  0x24   :  { %3762 = vmatpush3.bf16.msra.mxu1 %v3832_v37  ;;  %3617 = vmatpush3.bf16.msra.mxu0 %v3832_v37 }
  0x25   :  { %3755 = vmatprep.subr.bf16.mxu1 %v3833_v38  ;;  %3618 = vmatprep.subr.bf16.mxu0 %v3833_v38 }
  0x28   :  { %3763 = vmatpush3.bf16.msra.mxu1 %v3833_v38  ;;  %3619 = vmatpush3.bf16.msra.mxu0 %v3833_v38 }
  0x2a   :  { %3493 = vmatmul.mubr.msk.bf16.gmra.mxu0 %vm492_vm0, %v3775_v11 }
  0x2b   :  { %3496 = vmatprep.mubr.msk.bf16.mxu0 %vm492_vm0, %v3776_v12 }
  0x32   :  { %3497 = vmatmul.mubr.msk.bf16.gmra.mxu0 %vm492_vm0, %v3777_v13 }
  0x33   :  { %3500 = vmatprep.mubr.msk.bf16.mxu0 %vm492_vm0, %v3778_v14 }
  0x3a   :  { %3501 = vmatmul.mubr.msk.bf16.gmra.mxu0 %vm492_vm0, %v3779_v15 }
  0x3b   :  { %3504 = vmatprep.mubr.msk.bf16.mxu0 %vm492_vm0, %v3780_v16 }
  0x42   :  { %3505 = vmatmul.mubr.msk.bf16.gmra.mxu0 %vm492_vm0, %v3781_v17 }
  0x43   :  { %3508 = vmatprep.mubr.msk.bf16.mxu0 %vm492_vm0, %v3782_v18 }
  0x4a   :  { %3509 = vmatmul.mubr.msk.bf16.gmra.mxu0 %vm492_vm0, %v3783_v19 }
  0x4b   :  { %3512 = vmatprep.mubr.msk.bf16.mxu0 %vm492_vm0, %v3784_v20 }
  0x52   :  { %3513 = vmatmul.mubr.msk.bf16.gmra.mxu0 %vm492_vm0, %v3785_v21 }
  0x53   :  { %3516 = vmatprep.mubr.msk.bf16.mxu0 %vm492_vm0, %v3786_v22 }
  0x5a   :  { %3517 = vmatmul.mubr.msk.bf16.gmra.mxu0 %vm492_vm0, %v3787_v23 }
  0x5b   :  { %3520 = vmatprep.mubr.msk.bf16.mxu0 %vm492_vm0, %v3788_v24 }
  0x62   :  { %3521 = vmatmul.mubr.msk.bf16.gmra.mxu0 %vm492_vm0, %v3789_v26  ;;  %v3819_v26 = vld [vmem:[%s6785_s0 + $0x1a8] sm:$0xff]  }
  0x63   :  { %3524 = vmatprep.mubr.msk.bf16.mxu0 %vm492_vm0, %v3790_v28 }
  0x6a   :  { %3525 = vmatmul.mubr.msk.bf16.gmra.mxu0 %vm492_vm0, %v3791_v31 }
  0x6b   :  { %3528 = vmatprep.mubr.msk.bf16.mxu0 %vm492_vm0, %v3792_v32 }
  0x72   :  { %3529 = vmatmul.mubr.msk.bf16.gmra.mxu0 %vm492_vm0, %v3793_v35 }
  0x73   :  { %3532 = vmatprep.mubr.msk.bf16.mxu0 %vm492_vm0, %v3794_v36 }
  0x7a   :  { %3533 = vmatmul.mubr.msk.bf16.gmra.mxu0 %vm492_vm0, %v3795_v39 }
  0x7b   :  { %3536 = vmatprep.mubr.msk.bf16.mxu0 %vm492_vm0, %v3796_v40 }
  0x82   :  { %3537 = vmatmul.mubr.msk.bf16.gmra.mxu0 %vm492_vm0, %v3797_v41 }
  0x83   :  { %3540 = vmatprep.mubr.msk.bf16.mxu0 %vm492_vm0, %v3798_v42 }
  0x8a   :  { %3541 = vmatmul.mubr.msk.bf16.gmra.mxu0 %vm492_vm0, %v3799_v43 }
  0x8b   :  { %3544 = vmatprep.mubr.msk.bf16.mxu0 %vm492_vm0, %v3800_v44 }
  0x92   :  { %3545 = vmatmul.mubr.msk.bf16.gmra.mxu0 %vm492_vm0, %v3801_v45 }
  0x93   :  { %3548 = vmatprep.mubr.msk.bf16.mxu0 %vm492_vm0, %v3802_v46 }
  0x9a   :  { %3549 = vmatmul.mubr.msk.bf16.gmra.mxu0 %vm492_vm0, %v3803_v47 }
  0x9b   :  { %3552 = vmatprep.mubr.msk.bf16.mxu0 %vm492_vm0, %v3804_v48 }
  0xa2   :  { %3553 = vmatmul.mubr.msk.bf16.gmra.mxu0 %vm492_vm0, %v3805_v49 }
  0xa3   :  { %3556 = vmatprep.mubr.msk.bf16.mxu0 %vm492_vm0, %v3806_v50 }
  0xaa   :  { %3557 = vmatmul.mubr.msk.bf16.gmra.mxu0 %vm492_vm0, %v3807_v51 }
  0xab   :  { %3560 = vmatprep.mubr.msk.bf16.mxu0 %vm492_vm0, %v3808_v52 }
  0xb2   :  { %3561 = vmatmul.mubr.msk.bf16.gmra.mxu0 %vm492_vm0, %v3809_v53 }
  0xb3   :  { %3564 = vmatprep.mubr.msk.bf16.mxu0 %vm492_vm0, %v3810_v54 }
  0xba   :  { %3565 = vmatmul.mubr.msk.bf16.gmra.mxu0 %vm492_vm0, %v3811_v55  ;;  %v3823_v55 = vld [vmem:[%s6785_s0 + $0x1b8] sm:$0xff]  }
  0xbb   :  { %3568 = vmatprep.mubr.msk.bf16.mxu0 %vm492_vm0, %v3812_v56 }
  0xc2   :  { %3569 = vmatmul.mubr.msk.bf16.gmra.mxu0 %vm492_vm0, %v3813_v57 }
  0xc3   :  { %3572 = vmatprep.mubr.msk.bf16.mxu0 %vm492_vm0, %v3814_v58 }
  0xca   :  { %v3478_v62 = vpop.f32.mrf.mxu0  ;;  %3573 = vmatmul.mubr.msk.bf16.gmra.mxu0 %vm492_vm0, %v3815_v59 }
  0xcb   :  { %v4367_v63 = vadd.f32 %v3478_v62, %v4363_v61  ;;  %3576 = vmatprep.mubr.msk.bf16.mxu0 %vm492_vm0, %v3816_v60  ;;  %v3826_v62 = vld [vmem:[%s6785_s0 + $0x1c0] sm:$0xff]  }
  0xcc   :  { %v719_v0 = vpop.f32.mrf.mxu0 }
  0xcd   :  { %v1360_v1 = vmul.f32 0.044715, %v4367_v63  ;;  %v4372_v2 = vadd.f32 %v4363_v61, %v719_v0 }
  0xce   :  { %v3479_v3 = vpop.f32.mrf.mxu0 }
  0xcf   :  { %v1488_v5 = vmul.f32 %v1360_v1, %v4367_v63  ;;  %v1358_v6 = vmul.f32 0.044715, %v4372_v2  ;;  %v4380_v7 = vadd.f32 %v3479_v3, %v4363_v61 }
  0xd0   :  { %v722_v9 = vpop.f32.mrf.mxu0 }
  0xd1   :  { %v1616_v10 = vmul.f32 %v1488_v5, %v4367_v63  ;;  %v1486_v11 = vmul.f32 %v1358_v6, %v4372_v2  ;;  %v1361_v12 = vmul.f32 0.044715, %v4380_v7  ;;  %v4389_v13 = vadd.f32 %v4363_v61, %v722_v9 }
  0xd2   :  { %v3482_v14 = vpop.f32.mrf.mxu0  ;;  %3577 = vmatmul.mubr.msk.bf16.gmra.mxu0 %vm492_vm0, %v3817_v4 }
  0xd3   :  { %v1614_v15 = vmul.f32 %v1486_v11, %v4372_v2  ;;  %v1489_v16 = vmul.f32 %v1361_v12, %v4380_v7  ;;  %v4395_v17 = vadd.f32 %v3482_v14, %v4363_v61  ;;  %3580 = vmatprep.mubr.msk.bf16.mxu0 %vm492_vm0, %v3818_v8  ;;  %v1744_v18 = vadd.f32 %v1616_v10, %v4367_v63 }
  0xd4   :  { %v1359_v19 = vmul.f32 0.044715, %v4389_v13  ;;  %v735_v20 = vpop.f32.mrf.mxu0 }
  0xd5   :  { %v1617_v21 = vmul.f32 %v1489_v16, %v4380_v7  ;;  %v1364_v22 = vmul.f32 0.044715, %v4395_v17  ;;  %v4403_v23 = vadd.f32 %v4363_v61, %v735_v20  ;;  %v1742_v31 = vadd.f32 %v1614_v15, %v4372_v2 }
  0xd6   :  { %v1487_v24 = vmul.f32 %v1359_v19, %v4389_v13  ;;  %v3483_v25 = vpop.f32.mrf.mxu0  ;;  %v1872_v32 = vmul.f32 0.7978846, %v1744_v18 }
  0xd7   :  { %v1745_v27 = vadd.f32 %v1617_v21, %v4380_v7  ;;  %v1492_v28 = vmul.f32 %v1364_v22, %v4395_v17  ;;  %v1362_v29 = vmul.f32 0.044715, %v4403_v23  ;;  %v4418_v34 = vadd.f32 %v3483_v25, %v4363_v61 }
  0xd8   :  { %v1615_v33 = vmul.f32 %v1487_v24, %v4389_v13  ;;  %v738_v35 = vpop.f32.mrf.mxu0  ;;  %v1870_v45 = vmul.f32 0.7978846, %v1742_v31  ;;  %v3830_v31 = vld [vmem:[%s6785_s0 + $0x1d0] sm:$0xff]  }
  0xd9   :  { %v1873_v36 = vmul.f32 0.7978846, %v1745_v27  ;;  %v1620_v37 = vmul.f32 %v1492_v28, %v4395_v17  ;;  %v4422_v38 = vadd.f32 %v4363_v61, %v738_v35  ;;  %v1490_v39 = vmul.f32 %v1362_v29, %v4403_v23  ;;  %v3827_v27 = vld [vmem:[%s6785_s0 + $0x1c8] sm:$0xff]  }
  0xda   :  { %v1365_v40 = vmul.f32 0.044715, %v4418_v34  ;;  %v3486_v41 = vpop.f32.mrf.mxu0  ;;  %3581 = vmatmul.mubr.msk.bf16.gmra.mxu0 %vm492_vm0, %v3819_v26  ;;  %v1743_v44 = vadd.f32 %v1615_v33, %v4389_v13 }
  0xdb   :  { %v1363_v42 = vmul.f32 0.044715, %v4422_v38  ;;  %v4429_v43 = vadd.f32 %v3486_v41, %v4363_v61  ;;  %3584 = vmatprep.mubr.msk.bf16.mxu0 %vm492_vm0, %v3822_v30  ;;  %3838 = vtanh.f32 %v1873_v36  ;;  %v1618_v48 = vmul.f32 %v1490_v39, %v4403_v23 }
  0xdc   :  { %v1493_v46 = vmul.f32 %v1365_v40, %v4418_v34  ;;  %v751_v47 = vpop.f32.mrf.mxu0  ;;  %v1748_v49 = vadd.f32 %v1620_v37, %v4395_v17  ;;  %3840 = vtanh.f32 %v1872_v32  ;;  %v1871_v5 = vmul.f32 0.7978846, %v1743_v44 }
  0xdd   :  { %v1368_v50 = vmul.f32 0.044715, %v4429_v43  ;;  %v4438_v51 = vadd.f32 %v4363_v61, %v751_v47  ;;  %v1491_v52 = vmul.f32 %v1363_v42, %v4422_v38  ;;  %v1746_v56 = vadd.f32 %v1618_v48, %v4403_v23 }
  0xde   :  { %v1621_v53 = vmul.f32 %v1493_v46, %v4418_v34  ;;  %v3487_v54 = vpop.f32.mrf.mxu0  ;;  %v1876_v57 = vmul.f32 0.7978846, %v1748_v49  ;;  %3842 = vtanh.f32 %v1870_v45  ;;  %v1232_v40 = vmul.f32 0.5, %v4367_v63 }
  0xdf   :  { %v1496_v58 = vmul.f32 %v1368_v50, %v4429_v43  ;;  %v1366_v59 = vmul.f32 0.044715, %v4438_v51  ;;  %v4449_v60 = vadd.f32 %v3487_v54, %v4363_v61  ;;  %v1619_v0 = vmul.f32 %v1491_v52, %v4422_v38 }
  0xe0   :  { %v754_v1 = vpop.f32.mrf.mxu0  ;;  %v1874_v3 = vmul.f32 0.7978846, %v1746_v56  ;;  %v1749_v4 = vadd.f32 %v1621_v53, %v4418_v34  ;;  %v4500_v63 = vmul.f32 0.5, %v4372_v2 }
  0xe1   :  { %v1624_v6 = vmul.f32 %v1496_v58, %v4429_v43  ;;  %v1494_v8 = vmul.f32 %v1366_v59, %v4438_v51  ;;  %v1369_v9 = vmul.f32 0.044715, %v4449_v60  ;;  %v4460_v10 = vadd.f32 %v4363_v61, %v754_v1  ;;  %v3831_v1 = vld [vmem:[%s6785_s0 + $0x1d8] sm:$0xff]  }
  0xe2   :  { %v3490_v11 = vpop.f32.mrf.mxu0  ;;  %3585 = vmatmul.mubr.msk.bf16.gmra.mxu0 %vm492_vm0, %v3823_v55  ;;  %v1747_v12 = vadd.f32 %v1619_v0, %v4422_v38  ;;  %3844 = vtanh.f32 %v1874_v3  ;;  %v1877_v14 = vmul.f32 0.7978846, %v1749_v4  ;;  %v1236_v58 = vmul.f32 0.5, %v4395_v17 }
  0xe3   :  { %v1622_v15 = vmul.f32 %v1494_v8, %v4438_v51  ;;  %v1497_v16 = vmul.f32 %v1369_v9, %v4449_v60  ;;  %v1367_v18 = vmul.f32 0.044715, %v4460_v10  ;;  %3588 = vmatprep.mubr.msk.bf16.mxu0 %vm492_vm0, %v3826_v62  ;;  %3846 = vtanh.f32 %v1876_v57 }
  0xe4   :  { %v767_v19 = vpop.f32.mrf.mxu0  ;;  %v1875_v20 = vmul.f32 0.7978846, %v1747_v12  ;;  %3848 = vtanh.f32 %v1877_v14  ;;  %v1752_v21 = vadd.f32 %v1624_v6, %v4429_v43  ;;  %v4480_v30 = vadd.f32 %v3490_v11, %v4363_v61 }
  0xe5   :  { %v1625_v22 = vmul.f32 %v1497_v16, %v4449_v60  ;;  %v1495_v24 = vmul.f32 %v1367_v18, %v4460_v10  ;;  %3850 = vtanh.f32 %v1871_v5  ;;  %v4472_v25 = vadd.f32 %v4363_v61, %v767_v19 }
  0xe6   :  { %v3491_v26 = vpop.f32.mrf.mxu0  ;;  %3852 = vtanh.f32 %v1875_v20  ;;  %v1750_v28 = vadd.f32 %v1622_v15, %v4438_v51  ;;  %v1880_v32 = vmul.f32 0.7978846, %v1752_v21  ;;  %v1372_v48 = vmul.f32 0.044715, %v4480_v30 }
  0xe7   :  { %v1623_v29 = vmul.f32 %v1495_v24, %v4460_v10  ;;  %v1370_v33 = vmul.f32 0.044715, %v4472_v25  ;;  %v1753_v37 = vadd.f32 %v1625_v22, %v4449_v60  ;;  %v4492_v44 = vadd.f32 %v3491_v26, %v4363_v61 }
  0xe8   :  { %v770_v35 = vpop.f32.mrf.mxu0  ;;  %v1878_v36 = vmul.f32 0.7978846, %v1750_v28  ;;  %v3839_v39 = vpop.eup %3838  ;;  %v1233_v57 = vmul.f32 0.5, %v4380_v7  ;;  %v4506_v59 = vmul.f32 0.5, %v4389_v13  ;;  %v1234_v3 = vmul.f32 0.5, %v4403_v23  ;;  %v3834_v13 = vld [vmem:[%s6785_s0 + $0x1e0] sm:$0xff]  }
  0xe9   :  { %v4489_v41 = vadd.f32 %v4363_v61, %v770_v35  ;;  %v3841_v42 = vpop.eup %3840  ;;  %v1751_v46 = vadd.f32 %v1623_v29, %v4460_v10  ;;  %v1881_v47 = vmul.f32 0.7978846, %v1753_v37  ;;  %v2129_v50 = vadd.f32 1.0, %v3839_v39 }
  0xea   :  { %v3494_v45 = vpop.f32.mrf.mxu0  ;;  %3589 = vmatmul.mubr.msk.bf16.gmra.mxu0 %vm492_vm0, %v3827_v27  ;;  %3854 = vtanh.f32 %v1878_v36  ;;  %v1498_v52 = vmul.f32 %v1370_v33, %v4472_v25  ;;  %v2128_v56 = vadd.f32 1.0, %v3841_v42  ;;  %v1373_v62 = vmul.f32 0.044715, %v4492_v44 }
  0xeb   :  { %v1371_v49 = vmul.f32 0.044715, %v4489_v41  ;;  %3592 = vmatprep.mubr.msk.bf16.mxu0 %vm492_vm0, %v3830_v31  ;;  %3856 = vtanh.f32 %v1880_v32  ;;  %v1879_v54 = vmul.f32 0.7978846, %v1751_v46  ;;  %v3843_v55 = vpop.eup %3842  ;;  %v1500_v7 = vmul.f32 %v1372_v48, %v4480_v30 }
  0xec   :  { %v783_v53 = vpop.f32.mrf.mxu0  ;;  %3858 = vtanh.f32 %v1881_v47  ;;  %v4516_v17 = vadd.f32 %v3494_v45, %v4363_v61  ;;  %v1235_v5 = vmul.f32 0.5, %v4422_v38  ;;  %v1237_v6 = vmul.f32 0.5, %v4418_v34  ;;  %v3835_v47 = vld [vmem:[%s6785_s0 + $0x1e8] sm:$0xff]  }
  0xed   :  { %v1499_v2 = vmul.f32 %v1371_v49, %v4489_v41  ;;  %3860 = vtanh.f32 %v1879_v54  ;;  %v4523_v9 = vmul.f32 %v2129_v50, %v1233_v57  ;;  %v1626_v23 = vmul.f32 %v1498_v52, %v4472_v25 }
  0xee   :  { %v3495_v0 = vpop.f32.mrf.mxu0  ;;  %v4527_v12 = vmul.f32 0.5, %v4438_v51  ;;  %v4530_v14 = vmul.f32 0.5, %v4429_v43  ;;  %v4532_v16 = vmul.f32 %v2128_v56, %v1232_v40  ;;  %v4535_v18 = vadd.f32 %v4363_v61, %v783_v53 }
  0xef   :  { %v3845_v4 = vpop.eup %3844  ;;  %v4538_v34 = vmul.f32 0.5, %v4460_v10  ;;  %v4541_v38 = vmul.f32 0.5, %v4449_v60  ;;  %v1501_v20 = vmul.f32 %v1373_v62, %v4492_v44  ;;  %v1627_v51 = vmul.f32 %v1499_v2, %v4489_v41 }
  0xf0   :  { %v3847_v8 = vpop.eup %3846  ;;  %v786_v11 = vpop.f32.mrf.mxu0  ;;  %v2130_v43 = vadd.f32 1.0, %v3845_v4  ;;  %v4547_v26 = vmul.f32 %v1500_v7, %v4480_v30  ;;  %v1376_v10 = vmul.f32 0.044715, %v4516_v17  ;;  %v2383_v28 = vpack.c.bf16 %v4523_v9, %v4532_v16 }
  0xf1   :  { %v3849_v15 = vpop.eup %3848  ;;  %v4551_v27 = vadd.f32 %v4363_v61, %v786_v11  ;;  %v2132_v60 = vadd.f32 1.0, %v3847_v8  ;;  %v2126_v32 = vadd.f32 1.0, %v3843_v55  ;;  %v1754_v33 = vadd.f32 %v1626_v23, %v4472_v25  ;;  %v3836_v55 = vld [vmem:[%s6785_s0 + $0x1f0] sm:$0xff]  }
  0xf2   :  { %v3851_v19 = vpop.eup %3850  ;;  %v3498_v21 = vpop.f32.mrf.mxu0  ;;  %3593 = vmatmul.mubr.msk.bf16.gmra.mxu0 %vm492_vm0, %v3831_v1  ;;  %v2133_v22 = vadd.f32 1.0, %v3849_v15  ;;  %v1374_v35 = vmul.f32 0.044715, %v4535_v18  ;;  %v4559_v36 = vadd.f32 %v3495_v0, %v4363_v61  ;;  %v1629_v40 = vmul.f32 %v1501_v20, %v4492_v44 }
  0xf3   :  { %v3853_v24 = vpop.eup %3852  ;;  %3596 = vmatprep.mubr.msk.bf16.mxu0 %vm492_vm0, %v3834_v13  ;;  %v2127_v39 = vadd.f32 1.0, %v3851_v19  ;;  %v2258_v45 = vmul.f32 %v2130_v43, %v1234_v3  ;;  %v1755_v48 = vadd.f32 %v1627_v51, %v4489_v41  ;;  %v1504_v50 = vmul.f32 %v1376_v10, %v4516_v17 }
  0xf4   :  { %v799_v29 = vpop.f32.mrf.mxu0  ;;  %v2131_v31 = vadd.f32 1.0, %v3853_v24  ;;  %v2261_v37 = vmul.f32 %v2133_v22, %v1237_v6  ;;  %v1375_v52 = vmul.f32 0.044715, %v4551_v27  ;;  %v4569_v53 = vadd.f32 %v3498_v21, %v4363_v61 }
  0xf5   :  { %v2260_v54 = vmul.f32 %v2132_v60, %v1236_v58  ;;  %v4575_v57 = vadd.f32 %v4363_v61, %v799_v29  ;;  %v2254_v0 = vmul.f32 %v2126_v32, %v4500_v63  ;;  %v1882_v1 = vmul.f32 0.7978846, %v1754_v33 }
  0xf6   :  { %v3499_v42 = vpop.f32.mrf.mxu0  ;;  %v2259_v46 = vmul.f32 %v2131_v31, %v1235_v5  ;;  %v1502_v4 = vmul.f32 %v1374_v35, %v4535_v18  ;;  %v1377_v7 = vmul.f32 0.044715, %v4559_v36  ;;  %v2255_v58 = vmul.f32 %v2127_v39, %v4506_v59 }
  0xf7   :  { %v3855_v49 = vpop.eup %3854  ;;  %v2385_v13 = vpack.c.bf16 %v2261_v37, %v2260_v54  ;;  %v1883_v23 = vmul.f32 0.7978846, %v1755_v48  ;;  %3862 = vtanh.f32 %v1882_v1  ;;  %v1632_v63 = vmul.f32 %v1504_v50, %v4516_v17 }
  0xf8   :  { %v3857_v56 = vpop.eup %3856  ;;  %v802_v62 = vpop.f32.mrf.mxu0  ;;  %v2384_v2 = vpack.c.bf16 %v2259_v46, %v2258_v45  ;;  %v2134_v6 = vadd.f32 1.0, %v3855_v49  ;;  %v1503_v15 = vmul.f32 %v1375_v52, %v4551_v27  ;;  %v1380_v19 = vmul.f32 0.044715, %v4569_v53 }
  0xf9   :  { %v3859_v3 = vpop.eup %3858  ;;  %v2136_v20 = vadd.f32 1.0, %v3857_v56  ;;  %v1378_v59 = vmul.f32 0.044715, %v4575_v57  ;;  %v4588_v43 = vmul.f32 0.5, %v4472_v25  ;;  %3864 = vtanh.f32 %v1883_v23  ;;  %v3837_v25 = vld [vmem:[%s6785_s0 + $0x1f8] sm:$0xff]  }
  0xfa   :  { %3624 = vmatprep.mubr.bf16.mxu1 %v2384_v2  ;;  %v3502_v5 = vpop.f32.mrf.mxu0  ;;  %3597 = vmatmul.mubr.msk.bf16.gmra.mxu0 %vm492_vm0, %v3835_v47  ;;  %v2137_v8 = vadd.f32 1.0, %v3859_v3  ;;  %v3861_v11 = vpop.eup %3860  ;;  %v1505_v22 = vmul.f32 %v1377_v7, %v4559_v36  ;;  %v4592_v24 = vadd.f32 %v4363_v61, %v802_v62  ;;  %v2382_v60 = vpack.c.bf16 %v2255_v58, %v2254_v0 }
  0xfb   :  { %3625 = vmatmul.mubr.bf16.vlgmr.msra.gmra.mxu1 %v2385_v13  ;;  %3600 = vmatprep.mubr.msk.bf16.mxu0 %vm492_vm0, %v3836_v55  ;;  %v2135_v21 = vadd.f32 1.0, %v3861_v11  ;;  %v1630_v29 = vmul.f32 %v1502_v4, %v4535_v18  ;;  %v2262_v32 = vmul.f32 %v2134_v6, %v4527_v12  ;;  %v1756_v35 = vadd.f32 %v4547_v26, %v4480_v30 }
  0xfc   :  { %v815_v51 = vpop.f32.mrf.mxu0  ;;  %v2265_v10 = vmul.f32 %v2137_v8, %v4541_v38  ;;  %v1631_v37 = vmul.f32 %v1503_v15, %v4551_v27  ;;  %v1508_v39 = vmul.f32 %v1380_v19, %v4569_v53  ;;  %v4606_v38 = vadd.f32 %v3499_v42, %v4363_v61 }
  0xfd   :  { %v2263_v33 = vmul.f32 %v2135_v21, %v4538_v34  ;;  %v2264_v45 = vmul.f32 %v2136_v20, %v4530_v14  ;;  %v1506_v12 = vmul.f32 %v1378_v59, %v4575_v57  ;;  %v1757_v47 = vadd.f32 %v1629_v40, %v4492_v44 }
  0xfe   :  { %v3503_v31 = vpop.f32.mrf.mxu0  ;;  %v1884_v48 = vmul.f32 0.7978846, %v1756_v35  ;;  %v1379_v49 = vmul.f32 0.044715, %v4592_v24  ;;  %v4613_v26 = vadd.f32 %v3502_v5, %v4363_v61  ;;  %v1243_v52 = vmul.f32 0.5, %v4489_v41 }
  0xff   :  { %v2386_v34 = vpack.c.bf16 %v2263_v33, %v2262_v32  ;;  %v2387_v50 = vpack.c.bf16 %v2265_v10, %v2264_v45  ;;  %v1633_v42 = vmul.f32 %v1505_v22, %v4559_v36  ;;  %v1885_v14 = vmul.f32 0.7978846, %v1757_v47 }
 0x100   :  { %v818_v46 = vpop.f32.mrf.mxu0  ;;  %3866 = vtanh.f32 %v1884_v48  ;;  %v1758_v55 = vadd.f32 %v1630_v29, %v4535_v18  ;;  %v4620_v40 = vmul.f32 %v1508_v39, %v4569_v53  ;;  %v1381_v56 = vmul.f32 0.044715, %v4606_v38 }
 0x101   :  { %3628 = vmatprep.mubr.bf16.mxu1 %v2386_v34  ;;  %v4624_v62 = vadd.f32 %v4363_v61, %v815_v51  ;;  %v4627_v41 = vadd.f32 %v3503_v31, %v4363_v61  ;;  %v1634_v2 = vmul.f32 %v1506_v12, %v4575_v57  ;;  %3868 = vtanh.f32 %v1885_v14 }
 0x102   :  { %v3506_v54 = vpop.f32.mrf.mxu0  ;;  %3601 = vmatmul.mubr.msk.bf16.gmra.mxu0 %vm492_vm0, %v3837_v25  ;;  %v1759_v1 = vadd.f32 %v1631_v37, %v4551_v27  ;;  %v1886_v3 = vmul.f32 0.7978846, %v1758_v55  ;;  %v1507_v4 = vmul.f32 %v1379_v49, %v4592_v24  ;;  %v1384_v7 = vmul.f32 0.044715, %v4613_v26 }
 0x103   :  { %3629 = vmatmul.mubr.bf16.gmra.mxu1 %v2387_v50  ;;  %3620 = vmatprep.mubr.bf16.mxu0 %v2382_v60  ;;  %v4634_v13 = vadd.f32 %v4363_v61, %v818_v46  ;;  %v4637_v58 = vadd.f32 %v3506_v54, %v4363_v61  ;;  %v1760_v23 = vadd.f32 %v1632_v63, %v4516_v17  ;;  %v1382_v19 = vmul.f32 0.044715, %v4624_v62 }
 0x104   :  { %v831_v0 = vpop.f32.mrf.mxu0  ;;  %v1887_v8 = vmul.f32 0.7978846, %v1759_v1  ;;  %3870 = vtanh.f32 %v1886_v3  ;;  %v3863_v11 = vpop.eup %3862  ;;  %v1509_v15 = vmul.f32 %v1381_v56, %v4606_v38  ;;  %v1385_v20 = vmul.f32 0.044715, %v4627_v41 }
 0x105   :  { %v4640_v5 = vadd.f32 %v4363_v61, %v831_v0  ;;  %v1244_v59 = vmul.f32 0.5, %v4480_v30  ;;  %v2138_v21 = vadd.f32 1.0, %v3863_v11  ;;  %v1761_v22 = vadd.f32 %v1633_v42, %v4559_v36 }
 0x106   :  { %v3507_v6 = vpop.f32.mrf.mxu0  ;;  %3872 = vtanh.f32 %v1887_v8  ;;  %v1888_v10 = vmul.f32 0.7978846, %v1760_v23  ;;  %v3865_v60 = vpop.eup %3864  ;;  %v1635_v29 = vmul.f32 %v1507_v4, %v4592_v24  ;;  %v1512_v63 = vmul.f32 %v1384_v7, %v4613_v26 }
 0x107   :  { %v1383_v31 = vmul.f32 0.044715, %v4634_v13  ;;  %v1388_v32 = vmul.f32 0.044715, %v4637_v58  ;;  %v1386_v33 = vmul.f32 0.044715, %v4640_v5  ;;  %v1637_v37 = vmul.f32 %v1509_v15, %v4606_v38 }
 0x108   :  { %v834_v51 = vpop.f32.mrf.mxu0  ;;  %v2139_v25 = vadd.f32 1.0, %v3865_v60  ;;  %v1889_v30 = vmul.f32 0.7978846, %v1761_v22  ;;  %3874 = vtanh.f32 %v1888_v10  ;;  %v1510_v39 = vmul.f32 %v1382_v19, %v4624_v62 }
 0x109   :  { %v1245_v45 = vmul.f32 0.5, %v4492_v44  ;;  %v1246_v12 = vmul.f32 0.5, %v4535_v18  ;;  %v1513_v46 = vmul.f32 %v1385_v20, %v4627_v41  ;;  %v2266_v34 = vmul.f32 %v2138_v21, %v4588_v43 }
 0x10a   :  { %v3510_v35 = vpop.f32.mrf.mxu0  ;;  %3621 = vmatmul.mubr.bf16.vlgmr.msra.gmra.mxu0 %v2383_v28  ;;  %v2267_v47 = vmul.f32 %v2139_v25, %v1243_v52  ;;  %3876 = vtanh.f32 %v1889_v30  ;;  %v4663_v9 = vmul.f32 %v1512_v63, %v4613_v26  ;;  %v1511_v16 = vmul.f32 %v1383_v31, %v4634_v13 }
 0x10b   :  { %v1516_v28 = vmul.f32 %v1388_v32, %v4637_v58  ;;  %v4668_v49 = vadd.f32 %v3507_v6, %v4363_v61  ;;  %v1514_v44 = vmul.f32 %v1386_v33, %v4640_v5  ;;  %v1762_v42 = vadd.f32 %v1634_v2, %v4575_v57 }
 0x10c   :  { %v847_v48 = vpop.f32.mrf.mxu0  ;;  %v2388_v18 = vpack.c.bf16 %v2267_v47, %v2266_v34  ;;  %v1763_v43 = vadd.f32 %v1635_v29, %v4592_v24  ;;  %v4674_v54 = vmul.f32 %v1510_v39, %v4624_v62  ;;  %v4677_v14 = vadd.f32 %v4363_v61, %v834_v51 }
 0x10d   :  { %v3867_v52 = vpop.eup %3866  ;;  %v1247_v55 = vmul.f32 0.5, %v4551_v27  ;;  %v4681_v56 = vmul.f32 0.5, %v4516_v17  ;;  %v4684_v0 = vmul.f32 %v1513_v46, %v4627_v41  ;;  %v1890_v3 = vmul.f32 0.7978846, %v1762_v42 }
 0x10e   :  { %v3511_v50 = vpop.f32.mrf.mxu0  ;;  %3632 = vmatprep.mubr.bf16.mxu1 %v2388_v18  ;;  %v2140_v1 = vadd.f32 1.0, %v3867_v52  ;;  %v1891_v4 = vmul.f32 0.7978846, %v1763_v43  ;;  %v3869_v7 = vpop.eup %3868  ;;  %v4687_v6 = vmul.f32 %v1511_v16, %v4634_v13  ;;  %v4690_v8 = vmul.f32 %v1516_v28, %v4637_v58 }
 0x10f   :  { %v1389_v27 = vmul.f32 0.044715, %v4668_v49  ;;  %v1249_v17 = vmul.f32 0.5, %v4559_v36  ;;  %v4695_v23 = vmul.f32 %v1514_v44, %v4640_v5  ;;  %v2141_v11 = vadd.f32 1.0, %v3869_v7 }
 0x110   :  { %v850_v2 = vpop.f32.mrf.mxu0  ;;  %3878 = vtanh.f32 %v1890_v3  ;;  %v1764_v19 = vadd.f32 %v4620_v40, %v4569_v53  ;;  %v1387_v51 = vmul.f32 0.044715, %v4677_v14  ;;  %v4701_v21 = vadd.f32 %v3510_v35, %v4363_v61 }
 0x111   :  { %v3871_v20 = vpop.eup %3870  ;;  %v2268_v22 = vmul.f32 %v2140_v1, %v1244_v59  ;;  %v4704_v10 = vadd.f32 %v4363_v61, %v847_v48  ;;  %v2269_v36 = vmul.f32 %v2141_v11, %v1245_v45  ;;  %3880 = vtanh.f32 %v1891_v4 }
 0x112   :  { %v3514_v15 = vpop.f32.mrf.mxu0  ;;  %v2142_v60 = vadd.f32 1.0, %v3871_v20  ;;  %v1765_v63 = vadd.f32 %v1637_v37, %v4606_v38  ;;  %v1517_v32 = vmul.f32 %v1389_v27, %v4668_v49  ;;  %v4709_v40 = vadd.f32 %v3511_v50, %v4363_v61 }
 0x113   :  { %v3873_v31 = vpop.eup %3872  ;;  %v4712_v33 = vmul.f32 0.5, %v4575_v57  ;;  %v4715_v59 = vmul.f32 0.5, %v4592_v24  ;;  %v2389_v25 = vpack.c.bf16 %v2269_v36, %v2268_v22  ;;  %v4718_v35 = vadd.f32 %v4363_v61, %v850_v2 }
 0x114   :  { %v863_v29 = vpop.f32.mrf.mxu0  ;;  %v2143_v30 = vadd.f32 1.0, %v3873_v31  ;;  %v1892_v45 = vmul.f32 0.7978846, %v1764_v19  ;;  %v1515_v46 = vmul.f32 %v1387_v51, %v4677_v14  ;;  %v1392_v34 = vmul.f32 0.044715, %v4701_v21 }
 0x115   :  { %v3875_v37 = vpop.eup %3874  ;;  %v1390_v47 = vmul.f32 0.044715, %v4704_v10  ;;  %v2270_v48 = vmul.f32 %v2142_v60, %v1246_v12  ;;  %3633 = vmatmul.mubr.bf16.gmra.mxu1 %v2389_v25  ;;  %v1893_v28 = vmul.f32 0.7978846, %v1765_v63  ;;  %v4724_v18 = vmul.f32 %v1517_v32, %v4668_v49 }
 0x116   :  { %v3515_v39 = vpop.f32.mrf.mxu0  ;;  %v2271_v57 = vmul.f32 %v2143_v30, %v1247_v55  ;;  %v2144_v16 = vadd.f32 1.0, %v3875_v37  ;;  %3882 = vtanh.f32 %v1892_v45  ;;  %v1393_v50 = vmul.f32 0.044715, %v4709_v40 }
 0x117   :  { %v3877_v44 = vpop.eup %3876  ;;  %v4728_v42 = vadd.f32 %v3514_v15, %v4363_v61  ;;  %v4731_v43 = vadd.f32 %v4363_v61, %v863_v29  ;;  %v1391_v12 = vmul.f32 0.044715, %v4718_v35  ;;  %3884 = vtanh.f32 %v1893_v28 }
 0x118   :  { %v866_v24 = vpop.f32.mrf.mxu0  ;;  %v2390_v52 = vpack.c.bf16 %v2271_v57, %v2270_v48  ;;  %v2145_v55 = vadd.f32 1.0, %v3877_v44  ;;  %v4735_v2 = vmul.f32 %v1515_v46, %v4677_v14  ;;  %v1520_v3 = vmul.f32 %v1392_v34, %v4701_v21 }
 0x119   :  { %v4739_v4 = vmul.f32 0.5, %v4569_v53  ;;  %v4742_v7 = vmul.f32 0.5, %v4606_v38  ;;  %v1518_v27 = vmul.f32 %v1390_v47, %v4704_v10  ;;  %v2272_v11 = vmul.f32 %v2144_v16, %v4681_v56 }
 0x11a   :  { %v3518_v1 = vpop.f32.mrf.mxu0  ;;  %3636 = vmatprep.mubr.bf16.mxu1 %v2390_v52  ;;  %v2273_v15 = vmul.f32 %v2145_v55, %v1249_v17  ;;  %v1766_v20 = vadd.f32 %v4674_v54, %v4624_v62  ;;  %v1521_v51 = vmul.f32 %v1393_v50, %v4709_v40  ;;  %v1396_v22 = vmul.f32 0.044715, %v4728_v42 }
 0x11b   :  { %v1394_v53 = vmul.f32 0.044715, %v4731_v43  ;;  %v4752_v36 = vadd.f32 %v3515_v39, %v4363_v61  ;;  %v1519_v38 = vmul.f32 %v1391_v12, %v4718_v35  ;;  %v1767_v56 = vadd.f32 %v4687_v6, %v4634_v13 }
 0x11c   :  { %v879_v19 = vpop.f32.mrf.mxu0  ;;  %v2391_v60 = vpack.c.bf16 %v2273_v15, %v2272_v11  ;;  %v1894_v17 = vmul.f32 0.7978846, %v1766_v20  ;;  %v4758_v54 = vmul.f32 %v1520_v3, %v4701_v21  ;;  %v4761_v31 = vadd.f32 %v4363_v61, %v866_v24 }
 0x11d   :  { %v3879_v63 = vpop.eup %3878  ;;  %v4764_v32 = vadd.f32 %v3518_v1, %v4363_v61  ;;  %v4767_v25 = vadd.f32 %v4363_v61, %v879_v19  ;;  %v4770_v30 = vmul.f32 %v1518_v27, %v4704_v10  ;;  %v1895_v45 = vmul.f32 0.7978846, %v1767_v56 }
 0x11e   :  { %v3519_v29 = vpop.f32.mrf.mxu0  ;;  %3637 = vmatmul.mubr.bf16.gmra.mxu1 %v2391_v60  ;;  %v2146_v39 = vadd.f32 1.0, %v3879_v63  ;;  %3886 = vtanh.f32 %v1894_v17  ;;  %v3881_v37 = vpop.eup %3880  ;;  %v4773_v46 = vmul.f32 %v1521_v51, %v4709_v40  ;;  %v1524_v34 = vmul.f32 %v1396_v22, %v4728_v42 }
 0x11f   :  { %v1522_v47 = vmul.f32 %v1394_v53, %v4731_v43  ;;  %v1397_v48 = vmul.f32 0.044715, %v4752_v36  ;;  %v4779_v57 = vmul.f32 %v1519_v38, %v4718_v35  ;;  %v2147_v16 = vadd.f32 1.0, %v3881_v37 }
 0x120   :  { %v882_v6 = vpop.f32.mrf.mxu0  ;;  %3888 = vtanh.f32 %v1895_v45  ;;  %v1768_v28 = vadd.f32 %v4663_v9, %v4613_v26  ;;  %v1395_v44 = vmul.f32 0.044715, %v4761_v31  ;;  %v1400_v50 = vmul.f32 0.044715, %v4764_v32 }
 0x121   :  { %v1398_v12 = vmul.f32 0.044715, %v4767_v25  ;;  %v4787_v52 = vadd.f32 %v3519_v29, %v4363_v61  ;;  %v2274_v55 = vmul.f32 %v2146_v39, %v4712_v33  ;;  %v2275_v1 = vmul.f32 %v2147_v16, %v4715_v59 }
 0x122   :  { %v3522_v24 = vpop.f32.mrf.mxu0  ;;  %v1769_v3 = vadd.f32 %v4684_v0, %v4627_v41  ;;  %v1896_v27 = vmul.f32 0.7978846, %v1768_v28  ;;  %v4794_v9 = vmul.f32 %v1524_v34, %v4728_v42  ;;  %v4797_v19 = vmul.f32 %v1522_v47, %v4731_v43 }
 0x123   :  { %v3883_v15 = vpop.eup %3882  ;;  %v1525_v20 = vmul.f32 %v1397_v48, %v4752_v36  ;;  %v4801_v51 = vadd.f32 %v4363_v61, %v882_v6  ;;  %v2392_v33 = vpack.c.bf16 %v2275_v1, %v2274_v55  ;;  %v1523_v38 = vmul.f32 %v1395_v44, %v4761_v31 }
 0x124   :  { %v895_v11 = vpop.f32.mrf.mxu0  ;;  %v2148_v22 = vadd.f32 1.0, %v3883_v15  ;;  %v1897_v59 = vmul.f32 0.7978846, %v1769_v3  ;;  %3890 = vtanh.f32 %v1896_v27  ;;  %v3885_v0 = vpop.eup %3884  ;;  %v1528_v60 = vmul.f32 %v1400_v50, %v4764_v32 }
 0x125   :  { %v1526_v29 = vmul.f32 %v1398_v12, %v4767_v25  ;;  %v1254_v56 = vmul.f32 0.5, %v4624_v62  ;;  %3640 = vmatprep.mubr.bf16.mxu1 %v2392_v33  ;;  %v2149_v17 = vadd.f32 1.0, %v3885_v0  ;;  %v1401_v63 = vmul.f32 0.044715, %v4787_v52 }
 0x126   :  { %v3523_v53 = vpop.f32.mrf.mxu0  ;;  %v1255_v39 = vmul.f32 0.5, %v4634_v13  ;;  %3892 = vtanh.f32 %v1897_v59  ;;  %v4810_v45 = vmul.f32 %v1525_v20, %v4752_v36  ;;  %v1399_v37 = vmul.f32 0.044715, %v4801_v51 }
 0x127   :  { %v4814_v34 = vadd.f32 %v3522_v24, %v4363_v61  ;;  %v4817_v47 = vmul.f32 0.5, %v4613_v26  ;;  %v2276_v62 = vmul.f32 %v2148_v22, %v4739_v4  ;;  %v2277_v48 = vmul.f32 %v2149_v17, %v4742_v7 }
 0x128   :  { %v898_v6 = vpop.f32.mrf.mxu0  ;;  %v1770_v13 = vadd.f32 %v4695_v23, %v4640_v5  ;;  %v1771_v16 = vadd.f32 %v4735_v2, %v4677_v14  ;;  %v4826_v44 = vmul.f32 %v1523_v38, %v4761_v31  ;;  %v4829_v24 = vmul.f32 %v1528_v60, %v4764_v32 }
 0x129   :  { %v4832_v26 = vmul.f32 %v1526_v29, %v4767_v25  ;;  %v4835_v4 = vmul.f32 0.5, %v4627_v41  ;;  %v2393_v7 = vpack.c.bf16 %v2277_v48, %v2276_v62  ;;  %v1529_v50 = vmul.f32 %v1401_v63, %v4787_v52 }
 0x12a   :  { %v3526_v28 = vpop.f32.mrf.mxu0  ;;  %v1898_v23 = vmul.f32 0.7978846, %v1770_v13  ;;  %v1899_v12 = vmul.f32 0.7978846, %v1771_v16  ;;  %v1404_v1 = vmul.f32 0.044715, %v4814_v34  ;;  %v4840_v3 = vadd.f32 %v4363_v61, %v895_v11 }
 0x12b   :  { %v3887_v2 = vpop.eup %3886  ;;  %v4843_v27 = vadd.f32 %v3523_v53, %v4363_v61  ;;  %v1772_v15 = vadd.f32 %v4690_v8, %v4637_v58  ;;  %3641 = vmatmul.mubr.bf16.gmra.mxu1 %v2393_v7  ;;  %v1527_v41 = vmul.f32 %v1399_v37, %v4801_v51  ;;  %v1773_v33 = vadd.f32 %v4724_v18, %v4668_v49 }
 0x12c   :  { %v911_v55 = vpop.f32.mrf.mxu0  ;;  %v2150_v20 = vadd.f32 1.0, %v3887_v2  ;;  %3894 = vtanh.f32 %v1898_v23  ;;  %v4851_v0 = vadd.f32 %v4363_v61, %v898_v6  ;;  %v4854_v11 = vadd.f32 %v3526_v28, %v4363_v61 }
 0x12d   :  { %v3889_v59 = vpop.eup %3888  ;;  %3896 = vtanh.f32 %v1899_v12  ;;  %v1900_v53 = vmul.f32 0.7978846, %v1772_v15  ;;  %v4857_v8 = vmul.f32 %v1529_v50, %v4787_v52  ;;  %v4860_v60 = vmul.f32 0.5, %v4640_v5 }
 0x12e   :  { %v3527_v22 = vpop.f32.mrf.mxu0  ;;  %v2151_v38 = vadd.f32 1.0, %v3889_v59  ;;  %v1901_v29 = vmul.f32 0.7978846, %v1773_v33  ;;  %v1532_v18 = vmul.f32 %v1404_v1, %v4814_v34  ;;  %v1402_v63 = vmul.f32 0.044715, %v4840_v3 }
 0x12f   :  { %v1405_v6 = vmul.f32 0.044715, %v4843_v27  ;;  %3898 = vtanh.f32 %v1900_v53  ;;  %v2278_v37 = vmul.f32 %v2150_v20, %v1254_v56  ;;  %v4866_v48 = vadd.f32 %v4363_v61, %v911_v55 }
 0x130   :  { %v914_v17 = vpop.f32.mrf.mxu0  ;;  %v2279_v62 = vmul.f32 %v2151_v38, %v1255_v39  ;;  %3900 = vtanh.f32 %v1901_v29  ;;  %v4869_v5 = vmul.f32 %v1527_v41, %v4801_v51  ;;  %v1403_v28 = vmul.f32 0.044715, %v4851_v0 }
 0x131   :  { %v3891_v16 = vpop.eup %3890  ;;  %v1408_v7 = vmul.f32 0.044715, %v4854_v11  ;;  %v1774_v50 = vadd.f32 %v4770_v30, %v4704_v10  ;;  %v1259_v56 = vmul.f32 0.5, %v4677_v14  ;;  %v1775_v61 = vadd.f32 %v4779_v57, %v4718_v35  ;;  %v4889_v14 = vld [vmem:[%s6787_s2] ss:$0 sm:$0xff] }
 0x132   :  { %v3530_v13 = vpop.f32.mrf.mxu0  ;;  %v2394_v23 = vpack.c.bf16 %v2279_v62, %v2278_v37  ;;  %v2152_v12 = vadd.f32 1.0, %v3891_v16  ;;  %v4881_v2 = vmul.f32 %v1532_v18, %v4814_v34  ;;  %v1530_v1 = vmul.f32 %v1402_v63, %v4840_v3 }
 0x133   :  { %v3893_v55 = vpop.eup %3892  ;;  %v1533_v15 = vmul.f32 %v1405_v6, %v4843_v27  ;;  %v1902_v41 = vmul.f32 0.7978846, %v1774_v50  ;;  %v1406_v20 = vmul.f32 0.044715, %v4866_v48  ;;  %v4892_v57 = vadd.f32 %v4889_v14, %v3527_v22 }
 0x134   :  { %v4878_v39 = vpop.f32.mrf.mxu0  ;;  %3644 = vmatprep.mubr.bf16.mxu1 %v2394_v23  ;;  %v2153_v30 = vadd.f32 1.0, %v3893_v55  ;;  %v1903_v33 = vmul.f32 0.7978846, %v1775_v61  ;;  %v1531_v53 = vmul.f32 %v1403_v28, %v4851_v0  ;;  %v1536_v38 = vmul.f32 %v1408_v7, %v4854_v11 }
 0x135   :  { %v4897_v29 = vadd.f32 %v4889_v14, %v914_v17  ;;  %3902 = vtanh.f32 %v1902_v41  ;;  %v2280_v18 = vmul.f32 %v2152_v12, %v4817_v47  ;;  %v1776_v6 = vadd.f32 %v4758_v54, %v4701_v21 }
 0x136   :  { %v3531_v59 = vpop.f32.mrf.mxu0  ;;  %v2281_v63 = vmul.f32 %v2153_v30, %v4835_v4  ;;  %3904 = vtanh.f32 %v1903_v33  ;;  %v4904_v37 = vmul.f32 %v1530_v1, %v4840_v3  ;;  %v1260_v62 = vmul.f32 0.5, %v4637_v58 }
 0x137   :  { %v1261_v16 = vmul.f32 0.5, %v4668_v49  ;;  %v1777_v17 = vadd.f32 %v4773_v46, %v4709_v40  ;;  %v1534_v47 = vmul.f32 %v1406_v20, %v4866_v48  ;;  %v1409_v4 = vmul.f32 0.044715, %v4892_v57 }
 0x138   :  { %v930_v22 = vpop.f32.mrf.mxu0  ;;  %v2395_v28 = vpack.c.bf16 %v2281_v63, %v2280_v18  ;;  %v1904_v7 = vmul.f32 0.7978846, %v1776_v6  ;;  %v4913_v54 = vmul.f32 %v1533_v15, %v4843_v27  ;;  %v4916_v12 = vmul.f32 %v1531_v53, %v4851_v0 }
 0x139   :  { %v3895_v23 = vpop.eup %3894  ;;  %v4919_v58 = vadd.f32 %v4889_v14, %v3530_v13  ;;  %v1905_v49 = vmul.f32 0.7978846, %v1777_v17  ;;  %v4922_v55 = vmul.f32 %v1536_v38, %v4854_v11  ;;  %v1407_v1 = vmul.f32 0.044715, %v4897_v29 }
 0x13a   :  { %v3534_v50 = vpop.f32.mrf.mxu0  ;;  %v3897_v61 = vpop.eup %3896  ;;  %3645 = vmatmul.mubr.bf16.gmra.mxu1 %v2395_v28  ;;  %v2154_v46 = vadd.f32 1.0, %v3895_v23  ;;  %3906 = vtanh.f32 %v1904_v7  ;;  %v1262_v15 = vmul.f32 0.5, %v4704_v10  ;;  %v1263_v20 = vmul.f32 0.5, %v4718_v35 }
 0x13b   :  { %6801 = vst [vmem:[#allocation2_spill] sm:$0xff] %v4922_v55  ;;  %v2155_v30 = vadd.f32 1.0, %v3897_v61  ;;  %3908 = vtanh.f32 %v1905_v49  ;;  %v4928_v13 = vmul.f32 %v1534_v47, %v4866_v48  ;;  %v1537_v53 = vmul.f32 %v1409_v4, %v4892_v57 }
 0x13c   :  { %v943_v41 = vpop.f32.mrf.mxu0  ;;  %v3899_v33 = vpop.eup %3898  ;;  %v1778_v38 = vadd.f32 %v4797_v19, %v4731_v43  ;;  %v1779_v18 = vadd.f32 %v4826_v44, %v4761_v31  ;;  %v2282_v17 = vmul.f32 %v2154_v46, %v4860_v60  ;;  %v1412_v35 = vmul.f32 0.044715, %v4919_v58 }
 0x13d   :  { %v3901_v6 = vpop.eup %3900  ;;  %v2283_v10 = vmul.f32 %v2155_v30, %v1259_v56  ;;  %v2156_v28 = vadd.f32 1.0, %v3899_v33  ;;  %v1535_v47 = vmul.f32 %v1407_v1, %v4897_v29  ;;  %v1264_v19 = vmul.f32 0.5, %v4701_v21 }
 0x13e   :  { %v3535_v63 = vpop.f32.mrf.mxu0  ;;  %v2157_v7 = vadd.f32 1.0, %v3901_v6  ;;  %v1906_v23 = vmul.f32 0.7978846, %v1778_v38  ;;  %v1907_v49 = vmul.f32 0.7978846, %v1779_v18  ;;  %v4941_v44 = vadd.f32 %v4889_v14, %v4878_v39 }
 0x13f   :  { %v2396_v61 = vpack.c.bf16 %v2283_v10, %v2282_v17  ;;  %v4944_v55 = vadd.f32 %v4889_v14, %v3531_v59  ;;  %v2284_v60 = vmul.f32 %v2156_v28, %v1260_v62  ;;  %v1780_v46 = vadd.f32 %v4794_v9, %v4728_v42 }
 0x140   :  { %v946_v4 = vpop.f32.mrf.mxu0  ;;  %v2285_v56 = vmul.f32 %v2157_v7, %v1261_v16  ;;  %3910 = vtanh.f32 %v1906_v23  ;;  %v1540_v30 = vmul.f32 %v1412_v35, %v4919_v58  ;;  %v4950_v33 = vadd.f32 %v4889_v14, %v930_v22 }
 0x141   :  { %3648 = vmatprep.mubr.bf16.mxu1 %v2396_v61  ;;  %3912 = vtanh.f32 %v1907_v49  ;;  %v1781_v21 = vadd.f32 %v4810_v45, %v4752_v36  ;;  %v4955_v62 = vmul.f32 %v1537_v53, %v4892_v57  ;;  %v4958_v16 = vadd.f32 %v4889_v14, %v3534_v50 }
 0x142   :  { %v3538_v1 = vpop.f32.mrf.mxu0  ;;  %v3903_v39 = vpop.eup %3902  ;;  %v2397_v59 = vpack.c.bf16 %v2285_v56, %v2284_v60  ;;  %v1908_v9 = vmul.f32 0.7978846, %v1780_v46  ;;  %v4963_v6 = vmul.f32 %v1535_v47, %v4897_v29  ;;  %v1410_v17 = vmul.f32 0.044715, %v4941_v44 }
 0x143   :  { %v3905_v18 = vpop.eup %3904  ;;  %v2158_v22 = vadd.f32 1.0, %v3903_v39  ;;  %v1909_v10 = vmul.f32 0.7978846, %v1781_v21  ;;  %v1265_v28 = vmul.f32 0.5, %v4709_v40  ;;  %v1413_v53 = vmul.f32 0.044715, %v4944_v55 }
 0x144   :  { %v4960_v38 = vpop.f32.mrf.mxu0  ;;  %3649 = vmatmul.mubr.bf16.gmra.mxu1 %v2397_v59  ;;  %v2159_v45 = vadd.f32 1.0, %v3905_v18  ;;  %3914 = vtanh.f32 %v1908_v9  ;;  %v4971_v35 = vmul.f32 %v1540_v30, %v4919_v58  ;;  %v1411_v7 = vmul.f32 0.044715, %v4950_v33 }
 0x145   :  { %v1266_v47 = vmul.f32 0.5, %v4731_v43  ;;  %3916 = vtanh.f32 %v1909_v10  ;;  %v2286_v23 = vmul.f32 %v2158_v22, %v1262_v15  ;;  %v1416_v61 = vmul.f32 0.044715, %v4958_v16 }
 0x146   :  { %v4968_v50 = vpop.f32.mrf.mxu0  ;;  %v2287_v49 = vmul.f32 %v2159_v45, %v1263_v20  ;;  %v4977_v60 = vadd.f32 %v4889_v14, %v943_v41  ;;  %v1538_v46 = vmul.f32 %v1410_v17, %v4941_v44  ;;  %v1267_v30 = vmul.f32 0.5, %v4761_v31 }
 0x147   :  { %v3907_v56 = vpop.eup %3906  ;;  %v1782_v21 = vadd.f32 %v4832_v26, %v4767_v25  ;;  %v1783_v43 = vadd.f32 %v4869_v5, %v4801_v51  ;;  %v1541_v59 = vmul.f32 %v1413_v53, %v4944_v55  ;;  %v4989_v41 = vadd.f32 %v4889_v14, %v3535_v63 }
 0x148   :  { %v4979_v40 = vpop.f32.mrf.mxu0  ;;  %v3909_v15 = vpop.eup %3908  ;;  %v2398_v20 = vpack.c.bf16 %v2287_v49, %v2286_v23  ;;  %v2160_v39 = vadd.f32 1.0, %v3907_v56  ;;  %v4994_v22 = vadd.f32 %v4889_v14, %v946_v4  ;;  %v1539_v26 = vmul.f32 %v1411_v7, %v4950_v33 }
 0x149   :  { %v2161_v18 = vadd.f32 1.0, %v3909_v15  ;;  %v1910_v31 = vmul.f32 0.7978846, %v1782_v21  ;;  %v1911_v17 = vmul.f32 0.7978846, %v1783_v43  ;;  %v1544_v5 = vmul.f32 %v1416_v61, %v4958_v16 }
 0x14a   :  { %v4991_v9 = vpop.f32.mrf.mxu0  ;;  %3652 = vmatprep.mubr.bf16.mxu1 %v2398_v20  ;;  %v1414_v10 = vmul.f32 0.044715, %v4977_v60  ;;  %v1784_v45 = vadd.f32 %v4829_v24, %v4764_v32  ;;  %v2288_v53 = vmul.f32 %v2160_v39, %v1264_v19  ;;  %v1785_v4 = vadd.f32 %v4857_v8, %v4787_v52 }
 0x14b   :  { %v2289_v23 = vmul.f32 %v2161_v18, %v1265_v28  ;;  %3918 = vtanh.f32 %v1910_v31  ;;  %v1417_v49 = vmul.f32 0.044715, %v4989_v41  ;;  %v5007_v7 = vadd.f32 %v4889_v14, %v3538_v1 }
 0x14c   :  { %v5001_v63 = vpop.f32.mrf.mxu0  ;;  %3920 = vtanh.f32 %v1911_v17  ;;  %v1912_v61 = vmul.f32 0.7978846, %v1784_v45  ;;  %v5012_v24 = vmul.f32 %v1538_v46, %v4941_v44  ;;  %v1415_v19 = vmul.f32 0.044715, %v4994_v22 }
 0x14d   :  { %v3911_v21 = vpop.eup %3910  ;;  %v2399_v43 = vpack.c.bf16 %v2289_v23, %v2288_v53  ;;  %v1913_v28 = vmul.f32 0.7978846, %v1785_v4  ;;  %v5016_v8 = vmul.f32 %v1541_v59, %v4944_v55  ;;  %v5019_v20 = vmul.f32 %v1539_v26, %v4950_v33 }
 0x14e   :  { %v5009_v56 = vpop.f32.mrf.mxu0  ;;  %v3913_v15 = vpop.eup %3912  ;;  %v2162_v1 = vadd.f32 1.0, %v3911_v21  ;;  %3922 = vtanh.f32 %v1912_v61  ;;  %v1268_v31 = vmul.f32 0.5, %v4728_v42  ;;  %v1269_v46 = vmul.f32 0.5, %v4752_v36 }
 0x14f   :  { %3653 = vmatmul.mubr.bf16.gmra.mxu1 %v2399_v43  ;;  %v2163_v18 = vadd.f32 1.0, %v3913_v15  ;;  %3924 = vtanh.f32 %v1913_v28  ;;  %v5026_v17 = vmul.f32 %v1544_v5, %v4958_v16  ;;  %v1542_v59 = vmul.f32 %v1414_v10, %v4977_v60 }
 0x150   :  { %v5021_v39 = vpop.f32.mrf.mxu0  ;;  %v1545_v45 = vmul.f32 %v1417_v49, %v4989_v41  ;;  %v1420_v26 = vmul.f32 0.044715, %v5007_v7  ;;  %v2290_v4 = vmul.f32 %v2162_v1, %v1266_v47  ;;  %v1543_v21 = vmul.f32 %v1415_v19, %v4994_v22 }
 0x151   :  { %v3915_v23 = vpop.eup %3914  ;;  %v2291_v61 = vmul.f32 %v2163_v18, %v1267_v30  ;;  %v1786_v42 = vadd.f32 %v4904_v37, %v4840_v3  ;;  %v5038_v5 = vadd.f32 %v4889_v14, %v4960_v38  ;;  %v5042_v10 = vadd.f32 %v4889_v14, %v4968_v50 }
 0x152   :  { %v5031_v53 = vpop.f32.mrf.mxu0  ;;  %v3917_v36 = vpop.eup %3916  ;;  %v2164_v43 = vadd.f32 1.0, %v3915_v23  ;;  %v1787_v49 = vadd.f32 %v4916_v12, %v4851_v0  ;;  %v5050_v37 = vadd.f32 %v4889_v14, %v4979_v40  ;;  %v5053_v15 = vmul.f32 %v1542_v59, %v4977_v60 }
 0x153   :  { %v2400_v30 = vpack.c.bf16 %v2291_v61, %v2290_v4  ;;  %v2165_v19 = vadd.f32 1.0, %v3917_v36  ;;  %v1914_v28 = vmul.f32 0.7978846, %v1786_v42  ;;  %v1270_v38 = vmul.f32 0.5, %v4767_v25 }
 0x154   :  { %v5046_v47 = vpop.f32.mrf.mxu0  ;;  %v1548_v50 = vmul.f32 %v1420_v26, %v5007_v7  ;;  %v1915_v1 = vmul.f32 0.7978846, %v1787_v49  ;;  %v2292_v12 = vmul.f32 %v2164_v43, %v1268_v31  ;;  %v1788_v4 = vadd.f32 %v4881_v2, %v4814_v34 }
 0x155   :  { %3656 = vmatprep.mubr.bf16.mxu1 %v2400_v30  ;;  %v2293_v23 = vmul.f32 %v2165_v19, %v1269_v46  ;;  %3926 = vtanh.f32 %v1914_v28  ;;  %v1418_v40 = vmul.f32 0.044715, %v5038_v5  ;;  %v1421_v61 = vmul.f32 0.044715, %v5042_v10 }
 0x156   :  { %v5057_v18 = vpop.f32.mrf.mxu0  ;;  %3928 = vtanh.f32 %v1915_v1  ;;  %v1789_v25 = vadd.f32 %v4913_v54, %v4843_v27  ;;  %v1419_v42 = vmul.f32 0.044715, %v5050_v37  ;;  %v5070_v31 = vadd.f32 %v4889_v14, %v4991_v9 }
 0x157   :  { %v2401_v26 = vpack.c.bf16 %v2293_v23, %v2292_v12  ;;  %v1916_v46 = vmul.f32 0.7978846, %v1788_v4  ;;  %v5073_v2 = vmul.f32 %v1545_v45, %v4989_v41  ;;  %v5076_v43 = vmul.f32 %v1543_v21, %v4994_v22 }
 0x158   :  { %v5065_v59 = vpop.f32.mrf.mxu0  ;;  %v3919_v36 = vpop.eup %3918  ;;  %v1271_v49 = vmul.f32 0.5, %v4801_v51  ;;  %v1917_v54 = vmul.f32 0.7978846, %v1789_v25  ;;  %v1272_v1 = vmul.f32 0.5, %v4764_v32  ;;  %v1273_v9 = vmul.f32 0.5, %v4787_v52 }
 0x159   :  { %v3921_v19 = vpop.eup %3920  ;;  %3657 = vmatmul.mubr.bf16.gmra.mxu1 %v2401_v26  ;;  %v2166_v28 = vadd.f32 1.0, %v3919_v36  ;;  %3930 = vtanh.f32 %v1916_v46  ;;  %v5084_v45 = vmul.f32 %v1548_v50, %v5007_v7  ;;  %v1546_v21 = vmul.f32 %v1418_v40, %v5038_v5 }
 0x15a   :  { %v5079_v30 = vpop.f32.mrf.mxu0  ;;  %v2167_v12 = vadd.f32 1.0, %v3921_v19  ;;  %3932 = vtanh.f32 %v1917_v54  ;;  %v1549_v4 = vmul.f32 %v1421_v61, %v5042_v10  ;;  %v1547_v25 = vmul.f32 %v1419_v42, %v5050_v37 }
 0x15b   :  { %6802 = vst [vmem:[#allocation3_spill] sm:$0xff] %v5084_v45  ;;  %v3923_v51 = vpop.eup %3922  ;;  %v1274_v26 = vmul.f32 0.5, %v4840_v3  ;;  %v1424_v32 = vmul.f32 0.044715, %v5070_v31  ;;  %v2294_v46 = vmul.f32 %v2166_v28, %v1270_v38  ;;  %v1790_v50 = vadd.f32 %v4928_v13, %v4866_v48 }
 0x15c   :  { %v5087_v23 = vpop.f32.mrf.mxu0  ;;  %v3925_v52 = vpop.eup %3924  ;;  %v2295_v36 = vmul.f32 %v2167_v12, %v1271_v49  ;;  %v2168_v19 = vadd.f32 1.0, %v3923_v51  ;;  %v5099_v45 = vadd.f32 %v4889_v14, %v5001_v63  ;;  %v5103_v61 = vadd.f32 %v4889_v14, %v5009_v56 }
 0x15d   :  { %v2169_v54 = vadd.f32 1.0, %v3925_v52  ;;  %v1791_v3 = vadd.f32 %v4963_v6, %v4897_v29  ;;  %v5108_v42 = vmul.f32 %v1546_v21, %v5038_v5  ;;  %v1275_v13 = vmul.f32 0.5, %v4851_v0  ;;  %v6803_v6 = vld [vmem:[#allocation2_spill] sm:$0xff] }
 0x15e   :  { %v5095_v40 = vpop.f32.mrf.mxu0  ;;  %v2402_v38 = vpack.c.bf16 %v2295_v36, %v2294_v46  ;;  %v1918_v49 = vmul.f32 0.7978846, %v1790_v50  ;;  %v2296_v12 = vmul.f32 %v2168_v19, %v1272_v1  ;;  %v5115_v63 = vadd.f32 %v4889_v14, %v5021_v39 }
 0x15f   :  { %v2297_v51 = vmul.f32 %v2169_v54, %v1273_v9  ;;  %v1919_v56 = vmul.f32 0.7978846, %v1791_v3  ;;  %v1552_v52 = vmul.f32 %v1424_v32, %v5070_v31  ;;  %v1792_v21 = vadd.f32 %v6803_v6, %v4854_v11 }
 0x160   :  { %v5111_v28 = vpop.f32.mrf.mxu0  ;;  %3660 = vmatprep.mubr.bf16.mxu1 %v2402_v38  ;;  %3934 = vtanh.f32 %v1918_v49  ;;  %v1793_v0 = vadd.f32 %v4955_v62, %v4892_v57  ;;  %v1422_v1 = vmul.f32 0.044715, %v5099_v45  ;;  %v1425_v9 = vmul.f32 0.044715, %v5103_v61 }
 0x161   :  { %v2403_v36 = vpack.c.bf16 %v2297_v51, %v2296_v12  ;;  %3936 = vtanh.f32 %v1919_v56  ;;  %v5127_v19 = vmul.f32 %v1549_v4, %v5042_v10  ;;  %v5131_v32 = vadd.f32 %v4889_v14, %v5031_v53 }
 0x162   :  { %v5122_v46 = vpop.f32.mrf.mxu0  ;;  %v3927_v39 = vpop.eup %3926  ;;  %v1920_v50 = vmul.f32 0.7978846, %v1792_v21  ;;  %v1921_v54 = vmul.f32 0.7978846, %v1793_v0  ;;  %v5136_v38 = vmul.f32 %v1547_v25, %v5050_v37  ;;  %v1276_v12 = vmul.f32 0.5, %v4814_v34 }
 0x163   :  { %6804 = vst [vmem:[#allocation2_spill] sm:$0xff] %v5127_v19  ;;  %v3929_v62 = vpop.eup %3928  ;;  %3661 = vmatmul.mubr.bf16.gmra.mxu1 %v2403_v36  ;;  %v2170_v49 = vadd.f32 1.0, %v3927_v39  ;;  %v1277_v51 = vmul.f32 0.5, %v4843_v27  ;;  %v1423_v56 = vmul.f32 0.044715, %v5115_v63  ;;  %v5142_v53 = vmul.f32 0.5, %v4866_v48 }
 0x164   :  { %v5133_v3 = vpop.f32.mrf.mxu0  ;;  %v2171_v4 = vadd.f32 1.0, %v3929_v62  ;;  %3938 = vtanh.f32 %v1920_v50  ;;  %v5147_v21 = vmul.f32 %v1552_v52, %v5070_v31  ;;  %v1550_v25 = vmul.f32 %v1422_v1, %v5099_v45 }
 0x165   :  { %v1553_v0 = vmul.f32 %v1425_v9, %v5103_v61  ;;  %3940 = vtanh.f32 %v1921_v54  ;;  %v2298_v36 = vmul.f32 %v2170_v49, %v1274_v26  ;;  %v1428_v39 = vmul.f32 0.044715, %v5131_v32 }
 0x166   :  { %v5144_v6 = vpop.f32.mrf.mxu0  ;;  %6805 = vst [vmem:[#allocation4_spill] sm:$0xff] %v5147_v21  ;;  %v3931_v34 = vpop.eup %3930  ;;  %v2299_v27 = vmul.f32 %v2171_v4, %v1275_v13  ;;  %v1794_v48 = vadd.f32 %v5012_v24, %v4941_v44  ;;  %v5158_v52 = vadd.f32 %v4889_v14, %v5046_v47  ;;  %v5162_v1 = vadd.f32 %v4889_v14, %v5057_v18 }
 0x167   :  { %v3933_v50 = vpop.eup %3932  ;;  %v2172_v19 = vadd.f32 1.0, %v3931_v34  ;;  %v1795_v26 = vadd.f32 %v5019_v20, %v4950_v33  ;;  %v5168_v24 = vadd.f32 %v4889_v14, %v5065_v59  ;;  %v5173_v4 = vmul.f32 %v1550_v25, %v5099_v45 }
 0x168   :  { %v5154_v62 = vpop.f32.mrf.mxu0  ;;  %v2404_v13 = vpack.c.bf16 %v2299_v27, %v2298_v36  ;;  %v2173_v9 = vadd.f32 1.0, %v3933_v50  ;;  %v1922_v54 = vmul.f32 0.7978846, %v1794_v48  ;;  %v1551_v47 = vmul.f32 %v1423_v56, %v5115_v63 }
 0x169   :  { %v1279_v18 = vmul.f32 0.5, %v4897_v29  ;;  %v1923_v34 = vmul.f32 0.7978846, %v1795_v26  ;;  %v2300_v21 = vmul.f32 %v2172_v19, %v1276_v12  ;;  %v1796_v36 = vadd.f32 %v4971_v35, %v4919_v58 }
 0x16a   :  { %v5170_v49 = vpop.f32.mrf.mxu0  ;;  %3664 = vmatprep.mubr.bf16.mxu1 %v2404_v13  ;;  %v2301_v20 = vmul.f32 %v2173_v9, %v1277_v51  ;;  %3942 = vtanh.f32 %v1922_v54  ;;  %v1556_v27 = vmul.f32 %v1428_v39, %v5131_v32  ;;  %v1426_v48 = vmul.f32 0.044715, %v5158_v52 }
 0x16b   :  { %3944 = vtanh.f32 %v1923_v34  ;;  %v1797_v56 = vadd.f32 %v5016_v8, %v4944_v55  ;;  %v1429_v29 = vmul.f32 0.044715, %v5162_v1  ;;  %v1427_v19 = vmul.f32 0.044715, %v5168_v24 }
 0x16c   :  { %v5179_v59 = vpop.f32.mrf.mxu0  ;;  %v2405_v25 = vpack.c.bf16 %v2301_v20, %v2300_v21  ;;  %v1924_v12 = vmul.f32 0.7978846, %v1796_v36  ;;  %v5190_v35 = vmul.f32 %v1553_v0, %v5103_v61  ;;  %v5193_v39 = vmul.f32 %v1551_v47, %v5115_v63 }
 0x16d   :  { %v3935_v50 = vpop.eup %3934  ;;  %v1280_v26 = vmul.f32 0.5, %v4854_v11  ;;  %v1925_v13 = vmul.f32 0.7978846, %v1797_v56  ;;  %v1281_v21 = vmul.f32 0.5, %v4892_v57  ;;  %v5199_v54 = vadd.f32 %v4889_v14, %v5079_v30 }
 0x16e   :  { %v5187_v51 = vpop.f32.mrf.mxu0  ;;  %v3937_v9 = vpop.eup %3936  ;;  %3665 = vmatmul.mubr.bf16.gmra.mxu1 %v2405_v25  ;;  %v2174_v8 = vadd.f32 1.0, %v3935_v50  ;;  %3946 = vtanh.f32 %v1924_v12  ;;  %v5204_v20 = vmul.f32 %v1556_v27, %v5131_v32  ;;  %v1282_v47 = vmul.f32 0.5, %v4941_v44 }
 0x16f   :  { %6806 = vst [vmem:[#allocation5_spill] sm:$0xff] %v5199_v54  ;;  %v2175_v0 = vadd.f32 1.0, %v3937_v9  ;;  %3948 = vtanh.f32 %v1925_v13  ;;  %v1554_v11 = vmul.f32 %v1426_v48, %v5158_v52  ;;  %v1557_v36 = vmul.f32 %v1429_v29, %v5162_v1 }
 0x170   :  { %v5201_v34 = vpop.f32.mrf.mxu0  ;;  %6807 = vst [vmem:[#allocation6_spill] sm:$0xff] %v5204_v20  ;;  %v1555_v57 = vmul.f32 %v1427_v19, %v5168_v24  ;;  %v1283_v56 = vmul.f32 0.5, %v4950_v33  ;;  %v2302_v12 = vmul.f32 %v2174_v8, %v5142_v53  ;;  %v1798_v27 = vadd.f32 %v5053_v15, %v4977_v60 }
 0x171   :  { %v3939_v25 = vpop.eup %3938  ;;  %v2303_v50 = vmul.f32 %v2175_v0, %v1279_v18  ;;  %v1799_v44 = vadd.f32 %v5076_v43, %v4994_v22  ;;  %v1432_v29 = vmul.f32 0.044715, %v5199_v54  ;;  %v5221_v19 = vadd.f32 %v4889_v14, %v5087_v23 }
 0x172   :  { %v5211_v30 = vpop.f32.mrf.mxu0  ;;  %v3941_v13 = vpop.eup %3940  ;;  %v2176_v48 = vadd.f32 1.0, %v3939_v25  ;;  %v5225_v33 = vadd.f32 %v4889_v14, %v5095_v40  ;;  %v1926_v15 = vmul.f32 0.7978846, %v1798_v27  ;;  %v5230_v43 = vmul.f32 %v1554_v11, %v5158_v52 }
 0x173   :  { %v2406_v18 = vpack.c.bf16 %v2303_v50, %v2302_v12  ;;  %v2177_v9 = vadd.f32 1.0, %v3941_v13  ;;  %v1927_v8 = vmul.f32 0.7978846, %v1799_v44  ;;  %v5233_v25 = vmul.f32 %v1557_v36, %v5162_v1 }
 0x174   :  { %v5227_v53 = vpop.f32.mrf.mxu0  ;;  %v2304_v0 = vmul.f32 %v2176_v48, %v1280_v26  ;;  %v5237_v23 = vadd.f32 %v4889_v14, %v5111_v28  ;;  %3950 = vtanh.f32 %v1926_v15  ;;  %v1800_v12 = vadd.f32 %v5026_v17, %v4958_v16 }
 0x175   :  { %3668 = vmatprep.mubr.bf16.mxu1 %v2406_v18  ;;  %v2305_v40 = vmul.f32 %v2177_v9, %v1281_v21  ;;  %v1801_v26 = vadd.f32 %v5073_v2, %v4989_v41  ;;  %v1560_v11 = vmul.f32 %v1432_v29, %v5199_v54  ;;  %v1430_v36 = vmul.f32 0.044715, %v5221_v19 }
 0x176   :  { %v5239_v20 = vpop.f32.mrf.mxu0  ;;  %v1433_v50 = vmul.f32 0.044715, %v5225_v33  ;;  %3952 = vtanh.f32 %v1927_v8  ;;  %v5252_v21 = vadd.f32 %v4889_v14, %v5122_v46  ;;  %v1928_v13 = vmul.f32 0.7978846, %v1800_v12 }
 0x177   :  { %v3943_v27 = vpop.eup %3942  ;;  %v2407_v44 = vpack.c.bf16 %v2305_v40, %v2304_v0  ;;  %v1929_v17 = vmul.f32 0.7978846, %v1801_v26  ;;  %v5255_v2 = vmul.f32 %v1555_v57, %v5168_v24  ;;  %v1284_v18 = vmul.f32 0.5, %v4919_v58 }
 0x178   :  { %v5248_v28 = vpop.f32.mrf.mxu0  ;;  %6808 = vst [vmem:[#allocation7_spill] sm:$0xff] %v5252_v21  ;;  %v3945_v48 = vpop.eup %3944  ;;  %v2178_v29 = vadd.f32 1.0, %v3943_v27  ;;  %v1285_v9 = vmul.f32 0.5, %v4944_v55  ;;  %v1431_v0 = vmul.f32 0.044715, %v5237_v23  ;;  %v5263_v46 = vmul.f32 0.5, %v4977_v60 }
 0x179   :  { %3669 = vmatmul.mubr.bf16.gmra.mxu1 %v2407_v44  ;;  %v2179_v8 = vadd.f32 1.0, %v3945_v48  ;;  %3954 = vtanh.f32 %v1928_v13  ;;  %v5266_v40 = vmul.f32 %v1560_v11, %v5199_v54  ;;  %v1558_v57 = vmul.f32 %v1430_v36, %v5221_v19 }
 0x17a   :  { %v5259_v15 = vpop.f32.mrf.mxu0  ;;  %v1561_v12 = vmul.f32 %v1433_v50, %v5225_v33  ;;  %3956 = vtanh.f32 %v1929_v17  ;;  %v2306_v26 = vmul.f32 %v2178_v29, %v1282_v47  ;;  %v1436_v44 = vmul.f32 0.044715, %v5252_v21 }
 0x17b   :  { %6809 = vst [vmem:[#allocation8_spill] sm:$0xff] %v5266_v40  ;;  %v3947_v55 = vpop.eup %3946  ;;  %v2307_v27 = vmul.f32 %v2179_v8, %v1283_v56  ;;  %v1802_v60 = vadd.f32 %v5108_v42, %v5038_v5  ;;  %v5277_v11 = vadd.f32 %v4889_v14, %v5133_v3  ;;  %v5281_v36 = vadd.f32 %v4889_v14, %v5144_v6 }
 0x17c   :  { %v5270_v58 = vpop.f32.mrf.mxu0  ;;  %v3949_v48 = vpop.eup %3948  ;;  %v2180_v13 = vadd.f32 1.0, %v3947_v55  ;;  %v1803_v50 = vadd.f32 %v5136_v38, %v5050_v37  ;;  %v5289_v42 = vadd.f32 %v4889_v14, %v5154_v62  ;;  %v5292_v8 = vmul.f32 %v1558_v57, %v5221_v19  ;;  %v6811_v57 = vld [vmem:[#allocation2_spill] sm:$0xff] }
 0x17d   :  { %v2408_v56 = vpack.c.bf16 %v2307_v27, %v2306_v26  ;;  %v2181_v17 = vadd.f32 1.0, %v3949_v48  ;;  %v1930_v29 = vmul.f32 0.7978846, %v1802_v60  ;;  %v1559_v3 = vmul.f32 %v1431_v0, %v5237_v23  ;;  %v6810_v26 = vld [vmem:[#allocation3_spill] sm:$0xff] }
 0x17e   :  { %v5285_v47 = vpop.f32.mrf.mxu0  ;;  %v1287_v6 = vmul.f32 0.5, %v4994_v22  ;;  %v1931_v55 = vmul.f32 0.7978846, %v1803_v50  ;;  %v2308_v38 = vmul.f32 %v2180_v13, %v1284_v18  ;;  %v1804_v27 = vadd.f32 %v6810_v26, %v5007_v7 }
 0x17f   :  { %3672 = vmatprep.mubr.bf16.mxu1 %v2408_v56  ;;  %v2309_v54 = vmul.f32 %v2181_v17, %v1285_v9  ;;  %3958 = vtanh.f32 %v1930_v29  ;;  %v1564_v62 = vmul.f32 %v1436_v44, %v5252_v21  ;;  %v1434_v60 = vmul.f32 0.044715, %v5277_v11 }
 0x180   :  { %v5296_v40 = vpop.f32.mrf.mxu0  ;;  %3960 = vtanh.f32 %v1931_v55  ;;  %v1805_v0 = vadd.f32 %v6811_v57, %v5042_v10  ;;  %v1437_v50 = vmul.f32 0.044715, %v5281_v36  ;;  %v1435_v18 = vmul.f32 0.044715, %v5289_v42 }
 0x181   :  { %v2409_v22 = vpack.c.bf16 %v2309_v54, %v2308_v38  ;;  %v1932_v9 = vmul.f32 0.7978846, %v1804_v27  ;;  %v3951_v13 = vpop.eup %3950  ;;  %v5309_v56 = vmul.f32 %v1561_v12, %v5225_v33  ;;  %v5312_v44 = vmul.f32 %v1559_v3, %v5237_v23 }
 0x182   :  { %v5304_v48 = vpop.f32.mrf.mxu0  ;;  %v1288_v17 = vmul.f32 0.5, %v4958_v16  ;;  %v1933_v29 = vmul.f32 0.7978846, %v1805_v0  ;;  %v2182_v54 = vadd.f32 1.0, %v3951_v13  ;;  %v1289_v38 = vmul.f32 0.5, %v4989_v41 }
 0x183   :  { %v3953_v26 = vpop.eup %3952  ;;  %3673 = vmatmul.mubr.bf16.gmra.mxu1 %v2409_v22  ;;  %v5320_v27 = vadd.f32 %v4889_v14, %v5170_v49  ;;  %3962 = vtanh.f32 %v1932_v9  ;;  %v5323_v57 = vmul.f32 %v1564_v62, %v5252_v21  ;;  %v1290_v3 = vmul.f32 0.5, %v5038_v5 }
 0x184   :  { %v5315_v55 = vpop.f32.mrf.mxu0  ;;  %v2183_v12 = vadd.f32 1.0, %v3953_v26  ;;  %3964 = vtanh.f32 %v1933_v29  ;;  %v1562_v0 = vmul.f32 %v1434_v60, %v5277_v11  ;;  %v1565_v22 = vmul.f32 %v1437_v50, %v5281_v36 }
 0x185   :  { %6812 = vst [vmem:[#allocation3_spill] sm:$0xff] %v5323_v57  ;;  %v1563_v41 = vmul.f32 %v1435_v18, %v5289_v42  ;;  %v1291_v13 = vmul.f32 0.5, %v5050_v37  ;;  %v2310_v9 = vmul.f32 %v2182_v54, %v5263_v46  ;;  %v1806_v62 = vadd.f32 %v5173_v4, %v5099_v45 }
 0x186   :  { %v5326_v16 = vpop.f32.mrf.mxu0  ;;  %v3955_v49 = vpop.eup %3954  ;;  %v2311_v26 = vmul.f32 %v2183_v12, %v1287_v6  ;;  %v1807_v5 = vadd.f32 %v5193_v39, %v5115_v63  ;;  %v1440_v50 = vmul.f32 0.044715, %v5320_v27  ;;  %v5342_v18 = vadd.f32 %v4889_v14, %v5179_v59 }
 0x187   :  { %v3957_v57 = vpop.eup %3956  ;;  %v2184_v60 = vadd.f32 1.0, %v3955_v49  ;;  %v5346_v37 = vadd.f32 %v4889_v14, %v5187_v51  ;;  %v1934_v4 = vmul.f32 0.7978846, %v1806_v62  ;;  %v5351_v21 = vmul.f32 %v1562_v0, %v5277_v11 }
 0x188   :  { %v5337_v29 = vpop.f32.mrf.mxu0  ;;  %v2410_v46 = vpack.c.bf16 %v2311_v26, %v2310_v9  ;;  %v2185_v6 = vadd.f32 1.0, %v3957_v57  ;;  %v1935_v54 = vmul.f32 0.7978846, %v1807_v5  ;;  %v5354_v49 = vmul.f32 %v1565_v22, %v5281_v36  ;;  %v6813_v57 = vld [vmem:[#allocation4_spill] sm:$0xff] }
 0x189   :  { %v2312_v39 = vmul.f32 %v2184_v60, %v1288_v17  ;;  %v5358_v59 = vadd.f32 %v4889_v14, %v5201_v34  ;;  %3966 = vtanh.f32 %v1934_v4  ;;  %v1808_v9 = vadd.f32 %v6813_v57, %v5070_v31 }
 0x18a   :  { %v5348_v12 = vpop.f32.mrf.mxu0  ;;  %3676 = vmatprep.mubr.bf16.mxu1 %v2410_v46  ;;  %v2313_v51 = vmul.f32 %v2185_v6, %v1289_v38  ;;  %v1809_v26 = vadd.f32 %v5190_v35, %v5103_v61  ;;  %v1568_v0 = vmul.f32 %v1440_v50, %v5320_v27  ;;  %v1438_v22 = vmul.f32 0.044715, %v5342_v18 }
 0x18b   :  { %v1441_v62 = vmul.f32 0.044715, %v5346_v37  ;;  %3968 = vtanh.f32 %v1935_v54  ;;  %v5371_v38 = vadd.f32 %v4889_v14, %v5211_v30  ;;  %v1936_v60 = vmul.f32 0.7978846, %v1808_v9 }
 0x18c   :  { %v5364_v17 = vpop.f32.mrf.mxu0  ;;  %v3959_v34 = vpop.eup %3958  ;;  %v2411_v5 = vpack.c.bf16 %v2313_v51, %v2312_v39  ;;  %v1937_v46 = vmul.f32 0.7978846, %v1809_v26  ;;  %v5376_v4 = vmul.f32 %v1563_v41, %v5289_v42  ;;  %v1292_v57 = vmul.f32 0.5, %v5007_v7 }
 0x18d   :  { %6814 = vst [vmem:[#allocation2_spill] sm:$0xff] %v5364_v17  ;;  %v3961_v35 = vpop.eup %3960  ;;  %v2186_v50 = vadd.f32 1.0, %v3959_v34  ;;  %v1293_v17 = vmul.f32 0.5, %v5042_v10  ;;  %v1439_v39 = vmul.f32 0.044715, %v5358_v59  ;;  %v5382_v30 = vmul.f32 0.5, %v5099_v45 }
 0x18e   :  { %v5373_v6 = vpop.f32.mrf.mxu0  ;;  %3677 = vmatmul.mubr.bf16.gmra.mxu1 %v2411_v5  ;;  %v2187_v54 = vadd.f32 1.0, %v3961_v35  ;;  %3970 = vtanh.f32 %v1936_v60  ;;  %v5387_v9 = vmul.f32 %v1568_v0, %v5320_v27  ;;  %v1566_v41 = vmul.f32 %v1438_v22, %v5342_v18 }
 0x18f   :  { %v1569_v26 = vmul.f32 %v1441_v62, %v5346_v37  ;;  %3972 = vtanh.f32 %v1937_v46  ;;  %v2314_v10 = vmul.f32 %v2186_v50, %v1290_v3  ;;  %v1444_v5 = vmul.f32 0.044715, %v5371_v38 }
 0x190   :  { %v5384_v51 = vpop.f32.mrf.mxu0  ;;  %v3963_v7 = vpop.eup %3962  ;;  %v2315_v34 = vmul.f32 %v2187_v54, %v1291_v13  ;;  %v1810_v45 = vadd.f32 %v5230_v43, %v5158_v52  ;;  %v5398_v0 = vadd.f32 %v4889_v14, %v5227_v53  ;;  %v5402_v22 = vadd.f32 %v4889_v14, %v5239_v20 }
 0x191   :  { %6815 = vst [vmem:[#allocation4_spill] sm:$0xff] %v5384_v51  ;;  %v3965_v60 = vpop.eup %3964  ;;  %v2188_v51 = vadd.f32 1.0, %v3963_v7  ;;  %v1811_v3 = vadd.f32 %v5255_v2, %v5168_v24  ;;  %v5408_v43 = vadd.f32 %v4889_v14, %v5248_v28  ;;  %v5413_v54 = vmul.f32 %v1566_v41, %v5342_v18 }
 0x192   :  { %v5394_v35 = vpop.f32.mrf.mxu0  ;;  %v2412_v13 = vpack.c.bf16 %v2315_v34, %v2314_v10  ;;  %v2189_v62 = vadd.f32 1.0, %v3965_v60  ;;  %v1938_v46 = vmul.f32 0.7978846, %v1810_v45  ;;  %v1567_v53 = vmul.f32 %v1439_v39, %v5358_v59  ;;  %v6817_v10 = vld [vmem:[#allocation6_spill] sm:$0xff] }
 0x193   :  { %6816 = vst [vmem:[#allocation9_spill] sm:$0xff] %v5394_v35  ;;  %v1295_v20 = vmul.f32 0.5, %v5115_v63  ;;  %v1939_v7 = vmul.f32 0.7978846, %v1811_v3  ;;  %v2316_v35 = vmul.f32 %v2188_v51, %v1292_v57  ;;  %v1812_v34 = vadd.f32 %v6817_v10, %v5131_v32 }
 0x194   :  { %v5410_v50 = vpop.f32.mrf.mxu0  ;;  %3680 = vmatprep.mubr.bf16.mxu1 %v2412_v13  ;;  %v2317_v2 = vmul.f32 %v2189_v62, %v1293_v17  ;;  %3974 = vtanh.f32 %v1938_v46  ;;  %v1572_v45 = vmul.f32 %v1444_v5, %v5371_v38  ;;  %v1442_v60 = vmul.f32 0.044715, %v5398_v0 }
 0x195   :  { %3976 = vtanh.f32 %v1939_v7  ;;  %v1813_v39 = vadd.f32 %v5233_v25, %v5162_v1  ;;  %v1445_v63 = vmul.f32 0.044715, %v5402_v22  ;;  %v1443_v57 = vmul.f32 0.044715, %v5408_v43 }
 0x196   :  { %v5419_v28 = vpop.f32.mrf.mxu0  ;;  %v2413_v41 = vpack.c.bf16 %v2317_v2, %v2316_v35  ;;  %v1940_v17 = vmul.f32 0.7978846, %v1812_v34  ;;  %v3967_v3 = vpop.eup %3966  ;;  %v5430_v13 = vmul.f32 %v1569_v26, %v5346_v37  ;;  %v5433_v5 = vmul.f32 %v1567_v53, %v5358_v59 }
 0x197   :  { %v1296_v62 = vmul.f32 0.5, %v5070_v31  ;;  %v1941_v46 = vmul.f32 0.7978846, %v1813_v39  ;;  %v2190_v25 = vadd.f32 1.0, %v3967_v3  ;;  %v1297_v35 = vmul.f32 0.5, %v5103_v61 }
 0x198   :  { %v5427_v51 = vpop.f32.mrf.mxu0  ;;  %v3969_v7 = vpop.eup %3968  ;;  %3681 = vmatmul.mubr.bf16.gmra.mxu1 %v2413_v41  ;;  %v5439_v2 = vadd.f32 %v4889_v14, %v5259_v15  ;;  %3978 = vtanh.f32 %v1940_v17  ;;  %v5444_v34 = vmul.f32 %v1572_v45, %v5371_v38  ;;  %v1298_v53 = vmul.f32 0.5, %v5158_v52 }
 0x199   :  { %v2191_v26 = vadd.f32 1.0, %v3969_v7  ;;  %3980 = vtanh.f32 %v1941_v46  ;;  %v1570_v31 = vmul.f32 %v1442_v60, %v5398_v0  ;;  %v1573_v39 = vmul.f32 %v1445_v63, %v5402_v22  ;;  %v5460_v63 = vld [vmem:[%s6787_s2] ss:$0 sm:$0xff] }
 0x19a   :  { %v5441_v10 = vpop.f32.mrf.mxu0  ;;  %v1571_v61 = vmul.f32 %v1443_v57, %v5408_v43  ;;  %v1299_v41 = vmul.f32 0.5, %v5168_v24  ;;  %v2318_v15 = vmul.f32 %v2190_v25, %v5382_v30  ;;  %v1814_v3 = vadd.f32 %v5292_v8, %v5221_v19 }
 0x19b   :  { %6818 = vst [vmem:[#allocation6_spill] sm:$0xff] %v5441_v10  ;;  %v3971_v14 = vpop.eup %3970  ;;  %v2319_v17 = vmul.f32 %v2191_v26, %v1295_v20  ;;  %v1815_v45 = vadd.f32 %v5312_v44, %v5237_v23  ;;  %v1448_v60 = vmul.f32 0.044715, %v5439_v2  ;;  %v5464_v24 = vadd.f32 %v5460_v63, %v5270_v58  ;;  %v6820_v10 = vld [vmem:[#allocation5_spill] sm:$0xff] }
 0x19c   :  { %v3973_v52 = vpop.eup %3972  ;;  %v2192_v46 = vadd.f32 1.0, %v3971_v14  ;;  %v5468_v30 = vadd.f32 %v5460_v63, %v5285_v47  ;;  %v5470_v8 = vpop.f32.mrf.mxu0  ;;  %v1942_v57 = vmul.f32 0.7978846, %v1814_v3  ;;  %v5473_v26 = vmul.f32 %v1570_v31, %v5398_v0 }
 0x19d   :  { %6819 = vst [vmem:[#allocation10_spill] sm:$0xff] %v5470_v8  ;;  %v2414_v44 = vpack.c.bf16 %v2319_v17, %v2318_v15  ;;  %v2193_v20 = vadd.f32 1.0, %v3973_v52  ;;  %v1943_v7 = vmul.f32 0.7978846, %v1815_v45  ;;  %v5476_v14 = vmul.f32 %v1573_v39, %v5402_v22  ;;  %v6821_v8 = vld [vmem:[#allocation8_spill] sm:$0xff] }
 0x19e   :  { %v2320_v25 = vmul.f32 %v2192_v46, %v1296_v62  ;;  %v5480_v58 = vadd.f32 %v5460_v63, %v5296_v40  ;;  %3982 = vtanh.f32 %v1942_v57  ;;  %v1816_v15 = vadd.f32 %v6821_v8, %v6820_v10  ;;  %v5489_v3 = vpop.f32.mrf.mxu0 }
 0x19f   :  { %3684 = vmatprep.mubr.bf16.mxu1 %v2414_v44  ;;  %v2321_v47 = vmul.f32 %v2193_v20, %v1297_v35  ;;  %v1817_v17 = vadd.f32 %v5309_v56, %v5225_v33  ;;  %v1576_v62 = vmul.f32 %v1448_v60, %v5439_v2  ;;  %v1446_v31 = vmul.f32 0.044715, %v5464_v24 }
 0x1a0   :  { %v1449_v39 = vmul.f32 0.044715, %v5468_v30  ;;  %3984 = vtanh.f32 %v1943_v7  ;;  %v5493_v35 = vadd.f32 %v5460_v63, %v5304_v48  ;;  %v1944_v52 = vmul.f32 0.7978846, %v1816_v15  ;;  %v5507_v15 = vpop.f32.mrf.mxu0 }
 0x1a1   :  { %v3975_v40 = vpop.eup %3974  ;;  %v2415_v45 = vpack.c.bf16 %v2321_v47, %v2320_v25  ;;  %v1945_v46 = vmul.f32 0.7978846, %v1817_v17  ;;  %v5496_v56 = vmul.f32 %v1571_v61, %v5408_v43  ;;  %v1300_v44 = vmul.f32 0.5, %v5131_v32 }
 0x1a2   :  { %6822 = vst [vmem:[#allocation5_spill] sm:$0xff] %v5493_v35  ;;  %v3977_v8 = vpop.eup %3976  ;;  %v2194_v60 = vadd.f32 1.0, %v3975_v40  ;;  %v1301_v20 = vmul.f32 0.5, %v5162_v1  ;;  %v1447_v7 = vmul.f32 0.044715, %v5480_v58  ;;  %v1302_v25 = vmul.f32 0.5, %v5221_v19 }
 0x1a3   :  { %3685 = vmatmul.mubr.bf16.gmra.mxu1 %v2415_v45  ;;  %v2195_v57 = vadd.f32 1.0, %v3977_v8  ;;  %3986 = vtanh.f32 %v1944_v52  ;;  %v5503_v48 = vmul.f32 %v1576_v62, %v5439_v2  ;;  %v1574_v47 = vmul.f32 %v1446_v31, %v5464_v24 }
 0x1a4   :  { %v1577_v61 = vmul.f32 %v1449_v39, %v5468_v30  ;;  %3988 = vtanh.f32 %v1945_v46  ;;  %v2322_v17 = vmul.f32 %v2194_v60, %v1298_v53  ;;  %v1452_v40 = vmul.f32 0.044715, %v5493_v35 }
 0x1a5   :  { %v3979_v32 = vpop.eup %3978  ;;  %v2323_v1 = vmul.f32 %v2195_v57, %v1299_v41  ;;  %v1818_v45 = vadd.f32 %v5351_v21, %v5277_v11  ;;  %v5514_v62 = vadd.f32 %v5460_v63, %v5315_v55  ;;  %v5518_v31 = vadd.f32 %v5460_v63, %v5326_v16  ;;  %v5531_v16 = vpop.f32.mrf.mxu0 }
 0x1a6   :  { %v3981_v19 = vpop.eup %3980  ;;  %v2196_v52 = vadd.f32 1.0, %v3979_v32  ;;  %v1819_v39 = vadd.f32 %v5376_v4, %v5289_v42  ;;  %v5524_v46 = vadd.f32 %v5460_v63, %v5337_v29  ;;  %v5527_v8 = vmul.f32 %v1574_v47, %v5464_v24 }
 0x1a7   :  { %v2416_v53 = vpack.c.bf16 %v2323_v1, %v2322_v17  ;;  %v2197_v41 = vadd.f32 1.0, %v3981_v19  ;;  %v1946_v21 = vmul.f32 0.7978846, %v1818_v45  ;;  %v1575_v55 = vmul.f32 %v1447_v7, %v5480_v58  ;;  %v6823_v17 = vld [vmem:[#allocation7_spill] sm:$0xff] }
 0x1a8   :  { %v1303_v60 = vmul.f32 0.5, %v5237_v23  ;;  %v1947_v57 = vmul.f32 0.7978846, %v1819_v39  ;;  %v2324_v32 = vmul.f32 %v2196_v52, %v1300_v44  ;;  %v6824_v1 = vld [vmem:[#allocation3_spill] sm:$0xff]  ;;  %v1580_v29 = vmul.f32 %v1452_v40, %v5493_v35 }
 0x1a9   :  { %3688 = vmatprep.mubr.bf16.mxu1 %v2416_v53  ;;  %v2325_v4 = vmul.f32 %v2197_v41, %v1301_v20  ;;  %3990 = vtanh.f32 %v1946_v21  ;;  %v1820_v19 = vadd.f32 %v6824_v1, %v6823_v17  ;;  %v1450_v45 = vmul.f32 0.044715, %v5514_v62  ;;  %v5548_v21 = vpop.f32.mrf.mxu0 }
 0x1aa   :  { %3992 = vtanh.f32 %v1947_v57  ;;  %v1821_v7 = vadd.f32 %v5354_v49, %v5281_v36  ;;  %v1453_v23 = vmul.f32 0.044715, %v5518_v31  ;;  %v1451_v39 = vmul.f32 0.044715, %v5524_v46 }
 0x1ab   :  { %v2417_v47 = vpack.c.bf16 %v2325_v4, %v2324_v32  ;;  %v1948_v53 = vmul.f32 0.7978846, %v1820_v19  ;;  %v3983_v44 = vpop.eup %3982  ;;  %v5542_v20 = vmul.f32 %v1577_v61, %v5468_v30  ;;  %v5545_v52 = vmul.f32 %v1575_v55, %v5480_v58 }
 0x1ac   :  { %v1304_v40 = vmul.f32 0.5, %v6820_v10  ;;  %v1949_v41 = vmul.f32 0.7978846, %v1821_v7  ;;  %v2198_v49 = vadd.f32 1.0, %v3983_v44  ;;  %v1305_v32 = vmul.f32 0.5, %v5225_v33 }
 0x1ad   :  { %v3985_v57 = vpop.eup %3984  ;;  %3689 = vmatmul.mubr.bf16.gmra.mxu1 %v2417_v47  ;;  %v5553_v4 = vadd.f32 %v5460_v63, %v5348_v12  ;;  %3994 = vtanh.f32 %v1948_v53  ;;  %v5556_v1 = vmul.f32 %v1580_v29, %v5493_v35  ;;  %v1306_v55 = vmul.f32 0.5, %v5277_v11 }
 0x1ae   :  { %v2199_v61 = vadd.f32 1.0, %v3985_v57  ;;  %3996 = vtanh.f32 %v1949_v41  ;;  %v1578_v10 = vmul.f32 %v1450_v45, %v5514_v62  ;;  %v1581_v19 = vmul.f32 %v1453_v23, %v5518_v31  ;;  %v5567_v57 = vpop.f32.mrf.mxu0  ;;  %v6826_v23 = vld [vmem:[#allocation2_spill] sm:$0xff] }
 0x1af   :  { %6825 = vst [vmem:[#allocation8_spill] sm:$0xff] %v5556_v1  ;;  %v1579_v7 = vmul.f32 %v1451_v39, %v5524_v46  ;;  %v1307_v33 = vmul.f32 0.5, %v5289_v42  ;;  %v2326_v44 = vmul.f32 %v2198_v49, %v1302_v25  ;;  %v1822_v53 = vadd.f32 %v5413_v54, %v5342_v18  ;;  %v6827_v1 = vld [vmem:[#allocation4_spill] sm:$0xff] }
 0x1b0   :  { %v3987_v47 = vpop.eup %3986  ;;  %v2327_v12 = vmul.f32 %v2199_v61, %v1303_v60  ;;  %v1823_v29 = vadd.f32 %v5433_v5, %v5358_v59  ;;  %v1456_v45 = vmul.f32 0.044715, %v5553_v4  ;;  %v5572_v39 = vadd.f32 %v5460_v63, %v6826_v23 }
 0x1b1   :  { %v3989_v11 = vpop.eup %3988  ;;  %v2200_v41 = vadd.f32 1.0, %v3987_v47  ;;  %v5576_v42 = vadd.f32 %v5460_v63, %v5373_v6  ;;  %v1950_v54 = vmul.f32 0.7978846, %v1822_v53  ;;  %v5579_v5 = vmul.f32 %v1578_v10, %v5514_v62 }
 0x1b2   :  { %v2418_v25 = vpack.c.bf16 %v2327_v12, %v2326_v44  ;;  %v2201_v60 = vadd.f32 1.0, %v3989_v11  ;;  %v1951_v49 = vmul.f32 0.7978846, %v1823_v29  ;;  %v5582_v47 = vmul.f32 %v1581_v19, %v5518_v31  ;;  %v6828_v29 = vld [vmem:[#allocation9_spill] sm:$0xff] }
 0x1b3   :  { %v2328_v61 = vmul.f32 %v2200_v41, %v1304_v40  ;;  %v5586_v35 = vadd.f32 %v5460_v63, %v6827_v1  ;;  %3998 = vtanh.f32 %v1950_v54  ;;  %v1824_v6 = vadd.f32 %v5387_v9, %v5320_v27  ;;  %v5592_v40 = vpop.f32.mrf.mxu0 }
 0x1b4   :  { %3692 = vmatprep.mubr.bf16.mxu1 %v2418_v25  ;;  %v2329_v23 = vmul.f32 %v2201_v60, %v1305_v32  ;;  %v1825_v44 = vadd.f32 %v5430_v13, %v5346_v37  ;;  %v1584_v10 = vmul.f32 %v1456_v45, %v5553_v4  ;;  %v1454_v19 = vmul.f32 0.044715, %v5572_v39 }
 0x1b5   :  { %v1457_v12 = vmul.f32 0.044715, %v5576_v42  ;;  %4000 = vtanh.f32 %v1951_v49  ;;  %v5599_v32 = vadd.f32 %v5460_v63, %v6828_v29  ;;  %v1952_v11 = vmul.f32 0.7978846, %v1824_v6 }
 0x1b6   :  { %v3991_v1 = vpop.eup %3990  ;;  %v2419_v53 = vpack.c.bf16 %v2329_v23, %v2328_v61  ;;  %v1953_v9 = vmul.f32 0.7978846, %v1825_v44  ;;  %v5602_v13 = vmul.f32 %v1579_v7, %v5524_v46  ;;  %v1308_v45 = vmul.f32 0.5, %v6823_v17  ;;  %v5610_v23 = vpop.f32.mrf.mxu0 }
 0x1b7   :  { %v3993_v41 = vpop.eup %3992  ;;  %v2202_v25 = vadd.f32 1.0, %v3991_v1  ;;  %v1309_v60 = vmul.f32 0.5, %v5281_v36  ;;  %v1455_v49 = vmul.f32 0.044715, %v5586_v35  ;;  %v5608_v61 = vmul.f32 0.5, %v5342_v18 }
 0x1b8   :  { %3693 = vmatmul.mubr.bf16.gmra.mxu1 %v2419_v53  ;;  %v2203_v54 = vadd.f32 1.0, %v3993_v41  ;;  %4002 = vtanh.f32 %v1952_v11  ;;  %v5613_v6 = vmul.f32 %v1584_v10, %v5553_v4  ;;  %v1582_v7 = vmul.f32 %v1454_v19, %v5572_v39 }
 0x1b9   :  { %v1585_v44 = vmul.f32 %v1457_v12, %v5576_v42  ;;  %4004 = vtanh.f32 %v1953_v9  ;;  %v2330_v1 = vmul.f32 %v2202_v25, %v1306_v55  ;;  %v1460_v29 = vmul.f32 0.044715, %v5599_v32 }
 0x1ba   :  { %v3995_v36 = vpop.eup %3994  ;;  %v2331_v53 = vmul.f32 %v2203_v54, %v1307_v33  ;;  %v1826_v18 = vadd.f32 %v5473_v26, %v5398_v0  ;;  %v5624_v10 = vadd.f32 %v5460_v63, %v5410_v50  ;;  %v5628_v19 = vadd.f32 %v5460_v63, %v5419_v28  ;;  %v5638_v54 = vpop.f32.mrf.mxu0 }
 0x1bb   :  { %v5617_v17 = vpop.f32.mrf.mxu1  ;;  %v3997_v11 = vpop.eup %3996  ;;  %v2204_v41 = vadd.f32 1.0, %v3995_v36  ;;  %v1827_v12 = vadd.f32 %v5496_v56, %v5408_v43  ;;  %v5636_v26 = vadd.f32 %v5460_v63, %v5427_v51  ;;  %v5641_v50 = vmul.f32 %v1582_v7, %v5572_v39 }
 0x1bc   :  { %6829 = vst [vmem:[#allocation7_spill] sm:$0xff] %v5617_v17  ;;  %v2420_v33 = vpack.c.bf16 %v2331_v53, %v2330_v1  ;;  %v2205_v9 = vadd.f32 1.0, %v3997_v11  ;;  %v1954_v25 = vmul.f32 0.7978846, %v1826_v18  ;;  %v1583_v28 = vmul.f32 %v1455_v49, %v5586_v35  ;;  %v5655_v11 = vpop.f32.mrf.mxu0 }
 0x1bd   :  { %v5632_v55 = vpop.f32.mrf.mxu1  ;;  %v1311_v36 = vmul.f32 0.5, %v5358_v59  ;;  %v1955_v17 = vmul.f32 0.7978846, %v1827_v12  ;;  %v2332_v56 = vmul.f32 %v2204_v41, %v1308_v45  ;;  %v1828_v1 = vadd.f32 %v5444_v34, %v5371_v38 }
 0x1be   :  { %6830 = vst [vmem:[#allocation3_spill] sm:$0xff] %v5632_v55  ;;  %3696 = vmatprep.mubr.bf16.mxu1 %v2420_v33  ;;  %v2333_v55 = vmul.f32 %v2205_v9, %v1309_v60  ;;  %4006 = vtanh.f32 %v1954_v25  ;;  %v1588_v53 = vmul.f32 %v1460_v29, %v5599_v32  ;;  %v1458_v18 = vmul.f32 0.044715, %v5624_v10  ;;  %v6832_v9 = vld [vmem:[#allocation6_spill] sm:$0xff] }
 0x1bf   :  { %v5647_v51 = vpop.f32.mrf.mxu1  ;;  %4008 = vtanh.f32 %v1955_v17  ;;  %v1829_v49 = vadd.f32 %v5476_v14, %v5402_v22  ;;  %v1461_v59 = vmul.f32 0.044715, %v5628_v19  ;;  %v1459_v45 = vmul.f32 0.044715, %v5636_v26 }
 0x1c0   :  { %6831 = vst [vmem:[#allocation2_spill] sm:$0xff] %v5647_v51  ;;  %v2421_v7 = vpack.c.bf16 %v2333_v55, %v2332_v56  ;;  %v1956_v60 = vmul.f32 0.7978846, %v1828_v1  ;;  %v3999_v41 = vpop.eup %3998  ;;  %v5658_v34 = vmul.f32 %v1585_v44, %v5576_v42  ;;  %v5661_v29 = vmul.f32 %v1583_v28, %v5586_v35 }
 0x1c1   :  { %v1312_v17 = vmul.f32 0.5, %v5320_v27  ;;  %v1957_v12 = vmul.f32 0.7978846, %v1829_v49  ;;  %v2206_v14 = vadd.f32 1.0, %v3999_v41  ;;  %v1313_v55 = vmul.f32 0.5, %v5346_v37  ;;  %v5669_v56 = vpop.f32.mrf.mxu1  ;;  %v5679_v41 = vpop.f32.mrf.mxu0 }
 0x1c2   :  { %v4001_v33 = vpop.eup %4000  ;;  %3697 = vmatmul.mubr.bf16.gmra.mxu1 %v2421_v7  ;;  %v5667_v25 = vadd.f32 %v5460_v63, %v6832_v9  ;;  %4010 = vtanh.f32 %v1956_v60  ;;  %6833 = vst [vmem:[#allocation4_spill] sm:$0xff] %v5669_v56  ;;  %v5672_v1 = vmul.f32 %v1588_v53, %v5599_v32  ;;  %v1314_v28 = vmul.f32 0.5, %v5398_v0  ;;  %v6835_v56 = vld [vmem:[#allocation10_spill] sm:$0xff] }
 0x1c3   :  { %v2207_v44 = vadd.f32 1.0, %v4001_v33  ;;  %4012 = vtanh.f32 %v1957_v12  ;;  %v1586_v27 = vmul.f32 %v1458_v18, %v5624_v10  ;;  %v1589_v49 = vmul.f32 %v1461_v59, %v5628_v19 }
 0x1c4   :  { %6834 = vst [vmem:[#allocation9_spill] sm:$0xff] %v5672_v1  ;;  %v1587_v37 = vmul.f32 %v1459_v45, %v5636_v26  ;;  %v1315_v7 = vmul.f32 0.5, %v5408_v43  ;;  %v2334_v9 = vmul.f32 %v2206_v14, %v5608_v61  ;;  %v1830_v53 = vadd.f32 %v5527_v8, %v5464_v24  ;;  %v5695_v61 = vpop.f32.mrf.mxu1  ;;  %v5707_v1 = vpop.f32.mrf.mxu0 }
 0x1c5   :  { %v4003_v60 = vpop.eup %4002  ;;  %v2335_v33 = vmul.f32 %v2207_v44, %v1311_v36  ;;  %v1831_v0 = vadd.f32 %v5545_v52, %v5480_v58  ;;  %v1464_v59 = vmul.f32 0.044715, %v5667_v25  ;;  %v5689_v45 = vadd.f32 %v5460_v63, %v6835_v56 }
 0x1c6   :  { %v4005_v12 = vpop.eup %4004  ;;  %v2208_v18 = vadd.f32 1.0, %v4003_v60  ;;  %v5693_v43 = vadd.f32 %v5460_v63, %v5489_v3  ;;  %v1958_v8 = vmul.f32 0.7978846, %v1830_v53  ;;  %v5698_v52 = vmul.f32 %v1586_v27, %v5624_v10 }
 0x1c7   :  { %v2422_v36 = vpack.c.bf16 %v2335_v33, %v2334_v9  ;;  %v2209_v14 = vadd.f32 1.0, %v4005_v12  ;;  %v1959_v44 = vmul.f32 0.7978846, %v1831_v0  ;;  %v5701_v60 = vmul.f32 %v1589_v49, %v5628_v19 }
 0x1c8   :  { %v2336_v51 = vmul.f32 %v2208_v18, %v1312_v17  ;;  %v5705_v56 = vadd.f32 %v5460_v63, %v5507_v15  ;;  %4014 = vtanh.f32 %v1958_v8  ;;  %v1832_v9 = vadd.f32 %v5503_v48, %v5439_v2  ;;  %v5716_v15 = vpop.f32.mrf.mxu1  ;;  %v5727_v8 = vpop.f32.mrf.mxu0 }
 0x1c9   :  { %3700 = vmatprep.mubr.bf16.mxu1 %v2422_v36  ;;  %v2337_v3 = vmul.f32 %v2209_v14, %v1313_v55  ;;  %v1833_v17 = vadd.f32 %v5542_v20, %v5468_v30  ;;  %v1592_v27 = vmul.f32 %v1464_v59, %v5667_v25  ;;  %v1462_v49 = vmul.f32 0.044715, %v5689_v45  ;;  %6836 = vst [vmem:[#allocation6_spill] sm:$0xff] %v5716_v15 }
 0x1ca   :  { %v1465_v33 = vmul.f32 0.044715, %v5693_v43  ;;  %4016 = vtanh.f32 %v1959_v44  ;;  %v5720_v55 = vadd.f32 %v5460_v63, %v5531_v16  ;;  %v1960_v12 = vmul.f32 0.7978846, %v1832_v9 }
 0x1cb   :  { %v4007_v53 = vpop.eup %4006  ;;  %v2423_v0 = vpack.c.bf16 %v2337_v3, %v2336_v51  ;;  %v1961_v48 = vmul.f32 0.7978846, %v1833_v17  ;;  %v5723_v20 = vmul.f32 %v1587_v37, %v5636_v26  ;;  %v1316_v36 = vmul.f32 0.5, %v5371_v38  ;;  %v5738_v38 = vpop.f32.mrf.mxu1 }
 0x1cc   :  { %6837 = vst [vmem:[#allocation10_spill] sm:$0xff] %v5720_v55  ;;  %v4009_v18 = vpop.eup %4008  ;;  %v2210_v59 = vadd.f32 1.0, %v4007_v53  ;;  %v1317_v14 = vmul.f32 0.5, %v5402_v22  ;;  %v1463_v51 = vmul.f32 0.044715, %v5705_v56  ;;  %v5731_v16 = vmul.f32 0.5, %v5464_v24 }
 0x1cd   :  { %3701 = vmatmul.mubr.bf16.gmra.mxu1 %v2423_v0  ;;  %v2211_v44 = vadd.f32 1.0, %v4009_v18  ;;  %4018 = vtanh.f32 %v1960_v12  ;;  %v5734_v3 = vmul.f32 %v1592_v27, %v5667_v25  ;;  %v1590_v37 = vmul.f32 %v1462_v49, %v5689_v45  ;;  %6838 = vst [vmem:[#allocation11_spill] sm:$0xff] %v5738_v38  ;;  %v5764_v38 = vpop.f32.mrf.mxu1 }
 0x1ce   :  { %v1593_v9 = vmul.f32 %v1465_v33, %v5693_v43  ;;  %4020 = vtanh.f32 %v1961_v48  ;;  %v2338_v17 = vmul.f32 %v2210_v59, %v1314_v28  ;;  %v1468_v0 = vmul.f32 0.044715, %v5720_v55  ;;  %v5753_v28 = vpop.f32.mrf.mxu0 }
 0x1cf   :  { %v4011_v22 = vpop.eup %4010  ;;  %v2339_v53 = vmul.f32 %v2211_v44, %v1315_v7  ;;  %v1834_v24 = vadd.f32 %v5579_v5, %v5514_v62  ;;  %v5745_v27 = vadd.f32 %v5460_v63, %v5548_v21  ;;  %v5749_v49 = vadd.f32 %v5460_v63, %v5567_v57 }
 0x1d0   :  { %v4013_v18 = vpop.eup %4012  ;;  %v2212_v12 = vadd.f32 1.0, %v4011_v22  ;;  %v1835_v33 = vadd.f32 %v5602_v13, %v5524_v46  ;;  %v5757_v5 = vadd.f32 %v5460_v63, %v5592_v40  ;;  %v5760_v44 = vmul.f32 %v1590_v37, %v5689_v45  ;;  %v5772_v37 = vpop.f32.mrf.mxu0 }
 0x1d1   :  { %v2424_v7 = vpack.c.bf16 %v2339_v53, %v2338_v17  ;;  %v2213_v48 = vadd.f32 1.0, %v4013_v18  ;;  %v1962_v59 = vmul.f32 0.7978846, %v1834_v24  ;;  %v1591_v21 = vmul.f32 %v1463_v51, %v5705_v56  ;;  %v6839_v17 = vld [vmem:[#allocation5_spill] sm:$0xff]  ;;  %v6840_v53 = vld [vmem:[#allocation8_spill] sm:$0xff] }
 0x1d2   :  { %v1319_v57 = vmul.f32 0.5, %v5480_v58  ;;  %v1963_v22 = vmul.f32 0.7978846, %v1835_v33  ;;  %v2340_v13 = vmul.f32 %v2212_v12, %v1316_v36  ;;  %v1836_v18 = vadd.f32 %v6840_v53, %v6839_v17 }
 0x1d3   :  { %3704 = vmatprep.mubr.bf16.mxu1 %v2424_v7  ;;  %v2341_v15 = vmul.f32 %v2213_v48, %v1317_v14  ;;  %4022 = vtanh.f32 %v1962_v59  ;;  %v1596_v40 = vmul.f32 %v1468_v0, %v5720_v55  ;;  %v1466_v24 = vmul.f32 0.044715, %v5745_v27 }
 0x1d4   :  { %4024 = vtanh.f32 %v1963_v22  ;;  %v1837_v51 = vadd.f32 %v5582_v47, %v5518_v31  ;;  %v1469_v33 = vmul.f32 0.044715, %v5749_v49  ;;  %v1467_v36 = vmul.f32 0.044715, %v5757_v5 }
 0x1d5   :  { %v2425_v58 = vpack.c.bf16 %v2341_v15, %v2340_v13  ;;  %v1964_v14 = vmul.f32 0.7978846, %v1836_v18  ;;  %v4015_v12 = vpop.eup %4014  ;;  %v5777_v7 = vmul.f32 %v1593_v9, %v5693_v43  ;;  %v5780_v0 = vmul.f32 %v1591_v21, %v5705_v56  ;;  %v5783_v22 = vpop.f32.mrf.mxu1 }
 0x1d6   :  { %v1320_v48 = vmul.f32 0.5, %v5439_v2  ;;  %v1965_v59 = vmul.f32 0.7978846, %v1837_v51  ;;  %v2214_v15 = vadd.f32 1.0, %v4015_v12  ;;  %v1321_v13 = vmul.f32 0.5, %v5468_v30  ;;  %v5794_v2 = vpop.f32.mrf.mxu0 }
 0x1d7   :  { %v4017_v47 = vpop.eup %4016  ;;  %3705 = vmatmul.mubr.bf16.gmra.mxu1 %v2425_v58  ;;  %v5788_v53 = vadd.f32 %v5460_v63, %v5610_v23  ;;  %4026 = vtanh.f32 %v1964_v14  ;;  %v5791_v18 = vmul.f32 %v1596_v40, %v5720_v55  ;;  %v1322_v21 = vmul.f32 0.5, %v5514_v62  ;;  %v5796_v51 = vpop.f32.mrf.mxu1 }
 0x1d8   :  { %v2215_v9 = vadd.f32 1.0, %v4017_v47  ;;  %4028 = vtanh.f32 %v1965_v59  ;;  %6842 = vst [vmem:[#allocation8_spill] sm:$0xff] %v5796_v51  ;;  %v1594_v58 = vmul.f32 %v1466_v24, %v5745_v27  ;;  %v1597_v30 = vmul.f32 %v1469_v33, %v5749_v49 }
 0x1d9   :  { %6841 = vst [vmem:[#allocation5_spill] sm:$0xff] %v5791_v18  ;;  %v1595_v12 = vmul.f32 %v1467_v36, %v5757_v5  ;;  %v5803_v23 = vadd.f32 %v5460_v63, %v5638_v54  ;;  %v2342_v40 = vmul.f32 %v2214_v15, %v5731_v16  ;;  %v1838_v62 = vadd.f32 %v5641_v50, %v5572_v39  ;;  %v5810_v51 = vpop.f32.mrf.mxu1  ;;  %v5818_v50 = vpop.f32.mrf.mxu0 }
 0x1da   :  { %v4019_v14 = vpop.eup %4018  ;;  %v2343_v47 = vmul.f32 %v2215_v9, %v1319_v57  ;;  %v1839_v59 = vadd.f32 %v5661_v29, %v5586_v35  ;;  %6843 = vst [vmem:[#allocation12_spill] sm:$0xff] %v5810_v51  ;;  %v1323_v36 = vmul.f32 0.5, %v5524_v46  ;;  %v1472_v18 = vmul.f32 0.044715, %v5788_v53 }
 0x1db   :  { %v4021_v24 = vpop.eup %4020  ;;  %v2216_v33 = vadd.f32 1.0, %v4019_v14  ;;  %v5816_v54 = vadd.f32 %v5460_v63, %v5655_v11  ;;  %v1966_v15 = vmul.f32 0.7978846, %v1838_v62  ;;  %v5820_v55 = vpop.f32.mrf.mxu1  ;;  %v1470_v51 = vmul.f32 0.044715, %v5803_v23 }
 0x1dc   :  { %v2426_v16 = vpack.c.bf16 %v2343_v47, %v2342_v40  ;;  %v2217_v57 = vadd.f32 1.0, %v4021_v24  ;;  %v1967_v9 = vmul.f32 0.7978846, %v1839_v59  ;;  %v5825_v46 = vadd.f32 %v5460_v63, %v5679_v41 }
 0x1dd   :  { %6844 = vst [vmem:[#allocation13_spill] sm:$0xff] %v5816_v54  ;;  %v2344_v29 = vmul.f32 %v2216_v33, %v1320_v48  ;;  %v5829_v14 = vadd.f32 %v5460_v63, %v5707_v1  ;;  %4030 = vtanh.f32 %v1966_v15  ;;  %v1840_v40 = vadd.f32 %v5613_v6, %v5553_v4 }
 0x1de   :  { %3708 = vmatprep.mubr.bf16.mxu1 %v2426_v16  ;;  %v2345_v11 = vmul.f32 %v2217_v57, %v1321_v13  ;;  %v1841_v47 = vadd.f32 %v5658_v34, %v5576_v42  ;;  %v5835_v48 = vpop.f32.mrf.mxu1  ;;  %v5838_v62 = vmul.f32 %v1594_v58, %v5745_v27  ;;  %v5841_v41 = vmul.f32 %v1597_v30, %v5749_v49  ;;  %v5845_v16 = vpop.f32.mrf.mxu0 }
 0x1df   :  { %6845 = vst [vmem:[#allocation14_spill] sm:$0xff] %v5835_v48  ;;  %v1473_v1 = vmul.f32 0.044715, %v5816_v54  ;;  %4032 = vtanh.f32 %v1967_v9  ;;  %v1600_v24 = vmul.f32 %v1472_v18, %v5788_v53  ;;  %v1968_v33 = vmul.f32 0.7978846, %v1840_v40 }
 0x1e0   :  { %v4023_v59 = vpop.eup %4022  ;;  %v2427_v13 = vpack.c.bf16 %v2345_v11, %v2344_v29  ;;  %v1969_v6 = vmul.f32 0.7978846, %v1841_v47  ;;  %v5847_v34 = vpop.f32.mrf.mxu1  ;;  %v5850_v58 = vmul.f32 %v1595_v12, %v5757_v5  ;;  %v1324_v30 = vmul.f32 0.5, %v6839_v17 }
 0x1e1   :  { %6846 = vst [vmem:[#allocation15_spill] sm:$0xff] %v5847_v34  ;;  %v4025_v57 = vpop.eup %4024  ;;  %v2218_v15 = vadd.f32 1.0, %v4023_v59  ;;  %v1471_v48 = vmul.f32 0.044715, %v5825_v46  ;;  %v1598_v29 = vmul.f32 %v1470_v51, %v5803_v23  ;;  %v1476_v18 = vmul.f32 0.044715, %v5829_v14 }
 0x1e2   :  { %3709 = vmatmul.mubr.bf16.gmra.mxu1 %v2427_v13  ;;  %v2219_v9 = vadd.f32 1.0, %v4025_v57  ;;  %4034 = vtanh.f32 %v1968_v33  ;;  %v1325_v11 = vmul.f32 0.5, %v5518_v31  ;;  %v1601_v40 = vmul.f32 %v1473_v1, %v5816_v54  ;;  %v5866_v57 = vpop.f32.mrf.mxu0  ;;  %v5868_v33 = vpop.f32.mrf.mxu1 }
 0x1e3   :  { %4036 = vtanh.f32 %v1969_v6  ;;  %v5860_v12 = vadd.f32 %v5460_v63, %v5753_v28  ;;  %v2346_v17 = vmul.f32 %v2218_v15, %v1322_v21  ;;  %v5863_v13 = vmul.f32 %v1600_v24, %v5788_v53  ;;  %6847 = vst [vmem:[#allocation16_spill] sm:$0xff] %v5868_v33  ;;  %v5877_v21 = vld [vmem:[%s6788_s4] ss:$0 sm:$0xff] }
 0x1e4   :  { %v4027_v47 = vpop.eup %4026  ;;  %v2347_v59 = vmul.f32 %v2219_v9, %v1323_v36  ;;  %v1326_v51 = vmul.f32 0.5, %v5572_v39  ;;  %v1599_v1 = vmul.f32 %v1471_v48, %v5825_v46  ;;  %v1327_v6 = vmul.f32 0.5, %v5586_v35 }
 0x1e5   :  { %v4029_v31 = vpop.eup %4028  ;;  %v2220_v34 = vadd.f32 1.0, %v4027_v47  ;;  %v1842_v28 = vadd.f32 %v5698_v52, %v5624_v10  ;;  %v5880_v24 = vmul.f32 %v1598_v29, %v5803_v23  ;;  %v1604_v15 = vmul.f32 %v1476_v18, %v5829_v14  ;;  %v6850_v29 = vld [vmem:[#allocation7_spill] sm:$0xff]  ;;  %v5895_v18 = vpop.f32.mrf.mxu0 }
 0x1e6   :  { %v2428_v36 = vpack.c.bf16 %v2347_v59, %v2346_v17  ;;  %v2221_v39 = vadd.f32 1.0, %v4029_v31  ;;  %v5884_v9 = vmul.f32 %v1601_v40, %v5816_v54  ;;  %v1477_v35 = vmul.f32 0.044715, %v5860_v12  ;;  %v5897_v40 = vpop.f32.mrf.mxu1 }
 0x1e7   :  { %v1843_v52 = vadd.f32 %v5723_v20, %v5636_v26  ;;  %v1970_v48 = vmul.f32 0.7978846, %v1842_v28  ;;  %v2348_v47 = vmul.f32 %v2220_v34, %v1324_v30  ;;  %v5891_v17 = vadd.f32 %v5460_v63, %v5794_v2  ;;  %6851 = vst [vmem:[#allocation7_spill] sm:$0xff] %v5897_v40  ;;  %v6852_v28 = vld [vmem:[#allocation9_spill] sm:$0xff] }
 0x1e8   :  { %6848 = vst [vmem:[#allocation17_spill] sm:$0xff] %v5884_v9  ;;  %3712 = vmatprep.mubr.bf16.mxu1 %v2428_v36  ;;  %v2349_v33 = vmul.f32 %v2221_v39, %v1325_v11  ;;  %v2576_v59 = vadd.f32 %v6850_v29, %v5877_v21  ;;  %v5900_v31 = vmul.f32 %v1599_v1, %v5825_v46  ;;  %v1328_v39 = vmul.f32 0.5, %v5553_v4 }
 0x1e9   :  { %6849 = vst [vmem:[#allocation18_spill] sm:$0xff] %v5891_v17  ;;  %v5904_v20 = vadd.f32 %v5460_v63, %v5727_v8  ;;  %v1971_v34 = vmul.f32 0.7978846, %v1843_v52  ;;  %4038 = vtanh.f32 %v1970_v48  ;;  %v1732_v2 = vmul.f32 %v1604_v15, %v5829_v14 }
 0x1ea   :  { %v2429_v30 = vpack.c.bf16 %v2349_v33, %v2348_v47  ;;  %v1480_v11 = vmul.f32 0.044715, %v5891_v17  ;;  %3068 = vst.msk [vmem:[%s6789_s5 + $0x30] sm:$0xff] %vm492_vm0, %v2576_v59  ;;  %v1844_v1 = vadd.f32 %v6852_v28, %v5599_v32  ;;  %v4031_v36 = vpop.eup %4030  ;;  %v1845_v8 = vadd.f32 %v5701_v60, %v5628_v19  ;;  %v6853_v33 = vld [vmem:[#allocation3_spill] sm:$0xff]  ;;  %v5924_v28 = vpop.f32.mrf.mxu0 }
 0x1eb   :  { %4040 = vtanh.f32 %v1971_v34  ;;  %v2568_v15 = vadd.f32 %v5877_v21, %v6853_v33  ;;  %v2222_v48 = vadd.f32 1.0, %v4031_v36  ;;  %v1605_v47 = vmul.f32 %v1477_v35, %v5860_v12  ;;  %v5926_v4 = vpop.f32.mrf.mxu1 }
 0x1ec   :  { %v4033_v52 = vpop.eup %4032  ;;  %3713 = vmatmul.mubr.bf16.gmra.mxu1 %v2429_v30  ;;  %v5922_v29 = vadd.f32 %v5460_v63, %v5772_v37  ;;  %v1972_v59 = vmul.f32 0.7978846, %v1844_v1  ;;  %6854 = vst [vmem:[#allocation9_spill] sm:$0xff] %v5926_v4  ;;  %v1474_v60 = vmul.f32 0.044715, %v5904_v20  ;;  %v5935_v35 = vadd.f32 %v5460_v63, %v5845_v16  ;;  %v6855_v1 = vld [vmem:[#allocation2_spill] sm:$0xff] }
 0x1ed   :  { %v2223_v34 = vadd.f32 1.0, %v4033_v52  ;;  %v1973_v40 = vmul.f32 0.7978846, %v1845_v8  ;;  %3066 = vst.msk [vmem:[%s6789_s5 + $0x20] sm:$0xff] %vm492_vm0, %v2568_v15  ;;  %v1860_v37 = vadd.f32 %v1732_v2, %v5829_v14  ;;  %v1608_v30 = vmul.f32 %v1480_v11, %v5891_v17  ;;  %v5941_v33 = vpop.f32.mrf.mxu1  ;;  %v6856_v11 = vld [vmem:[#allocation4_spill] sm:$0xff] }
 0x1ee   :  { %4042 = vtanh.f32 %v1972_v59  ;;  %v2579_v36 = vadd.f32 %v6855_v1, %v5877_v21  ;;  %v2350_v52 = vmul.f32 %v2222_v48, %v1326_v51  ;;  %v1481_v15 = vmul.f32 0.044715, %v5935_v35  ;;  %v5952_v1 = vpop.f32.mrf.mxu0 }
 0x1ef   :  { %v4035_v8 = vpop.eup %4034  ;;  %v2351_v4 = vmul.f32 %v2223_v34, %v1327_v6  ;;  %4044 = vtanh.f32 %v1973_v40  ;;  %v1733_v16 = vmul.f32 %v1605_v47, %v5860_v12  ;;  %v1475_v2 = vmul.f32 0.044715, %v5922_v29 }
 0x1f0   :  { %v4037_v9 = vpop.eup %4036  ;;  %v2224_v54 = vadd.f32 1.0, %v4035_v8  ;;  %3069 = vst.msk [vmem:[%s6789_s5 + $0x38] sm:$0xff] %vm492_vm0, %v2579_v36  ;;  %v2571_v59 = vadd.f32 %v5877_v21, %v6856_v11  ;;  %v1329_v6 = vmul.f32 0.5, %v5576_v42  ;;  %v5957_v48 = vadd.f32 %v5460_v63, %v5818_v50  ;;  %v5976_v11 = vpop.f32.mrf.mxu0 }
 0x1f1   :  { %v2430_v51 = vpack.c.bf16 %v2351_v4, %v2350_v52  ;;  %v2225_v40 = vadd.f32 1.0, %v4037_v9  ;;  %v1988_v47 = vmul.f32 0.7978846, %v1860_v37  ;;  %v1602_v34 = vmul.f32 %v1474_v60, %v5904_v20  ;;  %v5966_v4 = vpop.f32.mrf.mxu1 }
 0x1f2   :  { %v1330_v8 = vmul.f32 0.5, %v5624_v10  ;;  %v1609_v36 = vmul.f32 %v1481_v15, %v5935_v35  ;;  %3067 = vst.msk [vmem:[%s6789_s5 + $0x28] sm:$0xff] %vm492_vm0, %v2571_v59  ;;  %v2352_v42 = vmul.f32 %v2224_v54, %v1328_v39  ;;  %v1736_v50 = vmul.f32 %v1608_v30, %v5891_v17 }
 0x1f3   :  { %3716 = vmatprep.mubr.bf16.mxu1 %v2430_v51  ;;  %v2353_v9 = vmul.f32 %v2225_v40, %v1329_v6  ;;  %v1846_v37 = vadd.f32 %v5760_v44, %v5689_v45  ;;  %v1861_v60 = vadd.f32 %v1733_v16, %v5860_v12  ;;  %v1603_v10 = vmul.f32 %v1475_v2, %v5922_v29  ;;  %v5985_v2 = vpop.f32.mrf.mxu1 }
 0x1f4   :  { %v1331_v52 = vmul.f32 0.5, %v5636_v26  ;;  %v1847_v15 = vadd.f32 %v5780_v0, %v5705_v56  ;;  %v1478_v54 = vmul.f32 0.044715, %v5957_v48  ;;  %v2592_v30 = vadd.f32 %v5695_v61, %v5877_v21 }
 0x1f5   :  { %v2431_v59 = vpack.c.bf16 %v2353_v9, %v2352_v42  ;;  %v1974_v39 = vmul.f32 0.7978846, %v1846_v37  ;;  %4046 = vtanh.f32 %v1988_v47  ;;  %v5982_v44 = vmul.f32 %v1602_v34, %v5904_v20 }
 0x1f6   :  { %v4039_v51 = vpop.eup %4038  ;;  %v1737_v16 = vmul.f32 %v1609_v36, %v5935_v35  ;;  %v1975_v26 = vmul.f32 0.7978846, %v1847_v15  ;;  %v1864_v6 = vadd.f32 %v1736_v50, %v5891_v17  ;;  %v5990_v40 = vadd.f32 %v5460_v63, %v5866_v57  ;;  %3072 = vst.msk [vmem:[%s6789_s5 + $0x50] sm:$0xff] %vm492_vm0, %v2592_v30  ;;  %v3622_v57 = vpop.f32.mrf.mxu0  ;;  %v6857_v30 = vld [vmem:[#allocation6_spill] sm:$0xff] }
 0x1f7   :  { %3717 = vmatmul.mubr.bf16.gmra.mxu1 %v2431_v59  ;;  %v2226_v0 = vadd.f32 1.0, %v4039_v51  ;;  %4048 = vtanh.f32 %v1974_v39  ;;  %v5998_v47 = vadd.f32 %v5460_v63, %v5895_v18  ;;  %v1848_v34 = vadd.f32 %v5734_v3, %v5667_v25 }
 0x1f8   :  { %v4041_v61 = vpop.eup %4040  ;;  %4050 = vtanh.f32 %v1975_v26  ;;  %v1849_v36 = vadd.f32 %v5777_v7, %v5693_v43  ;;  %v1989_v42 = vmul.f32 0.7978846, %v1861_v60  ;;  %v1332_v50 = vmul.f32 0.5, %v5599_v32  ;;  %v6858_v60 = vld [vmem:[#allocation11_spill] sm:$0xff] }
 0x1f9   :  { %v2227_v9 = vadd.f32 1.0, %v4041_v61  ;;  %v1606_v37 = vmul.f32 %v1478_v54, %v5957_v48  ;;  %v1865_v15 = vadd.f32 %v1737_v16, %v5935_v35  ;;  %v1976_v59 = vmul.f32 0.7978846, %v1848_v34  ;;  %v2551_v34 = vpop.f32.mrf.mxu0 }
 0x1fa   :  { %v1977_v39 = vmul.f32 0.7978846, %v1849_v36  ;;  %v2584_v63 = vadd.f32 %v5877_v21, %v6857_v30  ;;  %v6009_v18 = vpop.f32.mrf.mxu1  ;;  %v2354_v51 = vmul.f32 %v2226_v0, %v1330_v8  ;;  %v1992_v7 = vmul.f32 0.7978846, %v1864_v6 }
 0x1fb   :  { %v4043_v3 = vpop.eup %4042  ;;  %v2355_v26 = vmul.f32 %v2227_v9, %v1331_v52  ;;  %v2595_v61 = vadd.f32 %v6858_v60, %v5877_v21  ;;  %v1479_v54 = vmul.f32 0.044715, %v5990_v40  ;;  %v1484_v16 = vmul.f32 0.044715, %v5998_v47 }
 0x1fc   :  { %v4045_v17 = vpop.eup %4044  ;;  %v2228_v32 = vadd.f32 1.0, %v4043_v3  ;;  %4052 = vtanh.f32 %v1976_v59  ;;  %3070 = vst.msk [vmem:[%s6789_s5 + $0x40] sm:$0xff] %vm492_vm0, %v2584_v63  ;;  %v6019_v36 = vpop.f32.mrf.mxu1  ;;  %v1333_v52 = vmul.f32 0.5, %v5628_v19  ;;  %v6027_v6 = vmul.f32 %v1603_v10, %v5922_v29 }
 0x1fd   :  { %v2432_v8 = vpack.c.bf16 %v2355_v26, %v2354_v51  ;;  %v2229_v0 = vadd.f32 1.0, %v4045_v17  ;;  %4054 = vtanh.f32 %v1977_v39  ;;  %3073 = vst.msk [vmem:[%s6789_s5 + $0x58] sm:$0xff] %vm492_vm0, %v2595_v61  ;;  %v6030_v9 = vmul.f32 %v1606_v37, %v5957_v48  ;;  %v3623_v3 = vpop.f32.mrf.mxu0  ;;  %v4096_v26 = vld [vmem:[%s6787_s2] ss:$0 sm:$0xff] }
 0x1fe   :  { %4056 = vtanh.f32 %v1989_v42  ;;  %v1993_v59 = vmul.f32 0.7978846, %v1865_v15  ;;  %v6032_v30 = vpop.f32.mrf.mxu1  ;;  %v2356_v63 = vmul.f32 %v2228_v32, %v1332_v50  ;;  %v1334_v17 = vmul.f32 0.5, %v5689_v45  ;;  %v6860_v32 = vld [vmem:[#allocation5_spill] sm:$0xff] }
 0x1ff   :  { %3720 = vmatprep.mubr.bf16.mxu1 %v2432_v8  ;;  %v2357_v19 = vmul.f32 %v2229_v0, %v1333_v52  ;;  %v2587_v39 = vadd.f32 %v5877_v21, %v5764_v38  ;;  %4058 = vtanh.f32 %v1992_v7  ;;  %v6038_v42 = vmul.f32 %v1479_v54, %v5990_v40  ;;  %v6861_v8 = vld [vmem:[#allocation8_spill] sm:$0xff]  ;;  %v2554_v0 = vpop.f32.mrf.mxu0 }
 0x200   :  { %v1335_v10 = vmul.f32 0.5, %v5705_v56  ;;  %v1612_v37 = vmul.f32 %v1484_v16, %v5998_v47  ;;  %v6042_v15 = vpop.f32.mrf.mxu1  ;;  %v1850_v45 = vadd.f32 %v5838_v62, %v5745_v27  ;;  %v1851_v38 = vadd.f32 %v5850_v58, %v5757_v5 }
 0x201   :  { %v2433_v51 = vpack.c.bf16 %v2357_v19, %v2356_v63  ;;  %3071 = vst.msk [vmem:[%s6789_s5 + $0x48] sm:$0xff] %vm492_vm0, %v2587_v39  ;;  %v2560_v50 = vadd.f32 %v3622_v57, %v5877_v21  ;;  %4060 = vtanh.f32 %v1993_v59  ;;  %v1336_v56 = vmul.f32 0.5, %v5667_v25  ;;  %v6859_v25 = vld [vmem:[#allocation10_spill] sm:$0xff] }
 0x202   :  { %v6058_v7 = vadd.f32 %v4096_v26, %v5952_v1  ;;  %v2608_v60 = vadd.f32 %v5783_v22, %v5877_v21  ;;  %v6062_v61 = vpop.eup %4046  ;;  %v6065_v62 = vadd.f32 %v4096_v26, %v5924_v28  ;;  %v1978_v58 = vmul.f32 0.7978846, %v1850_v45 }
 0x203   :  { %3721 = vmatmul.mubr.bf16.gmra.mxu1 %v2433_v51  ;;  %v1979_v57 = vmul.f32 0.7978846, %v1851_v38  ;;  %3064 = vst.msk [vmem:[%s6789_s5 + $0x10] sm:$0xff] %vm492_vm0, %v2560_v50  ;;  %v1852_v1 = vadd.f32 %v6860_v32, %v6859_v25  ;;  %v1740_v16 = vmul.f32 %v1612_v37, %v5998_v47  ;;  %v1853_v22 = vadd.f32 %v5841_v41, %v5749_v49 }
 0x204   :  { %v4049_v54 = vpop.eup %4048  ;;  %3076 = vst.msk [vmem:[%s6789_s5 + $0x70] sm:$0xff] %vm492_vm0, %v2608_v60  ;;  %v2552_v28 = vadd.f32 %v5877_v21, %v2551_v34  ;;  %v2600_v52 = vadd.f32 %v5877_v21, %v6861_v8  ;;  %v6083_v59 = vpop.f32.mrf.mxu1  ;;  %4062 = vtanh.f32 %v1978_v58  ;;  %v2563_v37 = vadd.f32 %v3623_v3, %v5877_v21  ;;  %v6862_v3 = vld [vmem:[#allocation12_spill] sm:$0xff] }
 0x205   :  { %v4051_v63 = vpop.eup %4050  ;;  %v2230_v19 = vadd.f32 1.0, %v4049_v54  ;;  %v1980_v39 = vmul.f32 0.7978846, %v1852_v1  ;;  %v1485_v45 = vmul.f32 0.044715, %v6058_v7  ;;  %4064 = vtanh.f32 %v1979_v57 }
 0x206   :  { %v2231_v51 = vadd.f32 1.0, %v4051_v63  ;;  %v1981_v38 = vmul.f32 0.7978846, %v1853_v22  ;;  %3062 = vst.msk [vmem:[%s6789_s5] sm:$0xff] %vm492_vm0, %v2552_v28  ;;  %3074 = vst.msk [vmem:[%s6789_s5 + $0x60] sm:$0xff] %vm492_vm0, %v2600_v52  ;;  %v6095_v41 = vpop.f32.mrf.mxu1  ;;  %v1337_v34 = vmul.f32 0.5, %v5693_v43  ;;  %v2611_v50 = vadd.f32 %v6862_v3, %v5877_v21 }
 0x207   :  { %4066 = vtanh.f32 %v1980_v39  ;;  %3065 = vst.msk [vmem:[%s6789_s5 + $0x18] sm:$0xff] %vm492_vm0, %v2563_v37  ;;  %v2555_v60 = vadd.f32 %v5877_v21, %v2554_v0  ;;  %v2358_v58 = vmul.f32 %v2230_v19, %v1334_v17  ;;  %v1482_v32 = vmul.f32 0.044715, %v6065_v62  ;;  %v6863_v52 = vld [vmem:[#allocation14_spill] sm:$0xff]  ;;  %v6865_v3 = vld [vmem:[#allocation17_spill] sm:$0xff] }
 0x208   :  { %v2359_v57 = vmul.f32 %v2231_v51, %v1335_v10  ;;  %v2603_v1 = vadd.f32 %v5877_v21, %v5820_v55  ;;  %v6108_v54 = vpop.f32.mrf.mxu1  ;;  %v1868_v22 = vadd.f32 %v1740_v16, %v5998_v47  ;;  %4068 = vtanh.f32 %v1981_v38  ;;  %3077 = vst.msk [vmem:[%s6789_s5 + $0x78] sm:$0xff] %vm492_vm0, %v2611_v50  ;;  %v6864_v38 = vld [vmem:[#allocation13_spill] sm:$0xff] }
 0x209   :  { %v4053_v43 = vpop.eup %4052  ;;  %3063 = vst.msk [vmem:[%s6789_s5 + $0x8] sm:$0xff] %vm492_vm0, %v2555_v60  ;;  %v1854_v17 = vadd.f32 %v5880_v24, %v5803_v23  ;;  %v1855_v55 = vadd.f32 %v5900_v31, %v5825_v46  ;;  %v1613_v8 = vmul.f32 %v1485_v45, %v6058_v7  ;;  %v2624_v0 = vadd.f32 %v6863_v52, %v5877_v21  ;;  %v6866_v60 = vld [vmem:[#allocation15_spill] sm:$0xff] }
 0x20a   :  { %v4055_v10 = vpop.eup %4054  ;;  %v2434_v28 = vpack.c.bf16 %v2359_v57, %v2358_v58  ;;  %v2232_v16 = vadd.f32 1.0, %v4053_v43  ;;  %3075 = vst.msk [vmem:[%s6789_s5 + $0x68] sm:$0xff] %vm492_vm0, %v2603_v1  ;;  %v6133_v24 = vadd.f32 %v4096_v26, %v5976_v11  ;;  %v6135_v37 = vpop.f32.mrf.mxu1  ;;  %v1856_v45 = vadd.f32 %v5863_v13, %v5788_v53  ;;  %v6868_v1 = vld [vmem:[#allocation7_spill] sm:$0xff] }
 0x20b   :  { %v6130_v63 = vpop.eup %4056  ;;  %v2233_v19 = vadd.f32 1.0, %v4055_v10  ;;  %v1982_v31 = vmul.f32 0.7978846, %v1854_v17  ;;  %v1983_v39 = vmul.f32 0.7978846, %v1855_v55  ;;  %3080 = vst.msk [vmem:[%s6789_s5 + $0x90] sm:$0xff] %vm492_vm0, %v2624_v0  ;;  %v1857_v50 = vadd.f32 %v6865_v3, %v6864_v38 }
 0x20c   :  { %3724 = vmatprep.mubr.bf16.mxu1 %v2434_v28  ;;  %v2360_v51 = vmul.f32 %v2232_v16, %v1336_v56  ;;  %v2616_v11 = vadd.f32 %v5877_v21, %v6866_v60  ;;  %v6147_v26 = vpop.eup %4058  ;;  %v6867_v56 = vld [vmem:[#allocation16_spill] sm:$0xff]  ;;  %v2619_v43 = vadd.f32 %v5877_v21, %v6868_v1  ;;  %v1741_v17 = vmul.f32 %v1613_v8, %v6058_v7 }
 0x20d   :  { %v2361_v58 = vmul.f32 %v2233_v19, %v1337_v34  ;;  %4070 = vtanh.f32 %v1982_v31  ;;  %v2627_v57 = vadd.f32 %v6867_v56, %v5877_v21  ;;  %v1984_v13 = vmul.f32 0.7978846, %v1856_v45  ;;  %v6869_v19 = vld [vmem:[#allocation9_spill] sm:$0xff] }
 0x20e   :  { %4072 = vtanh.f32 %v1983_v39  ;;  %v1985_v55 = vmul.f32 0.7978846, %v1857_v50  ;;  %3078 = vst.msk [vmem:[%s6789_s5 + $0x80] sm:$0xff] %vm492_vm0, %v2616_v11  ;;  %v6158_v10 = vpop.eup %4060  ;;  %v1610_v28 = vmul.f32 %v1482_v32, %v6065_v62  ;;  %3079 = vst.msk [vmem:[%s6789_s5 + $0x88] sm:$0xff] %vm492_vm0, %v2619_v43  ;;  %v1858_v16 = vadd.f32 %v5982_v44, %v5904_v20 }
 0x20f   :  { %v2435_v34 = vpack.c.bf16 %v2361_v58, %v2360_v51  ;;  %3081 = vst.msk [vmem:[%s6789_s5 + $0x98] sm:$0xff] %vm492_vm0, %v2627_v57  ;;  %v1859_v8 = vadd.f32 %v6027_v6, %v5922_v29  ;;  %v6173_v52 = vpop.f32.mrf.mxu1  ;;  %v1735_v32 = vmul.f32 %v6038_v42, %v5990_v40  ;;  %v1483_v0 = vmul.f32 0.044715, %v6133_v24 }
 0x210   :  { %4074 = vtanh.f32 %v1984_v13  ;;  %v2640_v31 = vadd.f32 %v6869_v19, %v5877_v21  ;;  %v1996_v39 = vmul.f32 0.7978846, %v1868_v22  ;;  %v1986_v51 = vmul.f32 0.7978846, %v1858_v16 }
 0x211   :  { %3725 = vmatmul.mubr.bf16.gmra.mxu1 %v2435_v34  ;;  %4076 = vtanh.f32 %v1985_v55  ;;  %v1987_v45 = vmul.f32 0.7978846, %v1859_v8  ;;  %v6180_v44 = vpop.f32.mrf.mxu1  ;;  %v4063_v3 = vpop.eup %4062  ;;  %v1869_v6 = vadd.f32 %v1741_v17, %v6058_v7  ;;  %v2632_v42 = vadd.f32 %v5877_v21, %v5941_v33 }
 0x212   :  { %3084 = vst.msk [vmem:[%s6789_s5 + $0xb0] sm:$0xff] %vm492_vm0, %v2640_v31  ;;  %v2643_v22 = vadd.f32 %v5966_v4, %v5877_v21  ;;  %v2635_v50 = vadd.f32 %v5877_v21, %v5985_v2  ;;  %v4065_v60 = vpop.eup %4064  ;;  %v1738_v11 = vmul.f32 %v1610_v28, %v6065_v62  ;;  %v1338_v58 = vmul.f32 0.5, %v5745_v27 }
 0x213   :  { %v2234_v56 = vadd.f32 1.0, %v4063_v3  ;;  %4078 = vtanh.f32 %v1986_v51  ;;  %v6195_v57 = vpop.f32.mrf.mxu1  ;;  %v1611_v43 = vmul.f32 %v1483_v0, %v6133_v24  ;;  %v1339_v33 = vmul.f32 0.5, %v5757_v5  ;;  %3082 = vst.msk [vmem:[%s6789_s5 + $0xa0] sm:$0xff] %vm492_vm0, %v2632_v42 }
 0x214   :  { %v4067_v1 = vpop.eup %4066  ;;  %v2235_v17 = vadd.f32 1.0, %v4065_v60  ;;  %4080 = vtanh.f32 %v1987_v45  ;;  %3085 = vst.msk [vmem:[%s6789_s5 + $0xb8] sm:$0xff] %vm492_vm0, %v2643_v22  ;;  %3083 = vst.msk [vmem:[%s6789_s5 + $0xa8] sm:$0xff] %vm492_vm0, %v2635_v50  ;;  %v1340_v27 = vmul.f32 0.5, %v6859_v25  ;;  %v1862_v4 = vadd.f32 %v6030_v9, %v5957_v48 }
 0x215   :  { %v2236_v5 = vadd.f32 1.0, %v4067_v1  ;;  %v1863_v2 = vadd.f32 %v1735_v32, %v5990_v40  ;;  %v6215_v13 = vpop.f32.mrf.mxu1  ;;  %v4069_v55 = vpop.eup %4068  ;;  %v1997_v34 = vmul.f32 0.7978846, %v1869_v6  ;;  %v2362_v28 = vmul.f32 %v2234_v56, %v1338_v58 }
 0x216   :  { %v2363_v16 = vmul.f32 %v2235_v17, %v1339_v33  ;;  %v2656_v8 = vadd.f32 %v6009_v18, %v5877_v21  ;;  %v1341_v0 = vmul.f32 0.5, %v5749_v49  ;;  %v2237_v19 = vadd.f32 1.0, %v4069_v55 }
 0x217   :  { %v1990_v31 = vmul.f32 0.7978846, %v1862_v4  ;;  %v1991_v25 = vmul.f32 0.7978846, %v1863_v2  ;;  %4082 = vtanh.f32 %v1996_v39  ;;  %v1739_v51 = vmul.f32 %v1611_v43, %v6133_v24 }
 0x218   :  { %v2436_v9 = vpack.c.bf16 %v2363_v16, %v2362_v28  ;;  %v2364_v45 = vmul.f32 %v2236_v5, %v1340_v27  ;;  %3088 = vst.msk [vmem:[%s6789_s5 + $0xd0] sm:$0xff] %vm492_vm0, %v2656_v8  ;;  %v2365_v32 = vmul.f32 %v2237_v19, %v1341_v0  ;;  %v2648_v18 = vadd.f32 %v5877_v21, %v6019_v36 }
 0x219   :  { %4084 = vtanh.f32 %v1990_v31  ;;  %v2659_v49 = vadd.f32 %v6032_v30, %v5877_v21  ;;  %v6229_v3 = vpop.f32.mrf.mxu1  ;;  %v2651_v6 = vadd.f32 %v5877_v21, %v6042_v15  ;;  %v1342_v50 = vmul.f32 0.5, %v5803_v23 }
 0x21a   :  { %v4071_v39 = vpop.eup %4070  ;;  %3728 = vmatprep.mubr.bf16.mxu1 %v2436_v9  ;;  %4086 = vtanh.f32 %v1991_v25  ;;  %v2437_v22 = vpack.c.bf16 %v2365_v32, %v2364_v45  ;;  %3086 = vst.msk [vmem:[%s6789_s5 + $0xc0] sm:$0xff] %vm492_vm0, %v2648_v18  ;;  %v1343_v30 = vmul.f32 0.5, %v5825_v46  ;;  %v1866_v23 = vadd.f32 %v1738_v11, %v6065_v62 }
 0x21b   :  { %v4073_v42 = vpop.eup %4072  ;;  %4088 = vtanh.f32 %v1997_v34  ;;  %v2238_v60 = vadd.f32 1.0, %v4071_v39  ;;  %3089 = vst.msk [vmem:[%s6789_s5 + $0xd8] sm:$0xff] %vm492_vm0, %v2659_v49  ;;  %v2695_v36 = vpop.f32.mrf.mxu1  ;;  %3087 = vst.msk [vmem:[%s6789_s5 + $0xc8] sm:$0xff] %vm492_vm0, %v2651_v6  ;;  %v1867_v58 = vadd.f32 %v1739_v51, %v6133_v24  ;;  %v1344_v43 = vmul.f32 0.5, %v5788_v53 }
 0x21c   :  { %v2239_v15 = vadd.f32 1.0, %v4073_v42  ;;  %3729 = vmatmul.mubr.bf16.gmra.mxu1 %v2437_v22  ;;  %v1345_v33 = vmul.f32 0.5, %v6864_v38  ;;  %v2672_v46 = vadd.f32 %v6083_v59, %v5877_v21  ;;  %v1994_v2 = vmul.f32 0.7978846, %v1866_v23 }
 0x21d   :  { %v4075_v56 = vpop.eup %4074  ;;  %v2366_v1 = vmul.f32 %v2238_v60, %v1342_v50  ;;  %v3659_v17 = vpop.f32.mrf.mxu1  ;;  %v1995_v55 = vmul.f32 0.7978846, %v1867_v58  ;;  %v1346_v11 = vmul.f32 0.5, %v5904_v20  ;;  %v1347_v28 = vmul.f32 0.5, %v5922_v29 }
 0x21e   :  { %v4077_v27 = vpop.eup %4076  ;;  %v2367_v5 = vmul.f32 %v2239_v15, %v1343_v30  ;;  %v2240_v4 = vadd.f32 1.0, %v4075_v56  ;;  %3092 = vst.msk [vmem:[%s6789_s5 + $0xf0] sm:$0xff] %vm492_vm0, %v2672_v46  ;;  %v2664_v53 = vadd.f32 %v5877_v21, %v6095_v41  ;;  %v1349_v8 = vmul.f32 0.5, %v5860_v12 }
 0x21f   :  { %v2241_v34 = vadd.f32 1.0, %v4077_v27  ;;  %v2698_v59 = vpop.f32.mrf.mxu1  ;;  %4090 = vtanh.f32 %v1994_v2  ;;  %v2675_v0 = vadd.f32 %v6108_v54, %v5877_v21  ;;  %v2244_v25 = vadd.f32 1.0, %v6062_v61 }
 0x220   :  { %v4079_v38 = vpop.eup %4078  ;;  %v2438_v16 = vpack.c.bf16 %v2367_v5, %v2366_v1  ;;  %v2368_v19 = vmul.f32 %v2240_v4, %v1344_v43  ;;  %4092 = vtanh.f32 %v1995_v55  ;;  %3090 = vst.msk [vmem:[%s6789_s5 + $0xe0] sm:$0xff] %vm492_vm0, %v2664_v53  ;;  %v2667_v12 = vadd.f32 %v5877_v21, %v6135_v37 }
 0x221   :  { %v4081_v20 = vpop.eup %4080  ;;  %v2369_v29 = vmul.f32 %v2241_v34, %v1345_v33  ;;  %v2242_v31 = vadd.f32 1.0, %v4079_v38  ;;  %3093 = vst.msk [vmem:[%s6789_s5 + $0xf8] sm:$0xff] %vm492_vm0, %v2675_v0  ;;  %v2688_v54 = vadd.f32 %v6173_v52, %v5877_v21  ;;  %v2245_v9 = vadd.f32 1.0, %v6130_v63  ;;  %v6870_v34 = vld [vmem:[#allocation18_spill] sm:$0xff] }
 0x222   :  { %3732 = vmatprep.mubr.bf16.mxu1 %v2438_v16  ;;  %v2243_v41 = vadd.f32 1.0, %v4081_v20  ;;  %v2680_v45 = vadd.f32 %v5877_v21, %v6180_v44  ;;  %v2691_v61 = vadd.f32 %v6195_v57, %v5877_v21  ;;  %3091 = vst.msk [vmem:[%s6789_s5 + $0xe8] sm:$0xff] %vm492_vm0, %v2667_v12  ;;  %v2683_v63 = vadd.f32 %v5877_v21, %v6215_v13 }
 0x223   :  { %v2439_v51 = vpack.c.bf16 %v2369_v29, %v2368_v19  ;;  %v3662_v32 = vpop.f32.mrf.mxu1  ;;  %v2370_v18 = vmul.f32 %v2242_v31, %v1346_v11  ;;  %3096 = vst.msk [vmem:[%s6789_s5 + $0x110] sm:$0xff] %vm492_vm0, %v2688_v54  ;;  %v2704_v37 = vadd.f32 %v6229_v3, %v5877_v21  ;;  %v2696_v44 = vadd.f32 %v5877_v21, %v2695_v36 }
 0x224   :  { %v2371_v49 = vmul.f32 %v2243_v41, %v1347_v28  ;;  %v6294_v52 = vpop.eup %4082  ;;  %3094 = vst.msk [vmem:[%s6789_s5 + $0x100] sm:$0xff] %vm492_vm0, %v2680_v45  ;;  %3097 = vst.msk [vmem:[%s6789_s5 + $0x118] sm:$0xff] %vm492_vm0, %v2691_v61  ;;  %v2707_v57 = vadd.f32 %v3659_v17, %v5877_v21  ;;  %v2699_v13 = vadd.f32 %v5877_v21, %v2698_v59  ;;  %v1348_v60 = vmul.f32 0.5, %v5829_v14 }
 0x225   :  { %3733 = vmatmul.mubr.bf16.gmra.mxu1 %v2439_v51  ;;  %v2720_v3 = vadd.f32 %v3662_v32, %v5877_v21  ;;  %v2711_v39 = vpop.f32.mrf.mxu1  ;;  %3095 = vst.msk [vmem:[%s6789_s5 + $0x108] sm:$0xff] %vm492_vm0, %v2683_v63  ;;  %3100 = vst.msk [vmem:[%s6789_s5 + $0x130] sm:$0xff] %vm492_vm0, %v2704_v37  ;;  %v2373_v36 = vmul.f32 %v2245_v9, %v1349_v8  ;;  %v1350_v23 = vmul.f32 0.5, %v5957_v48  ;;  %v1351_v58 = vmul.f32 0.5, %v5990_v40 }
 0x226   :  { %v4085_v6 = vpop.eup %4084  ;;  %v2440_v42 = vpack.c.bf16 %v2371_v49, %v2370_v18  ;;  %v2712_v22 = vadd.f32 %v5877_v21, %v2711_v39  ;;  %3098 = vst.msk [vmem:[%s6789_s5 + $0x120] sm:$0xff] %vm492_vm0, %v2696_v44  ;;  %3101 = vst.msk [vmem:[%s6789_s5 + $0x138] sm:$0xff] %vm492_vm0, %v2707_v57  ;;  %v2372_v43 = vmul.f32 %v2244_v25, %v1348_v60  ;;  %v2249_v27 = vadd.f32 1.0, %v6158_v10 }
 0x227   :  { %v4087_v50 = vpop.eup %4086  ;;  %v2246_v30 = vadd.f32 1.0, %v4085_v6  ;;  %3099 = vst.msk [vmem:[%s6789_s5 + $0x128] sm:$0xff] %vm492_vm0, %v2699_v13  ;;  %3104 = vst.msk [vmem:[%s6789_s5 + $0x150] sm:$0xff] %vm492_vm0, %v2720_v3  ;;  %v3663_v14 = vpop.f32.mrf.mxu1  ;;  %v1353_v4 = vmul.f32 0.5, %v5935_v35  ;;  %v2248_v10 = vadd.f32 1.0, %v6147_v26  ;;  %v1352_v11 = vmul.f32 0.5, %v6870_v34 }
 0x228   :  { %v4089_v15 = vpop.eup %4088  ;;  %3736 = vmatprep.mubr.bf16.mxu1 %v2440_v42  ;;  %v2247_v56 = vadd.f32 1.0, %v4087_v50  ;;  %3102 = vst.msk [vmem:[%s6789_s5 + $0x140] sm:$0xff] %vm492_vm0, %v2712_v22  ;;  %v2723_v1 = vadd.f32 %v3663_v14, %v5877_v21  ;;  %v2441_v40 = vpack.c.bf16 %v2373_v36, %v2372_v43  ;;  %v1354_v38 = vmul.f32 0.5, %v6065_v62 }
 0x229   :  { %v2714_v33 = vpop.f32.mrf.mxu1  ;;  %v2374_v46 = vmul.f32 %v2246_v30, %v1350_v23  ;;  %v2377_v28 = vmul.f32 %v2249_v27, %v1353_v4  ;;  %v1355_v35 = vmul.f32 0.5, %v6133_v24  ;;  %v2376_v20 = vmul.f32 %v2248_v10, %v1352_v11 }
 0x22a   :  { %v2375_v17 = vmul.f32 %v2247_v56, %v1351_v58  ;;  %3105 = vst.msk [vmem:[%s6789_s5 + $0x158] sm:$0xff] %vm492_vm0, %v2723_v1  ;;  %v2715_v48 = vadd.f32 %v5877_v21, %v2714_v33  ;;  %v2253_v62 = vadd.f32 1.0, %v4089_v15  ;;  %v1357_v54 = vmul.f32 0.5, %v6058_v7 }
 0x22b   :  { %v2443_v41 = vpack.c.bf16 %v2377_v28, %v2376_v20  ;;  %v2252_v51 = vadd.f32 1.0, %v6294_v52  ;;  %v1356_v45 = vmul.f32 0.5, %v5998_v47 }
 0x22c   :  { %v2442_v5 = vpack.c.bf16 %v2375_v17, %v2374_v46  ;;  %3103 = vst.msk [vmem:[%s6789_s5 + $0x148] sm:$0xff] %vm492_vm0, %v2715_v48  ;;  %v4091_v2 = vpop.eup %4090  ;;  %v2381_v61 = vmul.f32 %v2253_v62, %v1357_v54 }
 0x22d   :  { %3737 = vmatmul.mubr.bf16.gmra.mxu1 %v2441_v40  ;;  %v4093_v55 = vpop.eup %4092  ;;  %v2250_v53 = vadd.f32 1.0, %v4091_v2  ;;  %v2380_v32 = vmul.f32 %v2252_v51, %v1356_v45 }
 0x22e   :  { %3740 = vmatprep.mubr.bf16.mxu1 %v2442_v5  ;;  %v3666_v59 = vpop.f32.mrf.mxu1  ;;  %v2251_v16 = vadd.f32 1.0, %v4093_v55 }
 0x22f   :  { %v2736_v8 = vadd.f32 %v3666_v59, %v5877_v21  ;;  %v2378_v19 = vmul.f32 %v2250_v53, %v1354_v38  ;;  %v2445_v49 = vpack.c.bf16 %v2381_v61, %v2380_v32 }
 0x230   :  { %v2727_v0 = vpop.f32.mrf.mxu1  ;;  %v2379_v29 = vmul.f32 %v2251_v16, %v1355_v35 }
 0x231   :  { %3108 = vst.msk [vmem:[%s6789_s5 + $0x170] sm:$0xff] %vm492_vm0, %v2736_v8  ;;  %v2728_v26 = vadd.f32 %v5877_v21, %v2727_v0 }
 0x232   :  { %v3667_v31 = vpop.f32.mrf.mxu1  ;;  %v2444_v25 = vpack.c.bf16 %v2379_v29, %v2378_v19 }
 0x233   :  { %3106 = vst.msk [vmem:[%s6789_s5 + $0x160] sm:$0xff] %vm492_vm0, %v2728_v26  ;;  %v2739_v24 = vadd.f32 %v3667_v31, %v5877_v21 }
 0x234   :  { %v2730_v12 = vpop.f32.mrf.mxu1 }
 0x235   :  { %3741 = vmatmul.mubr.bf16.gmra.mxu1 %v2443_v41  ;;  %3109 = vst.msk [vmem:[%s6789_s5 + $0x178] sm:$0xff] %vm492_vm0, %v2739_v24  ;;  %v2731_v9 = vadd.f32 %v5877_v21, %v2730_v12  ;;  %v6517_v12 = vld [vmem:[%s6788_s4] ss:$0 sm:$0xff] }
 0x236   :  { %3744 = vmatprep.mubr.bf16.mxu1 %v2444_v25 }
 0x237   :  { %3107 = vst.msk [vmem:[%s6789_s5 + $0x168] sm:$0xff] %vm492_vm0, %v2731_v9 }
 0x239   :  { %v3670_v7 = vpop.f32.mrf.mxu1 }
 0x23a   :  { %v2752_v18 = vadd.f32 %v3670_v7, %v5877_v21 }
 0x23b   :  { %v2743_v63 = vpop.f32.mrf.mxu1 }
 0x23c   :  { %3112 = vst.msk [vmem:[%s6789_s5 + $0x190] sm:$0xff] %vm492_vm0, %v2752_v18  ;;  %v2744_v37 = vadd.f32 %v5877_v21, %v2743_v63 }
 0x23d   :  { %3745 = vmatmul.mubr.bf16.gmra.mxu1 %v2445_v49  ;;  %v3671_v47 = vpop.f32.mrf.mxu1 }
 0x23e   :  { %3110 = vst.msk [vmem:[%s6789_s5 + $0x180] sm:$0xff] %vm492_vm0, %v2744_v37  ;;  %v2755_v52 = vadd.f32 %v3671_v47, %v5877_v21 }
 0x23f   :  { %v2746_v44 = vpop.f32.mrf.mxu1 }
 0x240   :  { %3113 = vst.msk [vmem:[%s6789_s5 + $0x198] sm:$0xff] %vm492_vm0, %v2755_v52  ;;  %v2747_v57 = vadd.f32 %v5877_v21, %v2746_v44 }
 0x242   :  { %3111 = vst.msk [vmem:[%s6789_s5 + $0x188] sm:$0xff] %vm492_vm0, %v2747_v57 }
 0x243   :  { %v3674_v13 = vpop.f32.mrf.mxu1 }
 0x244   :  { %v2768_v3 = vadd.f32 %v3674_v13, %v5877_v21 }
 0x245   :  { %v2759_v39 = vpop.f32.mrf.mxu1 }
 0x246   :  { %3116 = vst.msk [vmem:[%s6789_s5 + $0x1b0] sm:$0xff] %vm492_vm0, %v2768_v3  ;;  %v2760_v6 = vadd.f32 %v5877_v21, %v2759_v39 }
 0x247   :  { %v3675_v42 = vpop.f32.mrf.mxu1 }
 0x248   :  { %3114 = vst.msk [vmem:[%s6789_s5 + $0x1a0] sm:$0xff] %vm492_vm0, %v2760_v6  ;;  %v2771_v22 = vadd.f32 %v3675_v42, %v5877_v21 }
 0x249   :  { %v2762_v50 = vpop.f32.mrf.mxu1 }
 0x24a   :  { %3117 = vst.msk [vmem:[%s6789_s5 + $0x1b8] sm:$0xff] %vm492_vm0, %v2771_v22  ;;  %v2763_v60 = vadd.f32 %v5877_v21, %v2762_v50 }
 0x24c   :  { %3115 = vst.msk [vmem:[%s6789_s5 + $0x1a8] sm:$0xff] %vm492_vm0, %v2763_v60 }
 0x24e   :  { %v3678_v36 = vpop.f32.mrf.mxu1 }
 0x24f   :  { %v2784_v30 = vadd.f32 %v3678_v36, %v5877_v21 }
 0x250   :  { %v2775_v14 = vpop.f32.mrf.mxu1 }
 0x251   :  { %3120 = vst.msk [vmem:[%s6789_s5 + $0x1d0] sm:$0xff] %vm492_vm0, %v2784_v30  ;;  %v2776_v15 = vadd.f32 %v5877_v21, %v2775_v14 }
 0x252   :  { %v3679_v23 = vpop.f32.mrf.mxu1 }
 0x253   :  { %3118 = vst.msk [vmem:[%s6789_s5 + $0x1c0] sm:$0xff] %vm492_vm0, %v2776_v15  ;;  %v2787_v58 = vadd.f32 %v3679_v23, %v5877_v21 }
 0x254   :  { %v2778_v56 = vpop.f32.mrf.mxu1 }
 0x255   :  { %3121 = vst.msk [vmem:[%s6789_s5 + $0x1d8] sm:$0xff] %vm492_vm0, %v2787_v58  ;;  %v2779_v1 = vadd.f32 %v5877_v21, %v2778_v56 }
 0x257   :  { %3119 = vst.msk [vmem:[%s6789_s5 + $0x1c8] sm:$0xff] %vm492_vm0, %v2779_v1 }
 0x258   :  { %v3682_v43 = vpop.f32.mrf.mxu1 }
 0x259   :  { %v2800_v33 = vadd.f32 %v3682_v43, %v5877_v21 }
 0x25a   :  { %v2791_v46 = vpop.f32.mrf.mxu1 }
 0x25b   :  { %3124 = vst.msk [vmem:[%s6789_s5 + $0x1f0] sm:$0xff] %vm492_vm0, %v2800_v33  ;;  %v2792_v17 = vadd.f32 %v5877_v21, %v2791_v46 }
 0x25c   :  { %v3683_v27 = vpop.f32.mrf.mxu1 }
 0x25d   :  { %3122 = vst.msk [vmem:[%s6789_s5 + $0x1e0] sm:$0xff] %vm492_vm0, %v2792_v17  ;;  %v2803_v48 = vadd.f32 %v3683_v27, %v5877_v21 }
 0x25e   :  { %v2794_v40 = vpop.f32.mrf.mxu1 }
 0x25f   :  { %3125 = vst.msk [vmem:[%s6789_s5 + $0x1f8] sm:$0xff] %vm492_vm0, %v2803_v48  ;;  %v2795_v5 = vadd.f32 %v5877_v21, %v2794_v40 }
 0x261   :  { %3123 = vst.msk [vmem:[%s6789_s5 + $0x1e8] sm:$0xff] %vm492_vm0, %v2795_v5 }
 0x263   :  { %v3686_v4 = vpop.f32.mrf.mxu1 }
 0x264   :  { %v2816_v2 = vadd.f32 %v3686_v4, %v5877_v21 }
 0x265   :  { %v2807_v10 = vpop.f32.mrf.mxu1 }
 0x266   :  { %3128 = vst.msk [vmem:[%s6789_s5 + $0x210] sm:$0xff] %vm492_vm0, %v2816_v2  ;;  %v2808_v55 = vadd.f32 %v5877_v21, %v2807_v10 }
 0x267   :  { %v3687_v34 = vpop.f32.mrf.mxu1 }
 0x268   :  { %3126 = vst.msk [vmem:[%s6789_s5 + $0x200] sm:$0xff] %vm492_vm0, %v2808_v55  ;;  %v2819_v11 = vadd.f32 %v3687_v34, %v5877_v21 }
 0x269   :  { %v2810_v28 = vpop.f32.mrf.mxu1 }
 0x26a   :  { %3129 = vst.msk [vmem:[%s6789_s5 + $0x218] sm:$0xff] %vm492_vm0, %v2819_v11  ;;  %v2811_v53 = vadd.f32 %v5877_v21, %v2810_v28 }
 0x26c   :  { %3127 = vst.msk [vmem:[%s6789_s5 + $0x208] sm:$0xff] %vm492_vm0, %v2811_v53 }
 0x26d   :  { %v3690_v59 = vpop.f32.mrf.mxu1 }
 0x26e   :  { %v2832_v38 = vadd.f32 %v3690_v59, %v5877_v21 }
 0x26f   :  { %v2823_v35 = vpop.f32.mrf.mxu1 }
 0x270   :  { %3132 = vst.msk [vmem:[%s6789_s5 + $0x230] sm:$0xff] %vm492_vm0, %v2832_v38  ;;  %v2824_v16 = vadd.f32 %v5877_v21, %v2823_v35 }
 0x271   :  { %v3691_v8 = vpop.f32.mrf.mxu1 }
 0x272   :  { %3130 = vst.msk [vmem:[%s6789_s5 + $0x220] sm:$0xff] %vm492_vm0, %v2824_v16  ;;  %v2835_v0 = vadd.f32 %v3691_v8, %v5877_v21 }
 0x273   :  { %v2826_v20 = vpop.f32.mrf.mxu1 }
 0x274   :  { %3133 = vst.msk [vmem:[%s6789_s5 + $0x238] sm:$0xff] %vm492_vm0, %v2835_v0  ;;  %v2827_v19 = vadd.f32 %v5877_v21, %v2826_v20 }
 0x276   :  { %3131 = vst.msk [vmem:[%s6789_s5 + $0x228] sm:$0xff] %vm492_vm0, %v2827_v19 }
 0x278   :  { %v3694_v29 = vpop.f32.mrf.mxu1 }
 0x279   :  { %v2848_v26 = vadd.f32 %v3694_v29, %v5877_v21 }
 0x27a   :  { %v2839_v31 = vpop.f32.mrf.mxu1 }
 0x27b   :  { %3136 = vst.msk [vmem:[%s6789_s5 + $0x250] sm:$0xff] %vm492_vm0, %v2848_v26  ;;  %v2840_v41 = vadd.f32 %v5877_v21, %v2839_v31 }
 0x27c   :  { %v3695_v25 = vpop.f32.mrf.mxu1 }
 0x27d   :  { %3134 = vst.msk [vmem:[%s6789_s5 + $0x240] sm:$0xff] %vm492_vm0, %v2840_v41  ;;  %v2851_v62 = vadd.f32 %v3695_v25, %v5877_v21 }
 0x27e   :  { %v2842_v24 = vpop.f32.mrf.mxu1 }
 0x27f   :  { %3137 = vst.msk [vmem:[%s6789_s5 + $0x258] sm:$0xff] %vm492_vm0, %v2851_v62  ;;  %v2843_v54 = vadd.f32 %v6517_v12, %v2842_v24 }
 0x281   :  { %3135 = vst.msk [vmem:[%s6789_s5 + $0x248] sm:$0xff] %vm492_vm0, %v2843_v54 }
 0x282   :  { %v3698_v51 = vpop.f32.mrf.mxu1 }
 0x283   :  { %v2864_v21 = vadd.f32 %v6517_v12, %v3698_v51 }
 0x284   :  { %v2855_v9 = vpop.f32.mrf.mxu1 }
 0x285   :  { %3140 = vst.msk [vmem:[%s6789_s5 + $0x270] sm:$0xff] %vm492_vm0, %v2864_v21  ;;  %v2856_v45 = vadd.f32 %v6517_v12, %v2855_v9 }
 0x286   :  { %v3699_v61 = vpop.f32.mrf.mxu1 }
 0x287   :  { %3138 = vst.msk [vmem:[%s6789_s5 + $0x260] sm:$0xff] %vm492_vm0, %v2856_v45  ;;  %v2867_v32 = vadd.f32 %v6517_v12, %v3699_v61 }
 0x288   :  { %v2858_v7 = vpop.f32.mrf.mxu1 }
 0x289   :  { %3141 = vst.msk [vmem:[%s6789_s5 + $0x278] sm:$0xff] %vm492_vm0, %v2867_v32  ;;  %v2859_v18 = vadd.f32 %v6517_v12, %v2858_v7 }
 0x28b   :  { %3139 = vst.msk [vmem:[%s6789_s5 + $0x268] sm:$0xff] %vm492_vm0, %v2859_v18 }
 0x28d   :  { %v3702_v49 = vpop.f32.mrf.mxu1 }
 0x28e   :  { %v2880_v63 = vadd.f32 %v6517_v12, %v3702_v49 }
 0x28f   :  { %v2871_v37 = vpop.f32.mrf.mxu1 }
 0x290   :  { %3144 = vst.msk [vmem:[%s6789_s5 + $0x290] sm:$0xff] %vm492_vm0, %v2880_v63  ;;  %v2872_v47 = vadd.f32 %v6517_v12, %v2871_v37 }
 0x291   :  { %v3703_v52 = vpop.f32.mrf.mxu1 }
 0x292   :  { %3142 = vst.msk [vmem:[%s6789_s5 + $0x280] sm:$0xff] %vm492_vm0, %v2872_v47  ;;  %v2883_v44 = vadd.f32 %v6517_v12, %v3703_v52 }
 0x293   :  { %v2874_v57 = vpop.f32.mrf.mxu1 }
 0x294   :  { %3145 = vst.msk [vmem:[%s6789_s5 + $0x298] sm:$0xff] %vm492_vm0, %v2883_v44  ;;  %v2875_v13 = vadd.f32 %v6517_v12, %v2874_v57 }
 0x296   :  { %3143 = vst.msk [vmem:[%s6789_s5 + $0x288] sm:$0xff] %vm492_vm0, %v2875_v13 }
 0x297   :  { %v3706_v3 = vpop.f32.mrf.mxu1 }
 0x298   :  { %v2896_v39 = vadd.f32 %v6517_v12, %v3706_v3 }
 0x299   :  { %v2887_v6 = vpop.f32.mrf.mxu1 }
 0x29a   :  { %3148 = vst.msk [vmem:[%s6789_s5 + $0x2b0] sm:$0xff] %vm492_vm0, %v2896_v39  ;;  %v2888_v42 = vadd.f32 %v6517_v12, %v2887_v6 }
 0x29b   :  { %v3707_v22 = vpop.f32.mrf.mxu1 }
 0x29c   :  { %3146 = vst.msk [vmem:[%s6789_s5 + $0x2a0] sm:$0xff] %vm492_vm0, %v2888_v42  ;;  %v2899_v50 = vadd.f32 %v6517_v12, %v3707_v22 }
 0x29d   :  { %v2890_v60 = vpop.f32.mrf.mxu1 }
 0x29e   :  { %3149 = vst.msk [vmem:[%s6789_s5 + $0x2b8] sm:$0xff] %vm492_vm0, %v2899_v50  ;;  %v2891_v36 = vadd.f32 %v6517_v12, %v2890_v60 }
 0x2a0   :  { %3147 = vst.msk [vmem:[%s6789_s5 + $0x2a8] sm:$0xff] %vm492_vm0, %v2891_v36 }
 0x2a2   :  { %v3710_v30 = vpop.f32.mrf.mxu1 }
 0x2a3   :  { %v2912_v14 = vadd.f32 %v6517_v12, %v3710_v30 }
 0x2a4   :  { %v2903_v15 = vpop.f32.mrf.mxu1 }
 0x2a5   :  { %3152 = vst.msk [vmem:[%s6789_s5 + $0x2d0] sm:$0xff] %vm492_vm0, %v2912_v14  ;;  %v2904_v23 = vadd.f32 %v6517_v12, %v2903_v15 }
 0x2a6   :  { %v3711_v58 = vpop.f32.mrf.mxu1 }
 0x2a7   :  { %3150 = vst.msk [vmem:[%s6789_s5 + $0x2c0] sm:$0xff] %vm492_vm0, %v2904_v23  ;;  %v2915_v56 = vadd.f32 %v6517_v12, %v3711_v58 }
 0x2a8   :  { %v2906_v1 = vpop.f32.mrf.mxu1 }
 0x2a9   :  { %3153 = vst.msk [vmem:[%s6789_s5 + $0x2d8] sm:$0xff] %vm492_vm0, %v2915_v56  ;;  %v2907_v43 = vadd.f32 %v6517_v12, %v2906_v1 }
 0x2ab   :  { %3151 = vst.msk [vmem:[%s6789_s5 + $0x2c8] sm:$0xff] %vm492_vm0, %v2907_v43 }
 0x2ac   :  { %v3714_v33 = vpop.f32.mrf.mxu1 }
 0x2ad   :  { %v2928_v46 = vadd.f32 %v6517_v12, %v3714_v33 }
 0x2ae   :  { %v2919_v17 = vpop.f32.mrf.mxu1 }
 0x2af   :  { %3156 = vst.msk [vmem:[%s6789_s5 + $0x2f0] sm:$0xff] %vm492_vm0, %v2928_v46  ;;  %v2920_v27 = vadd.f32 %v6517_v12, %v2919_v17 }
 0x2b0   :  { %v3715_v48 = vpop.f32.mrf.mxu1 }
 0x2b1   :  { %3154 = vst.msk [vmem:[%s6789_s5 + $0x2e0] sm:$0xff] %vm492_vm0, %v2920_v27  ;;  %v2931_v40 = vadd.f32 %v6517_v12, %v3715_v48 }
 0x2b2   :  { %v2922_v5 = vpop.f32.mrf.mxu1 }
 0x2b3   :  { %3157 = vst.msk [vmem:[%s6789_s5 + $0x2f8] sm:$0xff] %vm492_vm0, %v2931_v40  ;;  %v2923_v4 = vadd.f32 %v6517_v12, %v2922_v5 }
 0x2b5   :  { %3155 = vst.msk [vmem:[%s6789_s5 + $0x2e8] sm:$0xff] %vm492_vm0, %v2923_v4 }
 0x2b7   :  { %v3718_v2 = vpop.f32.mrf.mxu1 }
 0x2b8   :  { %v2944_v10 = vadd.f32 %v6517_v12, %v3718_v2 }
 0x2b9   :  { %v2935_v55 = vpop.f32.mrf.mxu1 }
 0x2ba   :  { %3160 = vst.msk [vmem:[%s6789_s5 + $0x310] sm:$0xff] %vm492_vm0, %v2944_v10  ;;  %v2936_v34 = vadd.f32 %v6517_v12, %v2935_v55 }
 0x2bb   :  { %v3719_v11 = vpop.f32.mrf.mxu1 }
 0x2bc   :  { %3158 = vst.msk [vmem:[%s6789_s5 + $0x300] sm:$0xff] %vm492_vm0, %v2936_v34  ;;  %v2947_v28 = vadd.f32 %v6517_v12, %v3719_v11 }
 0x2bd   :  { %v2938_v53 = vpop.f32.mrf.mxu1 }
 0x2be   :  { %3161 = vst.msk [vmem:[%s6789_s5 + $0x318] sm:$0xff] %vm492_vm0, %v2947_v28  ;;  %v2939_v59 = vadd.f32 %v6517_v12, %v2938_v53 }
 0x2c0   :  { %3159 = vst.msk [vmem:[%s6789_s5 + $0x308] sm:$0xff] %vm492_vm0, %v2939_v59 }
 0x2c3   :  { %v3722_v38 = vpop.f32.mrf.mxu1 }
 0x2c4   :  { %v2960_v35 = vadd.f32 %v6517_v12, %v3722_v38 }
 0x2c5   :  { %v2951_v16 = vpop.f32.mrf.mxu1 }
 0x2c6   :  { %3164 = vst.msk [vmem:[%s6789_s5 + $0x330] sm:$0xff] %vm492_vm0, %v2960_v35  ;;  %v2952_v8 = vadd.f32 %v6517_v12, %v2951_v16 }
 0x2c7   :  { %v3723_v0 = vpop.f32.mrf.mxu1 }
 0x2c8   :  { %3162 = vst.msk [vmem:[%s6789_s5 + $0x320] sm:$0xff] %vm492_vm0, %v2952_v8  ;;  %v2963_v20 = vadd.f32 %v6517_v12, %v3723_v0 }
 0x2c9   :  { %v2954_v19 = vpop.f32.mrf.mxu1 }
 0x2ca   :  { %3165 = vst.msk [vmem:[%s6789_s5 + $0x338] sm:$0xff] %vm492_vm0, %v2963_v20  ;;  %v2955_v29 = vadd.f32 %v6517_v12, %v2954_v19 }
 0x2cc   :  { %3163 = vst.msk [vmem:[%s6789_s5 + $0x328] sm:$0xff] %vm492_vm0, %v2955_v29 }
 0x2d1   :  { %v3726_v26 = vpop.f32.mrf.mxu1 }
 0x2d2   :  { %v2976_v31 = vadd.f32 %v6517_v12, %v3726_v26 }
 0x2d3   :  { %v2967_v41 = vpop.f32.mrf.mxu1 }
 0x2d4   :  { %3168 = vst.msk [vmem:[%s6789_s5 + $0x350] sm:$0xff] %vm492_vm0, %v2976_v31  ;;  %v2968_v25 = vadd.f32 %v6517_v12, %v2967_v41 }
 0x2d5   :  { %v3727_v62 = vpop.f32.mrf.mxu1 }
 0x2d6   :  { %3166 = vst.msk [vmem:[%s6789_s5 + $0x340] sm:$0xff] %vm492_vm0, %v2968_v25  ;;  %v2979_v24 = vadd.f32 %v6517_v12, %v3727_v62 }
 0x2d7   :  { %v2970_v54 = vpop.f32.mrf.mxu1 }
 0x2d8   :  { %3169 = vst.msk [vmem:[%s6789_s5 + $0x358] sm:$0xff] %vm492_vm0, %v2979_v24  ;;  %v2971_v51 = vadd.f32 %v6517_v12, %v2970_v54 }
 0x2da   :  { %3167 = vst.msk [vmem:[%s6789_s5 + $0x348] sm:$0xff] %vm492_vm0, %v2971_v51 }
 0x2dc   :  { %v3730_v21 = vpop.f32.mrf.mxu1 }
 0x2dd   :  { %v2992_v9 = vadd.f32 %v6517_v12, %v3730_v21 }
 0x2de   :  { %v2983_v45 = vpop.f32.mrf.mxu1 }
 0x2df   :  { %3172 = vst.msk [vmem:[%s6789_s5 + $0x370] sm:$0xff] %vm492_vm0, %v2992_v9  ;;  %v2984_v61 = vadd.f32 %v6517_v12, %v2983_v45 }
 0x2e0   :  { %v3731_v32 = vpop.f32.mrf.mxu1 }
 0x2e1   :  { %3170 = vst.msk [vmem:[%s6789_s5 + $0x360] sm:$0xff] %vm492_vm0, %v2984_v61  ;;  %v2995_v7 = vadd.f32 %v6517_v12, %v3731_v32 }
 0x2e2   :  { %v2986_v18 = vpop.f32.mrf.mxu1 }
 0x2e3   :  { %3173 = vst.msk [vmem:[%s6789_s5 + $0x378] sm:$0xff] %vm492_vm0, %v2995_v7  ;;  %v2987_v49 = vadd.f32 %v6517_v12, %v2986_v18 }
 0x2e5   :  { %v3734_v63 = vpop.f32.mrf.mxu1  ;;  %3171 = vst.msk [vmem:[%s6789_s5 + $0x368] sm:$0xff] %vm492_vm0, %v2987_v49 }
 0x2e6   :  { %v3008_v37 = vadd.f32 %v6517_v12, %v3734_v63 }
 0x2e7   :  { %v2999_v47 = vpop.f32.mrf.mxu1 }
 0x2e8   :  { %3176 = vst.msk [vmem:[%s6789_s5 + $0x390] sm:$0xff] %vm492_vm0, %v3008_v37  ;;  %v3000_v52 = vadd.f32 %v6517_v12, %v2999_v47 }
 0x2e9   :  { %v3735_v44 = vpop.f32.mrf.mxu1 }
 0x2ea   :  { %3174 = vst.msk [vmem:[%s6789_s5 + $0x380] sm:$0xff] %vm492_vm0, %v3000_v52  ;;  %v3011_v57 = vadd.f32 %v6517_v12, %v3735_v44 }
 0x2eb   :  { %v3002_v13 = vpop.f32.mrf.mxu1 }
 0x2ec   :  { %3177 = vst.msk [vmem:[%s6789_s5 + $0x398] sm:$0xff] %vm492_vm0, %v3011_v57  ;;  %v3003_v3 = vadd.f32 %v6517_v12, %v3002_v13 }
 0x2ed   :  { %v3738_v39 = vpop.f32.mrf.mxu1 }
 0x2ee   :  { %3175 = vst.msk [vmem:[%s6789_s5 + $0x388] sm:$0xff] %vm492_vm0, %v3003_v3  ;;  %v3024_v6 = vadd.f32 %v6517_v12, %v3738_v39 }
 0x2ef   :  { %v3015_v42 = vpop.f32.mrf.mxu1 }
 0x2f0   :  { %3180 = vst.msk [vmem:[%s6789_s5 + $0x3b0] sm:$0xff] %vm492_vm0, %v3024_v6  ;;  %v3016_v22 = vadd.f32 %v6517_v12, %v3015_v42 }
 0x2f1   :  { %v3739_v50 = vpop.f32.mrf.mxu1 }
 0x2f2   :  { %3178 = vst.msk [vmem:[%s6789_s5 + $0x3a0] sm:$0xff] %vm492_vm0, %v3016_v22  ;;  %v3027_v60 = vadd.f32 %v6517_v12, %v3739_v50 }
 0x2f3   :  { %v3018_v36 = vpop.f32.mrf.mxu1 }
 0x2f4   :  { %3181 = vst.msk [vmem:[%s6789_s5 + $0x3b8] sm:$0xff] %vm492_vm0, %v3027_v60  ;;  %v3019_v30 = vadd.f32 %v6517_v12, %v3018_v36 }
 0x2f5   :  { %v3742_v14 = vpop.f32.mrf.mxu1 }
 0x2f6   :  { %3179 = vst.msk [vmem:[%s6789_s5 + $0x3a8] sm:$0xff] %vm492_vm0, %v3019_v30  ;;  %v3040_v15 = vadd.f32 %v6517_v12, %v3742_v14 }
 0x2f7   :  { %v3031_v23 = vpop.f32.mrf.mxu1 }
 0x2f8   :  { %3184 = vst.msk [vmem:[%s6789_s5 + $0x3d0] sm:$0xff] %vm492_vm0, %v3040_v15  ;;  %v3032_v58 = vadd.f32 %v6517_v12, %v3031_v23 }
 0x2f9   :  { %v3743_v56 = vpop.f32.mrf.mxu1 }
 0x2fa   :  { %3182 = vst.msk [vmem:[%s6789_s5 + $0x3c0] sm:$0xff] %vm492_vm0, %v3032_v58  ;;  %v3043_v1 = vadd.f32 %v6517_v12, %v3743_v56 }
 0x2fb   :  { %v3034_v43 = vpop.f32.mrf.mxu1 }
 0x2fc   :  { %3185 = vst.msk [vmem:[%s6789_s5 + $0x3d8] sm:$0xff] %vm492_vm0, %v3043_v1  ;;  %v3035_v33 = vadd.f32 %v6517_v12, %v3034_v43 }
 0x2fd   :  { %v3746_v46 = vpop.f32.mrf.mxu1 }
 0x2fe   :  { %3183 = vst.msk [vmem:[%s6789_s5 + $0x3c8] sm:$0xff] %vm492_vm0, %v3035_v33  ;;  %v3056_v17 = vadd.f32 %v6517_v12, %v3746_v46 }
 0x2ff   :  { %v3047_v27 = vpop.f32.mrf.mxu1 }
 0x300   :  { %3188 = vst.msk [vmem:[%s6789_s5 + $0x3f0] sm:$0xff] %vm492_vm0, %v3056_v17  ;;  %v3048_v48 = vadd.f32 %v6517_v12, %v3047_v27 }
 0x301   :  { %v3747_v40 = vpop.f32.mrf.mxu1 }
 0x302   :  { %3186 = vst.msk [vmem:[%s6789_s5 + $0x3e0] sm:$0xff] %vm492_vm0, %v3048_v48  ;;  %v3059_v5 = vadd.f32 %v6517_v12, %v3747_v40 }
 0x303   :  { %v3050_v4 = vpop.f32.mrf.mxu1 }
 0x304   :  { %3189 = vst.msk [vmem:[%s6789_s5 + $0x3f8] sm:$0xff] %vm492_vm0, %v3059_v5  ;;  %v3051_v2 = vadd.f32 %v6517_v12, %v3050_v4 }
 0x306   :  { %3187 = vst.msk [vmem:[%s6789_s5 + $0x3e8] sm:$0xff] %vm492_vm0, %v3051_v2 }

</bundles_post_ra>
